<compile_context>
chip_gen: v7x
topology: tpu7x:2x2x1
jax: 0.10.0
libtpu: 0.0.40
codegen_flags: <defaults>
</compile_context>

<pallas_src>
import functools

import jax
import jax.numpy as jnp
from jax import lax
from jax.experimental import pallas as pl
from jax.experimental.pallas import tpu as pltpu

CP = 128   # padded channel count (lane width; also the v5e MXU dimension)
TH = 8     # output rows (H) per tile  -> matmul M = TH * W


def _double_conv_kernel(
    x_ref,                                   # (1, TH, W, CP)  bf16   input tile
    w1_ref, b1_ref, g1_ref, bt1_ref,         # (9*CP, CP) bf16, (1, CP) f32 x3
    w2_ref, b2_ref, g2_ref, bt2_ref,
    out_ref,                                 # (N*H*W, CP) f32  (VMEM-resident output slab)
    x1pad, act1pad,                          # (N, H+2, W+2, CP) f32  spatially padded activations
    patch,                                   # (TH, W, 9*CP) bf16     im2col staging buffer
    conv_buf,                                # (N*H*W, CP) f32        raw (pre-BN) conv output
    s1_sum, s1_sq, s2_sum, s2_sq,            # (1, CP) f32            BN accumulators
    *, N, H, W,
):
    phase = pl.program_id(0)
    n = pl.program_id(1)
    t = pl.program_id(2)

    row0 = t * TH                                        # first output row of this tile
    base = pl.multiple_of((n * H + row0) * W, TH * W)    # flattened output-row offset
    inv_cnt = 1.0 / float(N * H * W)

    # ---------------- phase 0: init scratch + stage x tile into padded VMEM ----------------
    @pl.when(phase == 0)
    def _():
        @pl.when((n == 0) & (t == 0))
        def _():
            x1pad[...] = jnp.zeros_like(x1pad)
            act1pad[...] = jnp.zeros_like(act1pad)
            s1_sum[...] = jnp.zeros_like(s1_sum)
            s1_sq[...] = jnp.zeros_like(s1_sq)
            s2_sum[...] = jnp.zeros_like(s2_sum)
            s2_sq[...] = jnp.zeros_like(s2_sq)

        x1pad[n, pl.ds(1 + row0, TH), pl.ds(1, W), :] = x_ref[0].astype(jnp.float32)

    # ---------------- shared helpers ----------------
    def conv_im2col(src_pad, w_ref, b_ref, ssum, ssq):
        # Build the (TH*W, 9*CP) im2col patch with nine lane-aligned sub-stores, then ONE
        # MXU matmul (bf16 operands, f32 accumulation).
        for dy in range(3):
            for dx in range(3):
                k = (dy * 3 + dx) * CP
                win = src_pad[n, pl.ds(row0 + dy, TH), pl.ds(dx, W), :]   # (TH, W, CP) f32
                patch[:, :, k:k + CP] = win.astype(jnp.bfloat16)
        p2d = patch[...].reshape(TH * W, 9 * CP)
        conv = jnp.dot(p2d, w_ref[...], preferred_element_type=jnp.float32)
        conv = conv + b_ref[...]                                          # (TH*W, CP) f32
        conv_buf[pl.ds(base, TH * W), :] = conv
        # one-pass BatchNorm statistics, accumulated across all tiles / whole batch
        ssum[...] += jnp.sum(conv, axis=0, keepdims=True)
        ssq[...] += jnp.sum(conv * conv, axis=0, keepdims=True)

    def bn_lrelu(ssum, ssq, g_ref, bt_ref):
        mean = ssum[...] * inv_cnt
        var = ssq[...] * inv_cnt - mean * mean            # biased variance (PyTorch train mode)
        scale = lax.rsqrt(var + 1e-5) * g_ref[...]
        shift = bt_ref[...] - mean * scale
        y = conv_buf[pl.ds(base, TH * W), :] * scale + shift
        return jnp.where(y > 0, y, 0.2 * y)               # LeakyReLU(0.2)

    # ---------------- phase 1: conv1 + BN1 stats ----------------
    @pl.when(phase == 1)
    def _():
        conv_im2col(x1pad, w1_ref, b1_ref, s1_sum, s1_sq)

    # ---------------- phase 2: BN1 + LeakyReLU -> padded layer-1 activation (stays in VMEM) ----
    @pl.when(phase == 2)
    def _():
        y = bn_lrelu(s1_sum, s1_sq, g1_ref, bt1_ref)
        act1pad[n, pl.ds(1 + row0, TH), pl.ds(1, W), :] = y.reshape(TH, W, CP)

    # ---------------- phase 3: conv2 + BN2 stats ----------------
    @pl.when(phase == 3)
    def _():
        conv_im2col(act1pad, w2_ref, b2_ref, s2_sum, s2_sq)

    # ---------------- phase 4: BN2 + LeakyReLU -> lane-dense output slab ----------------
    @pl.when(phase == 4)
    def _():
        out_ref[pl.ds(base, TH * W), :] = bn_lrelu(s2_sum, s2_sq, g2_ref, bt2_ref)


def _prep_weight(w, cin, cout):
    """(3,3,cin,cout) -> zero-padded (3,3,CP,CP) -> im2col layout (9*CP, CP), bf16."""
    wp = jnp.zeros((3, 3, CP, CP), jnp.float32)
    wp = wp.at[:, :, :cin, :cout].set(w.astype(jnp.float32))
    return wp.reshape(9 * CP, CP).astype(jnp.bfloat16)


def _prep_vec(v, cout):
    """Per-channel vector zero-padded to (1, CP) f32 (padded lanes stay exactly 0)."""
    return jnp.zeros((1, CP), jnp.float32).at[0, :cout].set(v.astype(jnp.float32))


@jax.jit
def double_conv(x_nchw, params):
    """Forward of DoubleConv. Input/output in PyTorch NCHW."""
    N, Cin, H, W = x_nchw.shape
    Cout = params["w1"].shape[-1]
    assert Cin <= CP and Cout <= CP and H % TH == 0

    # NCHW -> NHWC once at the boundary, bf16 matmul operands, channels padded to CP.
    x = jnp.transpose(x_nchw, (0, 2, 3, 1)).astype(jnp.bfloat16)
    x = jnp.pad(x, ((0, 0), (0, 0), (0, 0), (0, CP - Cin)))

    w1 = _prep_weight(params["w1"], Cin, Cout)
    w2 = _prep_weight(params["w2"], Cout, Cout)
    b1 = _prep_vec(params["b1"], Cout)
    g1 = _prep_vec(params["g1"], Cout)
    bt1 = _prep_vec(params["be1"], Cout)
    b2 = _prep_vec(params["b2"], Cout)
    g2 = _prep_vec(params["g2"], Cout)
    bt2 = _prep_vec(params["be2"], Cout)

    n_t = H // TH
    kernel = functools.partial(_double_conv_kernel, N=N, H=H, W=W)
    const2 = lambda p, n, t: (0, 0)

    grid_spec = pltpu.PrefetchScalarGridSpec(
        num_scalar_prefetch=0,
        grid=(5, N, n_t),
        in_specs=[
            pl.BlockSpec((1, TH, W, CP), lambda p, n, t: (n, t, 0, 0)),   # x tiles
            pl.BlockSpec((9 * CP, CP), const2),                            # w1 (im2col layout)
            pl.BlockSpec((1, CP), const2),                                 # b1
            pl.BlockSpec((1, CP), const2),                                 # gamma1
            pl.BlockSpec((1, CP), const2),                                 # beta1
            pl.BlockSpec((9 * CP, CP), const2),                            # w2 (im2col layout)
            pl.BlockSpec((1, CP), const2),                                 # b2
            pl.BlockSpec((1, CP), const2),                                 # gamma2
            pl.BlockSpec((1, CP), const2),                                 # beta2
        ],
        out_specs=pl.BlockSpec((N * H * W, CP), const2),                   # resident output slab
        scratch_shapes=[
            pltpu.VMEM((N, H + 2, W + 2, CP), jnp.float32),   # x1pad  (padded input)
            pltpu.VMEM((N, H + 2, W + 2, CP), jnp.float32),   # act1pad (padded layer-1 act)
            pltpu.VMEM((TH, W, 9 * CP), jnp.bfloat16),        # im2col patch staging
            pltpu.VMEM((N * H * W, CP), jnp.float32),         # raw conv buffer (reused)
            pltpu.VMEM((1, CP), jnp.float32),                 # s1_sum
            pltpu.VMEM((1, CP), jnp.float32),                 # s1_sq
            pltpu.VMEM((1, CP), jnp.float32),                 # s2_sum
            pltpu.VMEM((1, CP), jnp.float32),                 # s2_sq
        ],
    )

    out_flat = pl.pallas_call(
        kernel,
        grid_spec=grid_spec,
        out_shape=jax.ShapeDtypeStruct((N * H * W, CP), jnp.float32),
        compiler_params=pltpu.CompilerParams(
            dimension_semantics=("arbitrary", "arbitrary", "arbitrary"),
            vmem_limit_bytes=32 * 1024 * 1024,
        ),
    )(x, w1, b1, g1, bt1, w2, b2, g2, bt2)

    out = out_flat.reshape(N, H, W, CP)[..., :Cout]
    return jnp.transpose(out, (0, 3, 1, 2))   # NHWC -> NCHW


def init_double_conv_params(key, in_channels, out_channels):
    """Deterministic parameter init (PyTorch-style uniform bounds for conv, BN defaults)."""
    k1, k2, k3, k4 = jax.random.split(key, 4)

    def conv_init(kw, kb, cin, cout):
        fan_in = cin * 3 * 3
        bound = 1.0 / jnp.sqrt(fan_in)
        # PyTorch layout (cout, cin, 3, 3) -> kernel layout (3, 3, cin, cout)
        w_pt = jax.random.uniform(kw, (cout, cin, 3, 3), jnp.float32, -bound, bound)
        w = jnp.transpose(w_pt, (2, 3, 1, 0))
        b = jax.random.uniform(kb, (cout,), jnp.float32, -bound, bound)
        return w, b

    w1, b1 = conv_init(k1, k2, in_channels, out_channels)
    w2, b2 = conv_init(k3, k4, out_channels, out_channels)
    ones = jnp.ones((out_channels,), jnp.float32)
    zeros = jnp.zeros((out_channels,), jnp.float32)
    return dict(w1=w1, b1=b1, g1=ones, be1=zeros,
                w2=w2, b2=b2, g2=ones, be2=zeros)


def _reference_double_conv(x_nchw, params):
    """Pure-JAX f32 reference (XLA conv) for a correctness sanity check."""
    def layer(x, w, b, g, be):
        y = lax.conv_general_dilated(
            x, w, window_strides=(1, 1), padding=((1, 1), (1, 1)),
            dimension_numbers=("NCHW", "HWIO", "NCHW"))
        y = y + b[None, :, None, None]
        mean = jnp.mean(y, axis=(0, 2, 3), keepdims=True)
        var = jnp.mean((y - mean) ** 2, axis=(0, 2, 3), keepdims=True)
        y = (y - mean) * lax.rsqrt(var + 1e-5)
        y = y * g[None, :, None, None] + be[None, :, None, None]
        return jnp.where(y > 0, y, 0.2 * y)

    x = layer(x_nchw, params["w1"], params["b1"], params["g1"], params["be1"])
    x = layer(x, params["w2"], params["b2"], params["g2"], params["be2"])
    return x


if __name__ == "__main__":
    key = jax.random.PRNGKey(0)
    k_x, k_p = jax.random.split(key)

    in_channels, out_channels = 4, 8
    x = jax.random.normal(k_x, (2, in_channels, 16, 16), jnp.float32)  # NCHW
    params = init_double_conv_params(k_p, in_channels, out_channels)

    out = jax.block_until_ready(double_conv(x, params))
    assert out.shape == (2, out_channels, 16, 16)

    ref = jax.block_until_ready(_reference_double_conv(x, params))
    max_err = float(jnp.max(jnp.abs(out - ref)))
    # bf16 matmul operands (f32 accumulation) -> slightly looser tolerance than pure f32.
    assert jnp.allclose(out, ref, rtol=2e-2, atol=2e-2), f"mismatch vs reference (max abs err {max_err})"

    print("KERNEL_OK")
</pallas_src>

<mosaic_0001>
module attributes {stable_mosaic.version = 11 : i64} {
  func.func @_double_conv_kernel(%arg0: i32, %arg1: i32, %arg2: i32, %arg3: memref<1x8x16x128xbf16, #tpu.memory_space<vmem>>, %arg4: memref<1152x128xbf16, #tpu.memory_space<vmem>>, %arg5: memref<1x128xf32, #tpu.memory_space<vmem>>, %arg6: memref<1x128xf32, #tpu.memory_space<vmem>>, %arg7: memref<1x128xf32, #tpu.memory_space<vmem>>, %arg8: memref<1152x128xbf16, #tpu.memory_space<vmem>>, %arg9: memref<1x128xf32, #tpu.memory_space<vmem>>, %arg10: memref<1x128xf32, #tpu.memory_space<vmem>>, %arg11: memref<1x128xf32, #tpu.memory_space<vmem>>, %arg12: memref<512x128xf32, #tpu.memory_space<vmem>>, %arg13: memref<2x18x18x128xf32, #tpu.memory_space<vmem>>, %arg14: memref<2x18x18x128xf32, #tpu.memory_space<vmem>>, %arg15: memref<8x16x1152xbf16, #tpu.memory_space<vmem>>, %arg16: memref<512x128xf32, #tpu.memory_space<vmem>>, %arg17: memref<1x128xf32, #tpu.memory_space<vmem>>, %arg18: memref<1x128xf32, #tpu.memory_space<vmem>>, %arg19: memref<1x128xf32, #tpu.memory_space<vmem>>, %arg20: memref<1x128xf32, #tpu.memory_space<vmem>>) attributes {dimension_semantics = [#tpu.dimension_semantics<arbitrary>, #tpu.dimension_semantics<arbitrary>, #tpu.dimension_semantics<arbitrary>], iteration_bounds = array<i64: 5, 2, 2>, scalar_prefetch = 0 : i64, scratch_operands = 8 : i64, tpu.core_type = #tpu.core_type<tc>, window_params = [{transform_indices = @transform_0, window_bounds = array<i64: 1, 8, 16, 128>}, {pipeline_mode = #tpu.pipeline_mode<synchronous>, transform_indices = @transform_1, window_bounds = array<i64: 1152, 128>}, {pipeline_mode = #tpu.pipeline_mode<synchronous>, transform_indices = @transform_2, window_bounds = array<i64: 1, 128>}, {pipeline_mode = #tpu.pipeline_mode<synchronous>, transform_indices = @transform_3, window_bounds = array<i64: 1, 128>}, {pipeline_mode = #tpu.pipeline_mode<synchronous>, transform_indices = @transform_4, window_bounds = array<i64: 1, 128>}, {pipeline_mode = #tpu.pipeline_mode<synchronous>, transform_indices = @transform_5, window_bounds = array<i64: 1152, 128>}, {pipeline_mode = #tpu.pipeline_mode<synchronous>, transform_indices = @transform_6, window_bounds = array<i64: 1, 128>}, {pipeline_mode = #tpu.pipeline_mode<synchronous>, transform_indices = @transform_7, window_bounds = array<i64: 1, 128>}, {pipeline_mode = #tpu.pipeline_mode<synchronous>, transform_indices = @transform_8, window_bounds = array<i64: 1, 128>}, {pipeline_mode = #tpu.pipeline_mode<synchronous>, transform_indices = @transform_9, window_bounds = array<i64: 512, 128>}]} {
    %c8_i32 = arith.constant 8 : i32
    %0 = arith.muli %arg2, %c8_i32 : i32
    %c16_i32 = arith.constant 16 : i32
    %1 = arith.muli %arg1, %c16_i32 : i32
    %2 = arith.addi %1, %0 : i32
    %c16_i32_0 = arith.constant 16 : i32
    %3 = arith.muli %2, %c16_i32_0 : i32
    %4 = tpu.assume_multiple %3, 128 : i32
    %c0_i32 = arith.constant 0 : i32
    %5 = arith.cmpi eq, %arg0, %c0_i32 : i32
    %6 = arith.extui %5 : i1 to i32
    %c0_i32_1 = arith.constant 0 : i32
    %7 = arith.cmpi ne, %6, %c0_i32_1 : i32
    scf.if %7 {
      %c0_i32_6 = arith.constant 0 : i32
      %20 = arith.cmpi eq, %arg1, %c0_i32_6 : i32
      %c0_i32_7 = arith.constant 0 : i32
      %21 = arith.cmpi eq, %arg2, %c0_i32_7 : i32
      %22 = arith.andi %20, %21 : i1
      %23 = arith.extui %22 : i1 to i32
      %c0_i32_8 = arith.constant 0 : i32
      %24 = arith.cmpi ne, %23, %c0_i32_8 : i32
      scf.if %24 {
        %cst = arith.constant 0.000000e+00 : f32
        %34 = vector.broadcast %cst : f32 to vector<2x18x18x128xf32>
        %c0_14 = arith.constant 0 : index
        %c0_15 = arith.constant 0 : index
        %c0_16 = arith.constant 0 : index
        %c0_17 = arith.constant 0 : index
        %35 = vector.load %arg13[%c0_14, %c0_15, %c0_16, %c0_17] : memref<2x18x18x128xf32, #tpu.memory_space<vmem>>, vector<2x18x18x128xf32>
        tpu.vector_store %arg13[%c0_14, %c0_15, %c0_16, %c0_17], %34 {strides = array<i32>} : memref<2x18x18x128xf32, #tpu.memory_space<vmem>>, vector<2x18x18x128xf32>,
        %cst_18 = arith.constant 0.000000e+00 : f32
        %36 = vector.broadcast %cst_18 : f32 to vector<2x18x18x128xf32>
        %c0_19 = arith.constant 0 : index
        %c0_20 = arith.constant 0 : index
        %c0_21 = arith.constant 0 : index
        %c0_22 = arith.constant 0 : index
        %37 = vector.load %arg14[%c0_19, %c0_20, %c0_21, %c0_22] : memref<2x18x18x128xf32, #tpu.memory_space<vmem>>, vector<2x18x18x128xf32>
        tpu.vector_store %arg14[%c0_19, %c0_20, %c0_21, %c0_22], %36 {strides = array<i32>} : memref<2x18x18x128xf32, #tpu.memory_space<vmem>>, vector<2x18x18x128xf32>,
        %cst_23 = arith.constant 0.000000e+00 : f32
        %38 = vector.broadcast %cst_23 : f32 to vector<1x128xf32>
        %c0_24 = arith.constant 0 : index
        %c0_25 = arith.constant 0 : index
        %39 = vector.load %arg17[%c0_24, %c0_25] : memref<1x128xf32, #tpu.memory_space<vmem>>, vector<1x128xf32>
        tpu.vector_store %arg17[%c0_24, %c0_25], %38 {strides = array<i32>} : memref<1x128xf32, #tpu.memory_space<vmem>>, vector<1x128xf32>,
        %cst_26 = arith.constant 0.000000e+00 : f32
        %40 = vector.broadcast %cst_26 : f32 to vector<1x128xf32>
        %c0_27 = arith.constant 0 : index
        %c0_28 = arith.constant 0 : index
        %41 = vector.load %arg18[%c0_27, %c0_28] : memref<1x128xf32, #tpu.memory_space<vmem>>, vector<1x128xf32>
        tpu.vector_store %arg18[%c0_27, %c0_28], %40 {strides = array<i32>} : memref<1x128xf32, #tpu.memory_space<vmem>>, vector<1x128xf32>,
        %cst_29 = arith.constant 0.000000e+00 : f32
        %42 = vector.broadcast %cst_29 : f32 to vector<1x128xf32>
        %c0_30 = arith.constant 0 : index
        %c0_31 = arith.constant 0 : index
        %43 = vector.load %arg19[%c0_30, %c0_31] : memref<1x128xf32, #tpu.memory_space<vmem>>, vector<1x128xf32>
        tpu.vector_store %arg19[%c0_30, %c0_31], %42 {strides = array<i32>} : memref<1x128xf32, #tpu.memory_space<vmem>>, vector<1x128xf32>,
        %cst_32 = arith.constant 0.000000e+00 : f32
        %44 = vector.broadcast %cst_32 : f32 to vector<1x128xf32>
        %c0_33 = arith.constant 0 : index
        %c0_34 = arith.constant 0 : index
        %45 = vector.load %arg20[%c0_33, %c0_34] : memref<1x128xf32, #tpu.memory_space<vmem>>, vector<1x128xf32>
        tpu.vector_store %arg20[%c0_33, %c0_34], %44 {strides = array<i32>} : memref<1x128xf32, #tpu.memory_space<vmem>>, vector<1x128xf32>,
      } else {
      }
      %c0 = arith.constant 0 : index
      %c0_9 = arith.constant 0 : index
      %c0_10 = arith.constant 0 : index
      %c0_11 = arith.constant 0 : index
      %25 = vector.load %arg3[%c0, %c0_9, %c0_10, %c0_11] : memref<1x8x16x128xbf16, #tpu.memory_space<vmem>>, vector<1x8x16x128xbf16>
      %26 = vector.shape_cast %25 : vector<1x8x16x128xbf16> to vector<8x16x128xbf16>
      %27 = arith.extf %26 : vector<8x16x128xbf16> to vector<8x16x128xf32>
      %c1_i32_12 = arith.constant 1 : i32
      %28 = arith.addi %c1_i32_12, %0 : i32
      %29 = arith.index_cast %arg1 : i32 to index
      %30 = arith.index_cast %28 : i32 to index
      %c1 = arith.constant 1 : index
      %c0_13 = arith.constant 0 : index
      %31 = vector.load %arg13[%29, %30, %c1, %c0_13] : memref<2x18x18x128xf32, #tpu.memory_space<vmem>>, vector<1x8x16x128xf32>
      %32 = vector.shape_cast %31 : vector<1x8x16x128xf32> to vector<8x16x128xf32>
      %33 = vector.shape_cast %27 : vector<8x16x128xf32> to vector<1x8x16x128xf32>
      tpu.vector_store %arg13[%29, %30, %c1, %c0_13], %33 {strides = array<i32>} : memref<2x18x18x128xf32, #tpu.memory_space<vmem>>, vector<1x8x16x128xf32>,
    } else {
    }
    %c1_i32 = arith.constant 1 : i32
    %8 = arith.cmpi eq, %arg0, %c1_i32 : i32
    %9 = arith.extui %8 : i1 to i32
    %c0_i32_2 = arith.constant 0 : i32
    %10 = arith.cmpi ne, %9, %c0_i32_2 : i32
    scf.if %10 {
      %c0_i32_6 = arith.constant 0 : i32
      %20 = arith.addi %0, %c0_i32_6 : i32
      %21 = arith.index_cast %arg1 : i32 to index
      %22 = arith.index_cast %20 : i32 to index
      %c0 = arith.constant 0 : index
      %c0_7 = arith.constant 0 : index
      %23 = vector.load %arg13[%21, %22, %c0, %c0_7] : memref<2x18x18x128xf32, #tpu.memory_space<vmem>>, vector<1x8x16x128xf32>
      %24 = vector.shape_cast %23 : vector<1x8x16x128xf32> to vector<8x16x128xf32>
      %25 = arith.truncf %24 : vector<8x16x128xf32> to vector<8x16x128xbf16>
      %c0_8 = arith.constant 0 : index
      %c0_9 = arith.constant 0 : index
      %c0_10 = arith.constant 0 : index
      %26 = vector.load %arg15[%c0_8, %c0_9, %c0_10] : memref<8x16x1152xbf16, #tpu.memory_space<vmem>>, vector<8x16x128xbf16>
      tpu.vector_store %arg15[%c0_8, %c0_9, %c0_10], %25 {strides = array<i32>} : memref<8x16x1152xbf16, #tpu.memory_space<vmem>>, vector<8x16x128xbf16>,
      %c0_i32_11 = arith.constant 0 : i32
      %27 = arith.addi %0, %c0_i32_11 : i32
      %28 = arith.index_cast %arg1 : i32 to index
      %29 = arith.index_cast %27 : i32 to index
      %c1 = arith.constant 1 : index
      %c0_12 = arith.constant 0 : index
      %30 = vector.load %arg13[%28, %29, %c1, %c0_12] : memref<2x18x18x128xf32, #tpu.memory_space<vmem>>, vector<1x8x16x128xf32>
      %31 = vector.shape_cast %30 : vector<1x8x16x128xf32> to vector<8x16x128xf32>
      %32 = arith.truncf %31 : vector<8x16x128xf32> to vector<8x16x128xbf16>
      %c0_13 = arith.constant 0 : index
      %c0_14 = arith.constant 0 : index
      %c128 = arith.constant 128 : index
      %33 = vector.load %arg15[%c0_13, %c0_14, %c128] : memref<8x16x1152xbf16, #tpu.memory_space<vmem>>, vector<8x16x128xbf16>
      tpu.vector_store %arg15[%c0_13, %c0_14, %c128], %32 {strides = array<i32>} : memref<8x16x1152xbf16, #tpu.memory_space<vmem>>, vector<8x16x128xbf16>,
      %c0_i32_15 = arith.constant 0 : i32
      %34 = arith.addi %0, %c0_i32_15 : i32
      %35 = arith.index_cast %arg1 : i32 to index
      %36 = arith.index_cast %34 : i32 to index
      %c2 = arith.constant 2 : index
      %c0_16 = arith.constant 0 : index
      %37 = vector.load %arg13[%35, %36, %c2, %c0_16] : memref<2x18x18x128xf32, #tpu.memory_space<vmem>>, vector<1x8x16x128xf32>
      %38 = vector.shape_cast %37 : vector<1x8x16x128xf32> to vector<8x16x128xf32>
      %39 = arith.truncf %38 : vector<8x16x128xf32> to vector<8x16x128xbf16>
      %c0_17 = arith.constant 0 : index
      %c0_18 = arith.constant 0 : index
      %c256 = arith.constant 256 : index
      %40 = vector.load %arg15[%c0_17, %c0_18, %c256] : memref<8x16x1152xbf16, #tpu.memory_space<vmem>>, vector<8x16x128xbf16>
      tpu.vector_store %arg15[%c0_17, %c0_18, %c256], %39 {strides = array<i32>} : memref<8x16x1152xbf16, #tpu.memory_space<vmem>>, vector<8x16x128xbf16>,
      %c1_i32_19 = arith.constant 1 : i32
      %41 = arith.addi %0, %c1_i32_19 : i32
      %42 = arith.index_cast %arg1 : i32 to index
      %43 = arith.index_cast %41 : i32 to index
      %c0_20 = arith.constant 0 : index
      %c0_21 = arith.constant 0 : index
      %44 = vector.load %arg13[%42, %43, %c0_20, %c0_21] : memref<2x18x18x128xf32, #tpu.memory_space<vmem>>, vector<1x8x16x128xf32>
      %45 = vector.shape_cast %44 : vector<1x8x16x128xf32> to vector<8x16x128xf32>
      %46 = arith.truncf %45 : vector<8x16x128xf32> to vector<8x16x128xbf16>
      %c0_22 = arith.constant 0 : index
      %c0_23 = arith.constant 0 : index
      %c384 = arith.constant 384 : index
      %47 = vector.load %arg15[%c0_22, %c0_23, %c384] : memref<8x16x1152xbf16, #tpu.memory_space<vmem>>, vector<8x16x128xbf16>
      tpu.vector_store %arg15[%c0_22, %c0_23, %c384], %46 {strides = array<i32>} : memref<8x16x1152xbf16, #tpu.memory_space<vmem>>, vector<8x16x128xbf16>,
      %c1_i32_24 = arith.constant 1 : i32
      %48 = arith.addi %0, %c1_i32_24 : i32
      %49 = arith.index_cast %arg1 : i32 to index
      %50 = arith.index_cast %48 : i32 to index
      %c1_25 = arith.constant 1 : index
      %c0_26 = arith.constant 0 : index
      %51 = vector.load %arg13[%49, %50, %c1_25, %c0_26] : memref<2x18x18x128xf32, #tpu.memory_space<vmem>>, vector<1x8x16x128xf32>
      %52 = vector.shape_cast %51 : vector<1x8x16x128xf32> to vector<8x16x128xf32>
      %53 = arith.truncf %52 : vector<8x16x128xf32> to vector<8x16x128xbf16>
      %c0_27 = arith.constant 0 : index
      %c0_28 = arith.constant 0 : index
      %c512 = arith.constant 512 : index
      %54 = vector.load %arg15[%c0_27, %c0_28, %c512] : memref<8x16x1152xbf16, #tpu.memory_space<vmem>>, vector<8x16x128xbf16>
      tpu.vector_store %arg15[%c0_27, %c0_28, %c512], %53 {strides = array<i32>} : memref<8x16x1152xbf16, #tpu.memory_space<vmem>>, vector<8x16x128xbf16>,
      %c1_i32_29 = arith.constant 1 : i32
      %55 = arith.addi %0, %c1_i32_29 : i32
      %56 = arith.index_cast %arg1 : i32 to index
      %57 = arith.index_cast %55 : i32 to index
      %c2_30 = arith.constant 2 : index
      %c0_31 = arith.constant 0 : index
      %58 = vector.load %arg13[%56, %57, %c2_30, %c0_31] : memref<2x18x18x128xf32, #tpu.memory_space<vmem>>, vector<1x8x16x128xf32>
      %59 = vector.shape_cast %58 : vector<1x8x16x128xf32> to vector<8x16x128xf32>
      %60 = arith.truncf %59 : vector<8x16x128xf32> to vector<8x16x128xbf16>
      %c0_32 = arith.constant 0 : index
      %c0_33 = arith.constant 0 : index
      %c640 = arith.constant 640 : index
      %61 = vector.load %arg15[%c0_32, %c0_33, %c640] : memref<8x16x1152xbf16, #tpu.memory_space<vmem>>, vector<8x16x128xbf16>
      tpu.vector_store %arg15[%c0_32, %c0_33, %c640], %60 {strides = array<i32>} : memref<8x16x1152xbf16, #tpu.memory_space<vmem>>, vector<8x16x128xbf16>,
      %c2_i32_34 = arith.constant 2 : i32
      %62 = arith.addi %0, %c2_i32_34 : i32
      %63 = arith.index_cast %arg1 : i32 to index
      %64 = arith.index_cast %62 : i32 to index
      %c0_35 = arith.constant 0 : index
      %c0_36 = arith.constant 0 : index
      %65 = vector.load %arg13[%63, %64, %c0_35, %c0_36] : memref<2x18x18x128xf32, #tpu.memory_space<vmem>>, vector<1x8x16x128xf32>
      %66 = vector.shape_cast %65 : vector<1x8x16x128xf32> to vector<8x16x128xf32>
      %67 = arith.truncf %66 : vector<8x16x128xf32> to vector<8x16x128xbf16>
      %c0_37 = arith.constant 0 : index
      %c0_38 = arith.constant 0 : index
      %c768 = arith.constant 768 : index
      %68 = vector.load %arg15[%c0_37, %c0_38, %c768] : memref<8x16x1152xbf16, #tpu.memory_space<vmem>>, vector<8x16x128xbf16>
      tpu.vector_store %arg15[%c0_37, %c0_38, %c768], %67 {strides = array<i32>} : memref<8x16x1152xbf16, #tpu.memory_space<vmem>>, vector<8x16x128xbf16>,
      %c2_i32_39 = arith.constant 2 : i32
      %69 = arith.addi %0, %c2_i32_39 : i32
      %70 = arith.index_cast %arg1 : i32 to index
      %71 = arith.index_cast %69 : i32 to index
      %c1_40 = arith.constant 1 : index
      %c0_41 = arith.constant 0 : index
      %72 = vector.load %arg13[%70, %71, %c1_40, %c0_41] : memref<2x18x18x128xf32, #tpu.memory_space<vmem>>, vector<1x8x16x128xf32>
      %73 = vector.shape_cast %72 : vector<1x8x16x128xf32> to vector<8x16x128xf32>
      %74 = arith.truncf %73 : vector<8x16x128xf32> to vector<8x16x128xbf16>
      %c0_42 = arith.constant 0 : index
      %c0_43 = arith.constant 0 : index
      %c896 = arith.constant 896 : index
      %75 = vector.load %arg15[%c0_42, %c0_43, %c896] : memref<8x16x1152xbf16, #tpu.memory_space<vmem>>, vector<8x16x128xbf16>
      tpu.vector_store %arg15[%c0_42, %c0_43, %c896], %74 {strides = array<i32>} : memref<8x16x1152xbf16, #tpu.memory_space<vmem>>, vector<8x16x128xbf16>,
      %c2_i32_44 = arith.constant 2 : i32
      %76 = arith.addi %0, %c2_i32_44 : i32
      %77 = arith.index_cast %arg1 : i32 to index
      %78 = arith.index_cast %76 : i32 to index
      %c2_45 = arith.constant 2 : index
      %c0_46 = arith.constant 0 : index
      %79 = vector.load %arg13[%77, %78, %c2_45, %c0_46] : memref<2x18x18x128xf32, #tpu.memory_space<vmem>>, vector<1x8x16x128xf32>
      %80 = vector.shape_cast %79 : vector<1x8x16x128xf32> to vector<8x16x128xf32>
      %81 = arith.truncf %80 : vector<8x16x128xf32> to vector<8x16x128xbf16>
      %c0_47 = arith.constant 0 : index
      %c0_48 = arith.constant 0 : index
      %c1024 = arith.constant 1024 : index
      %82 = vector.load %arg15[%c0_47, %c0_48, %c1024] : memref<8x16x1152xbf16, #tpu.memory_space<vmem>>, vector<8x16x128xbf16>
      tpu.vector_store %arg15[%c0_47, %c0_48, %c1024], %81 {strides = array<i32>} : memref<8x16x1152xbf16, #tpu.memory_space<vmem>>, vector<8x16x128xbf16>,
      %c0_49 = arith.constant 0 : index
      %c0_50 = arith.constant 0 : index
      %c0_51 = arith.constant 0 : index
      %83 = vector.load %arg15[%c0_49, %c0_50, %c0_51] : memref<8x16x1152xbf16, #tpu.memory_space<vmem>>, vector<8x16x1152xbf16>
      %84 = vector.shape_cast %83 : vector<8x16x1152xbf16> to vector<128x1152xbf16>
      %c0_52 = arith.constant 0 : index
      %c0_53 = arith.constant 0 : index
      %85 = vector.load %arg4[%c0_52, %c0_53] : memref<1152x128xbf16, #tpu.memory_space<vmem>>, vector<1152x128xbf16>
      %cst = arith.constant dense<0.000000e+00> : vector<128x128xf32>
      %86 = tpu.matmul %84, %85, %cst {dimension_numbers = #tpu.dot_dimension_numbers<[1], [0], [0], [1], [0, 0, 1, 1], [], []>} : vector<128x1152xbf16>, vector<1152x128xbf16>, vector<128x128xf32> -> vector<128x128xf32>
      %c0_54 = arith.constant 0 : index
      %c0_55 = arith.constant 0 : index
      %87 = vector.load %arg5[%c0_54, %c0_55] : memref<1x128xf32, #tpu.memory_space<vmem>>, vector<1x128xf32>
      %88 = vector.broadcast %87 : vector<1x128xf32> to vector<128x128xf32>
      %89 = arith.addf %86, %88 : vector<128x128xf32>
      %90 = arith.index_cast %4 : i32 to index
      %c0_56 = arith.constant 0 : index
      %91 = vector.load %arg16[%90, %c0_56] : memref<512x128xf32, #tpu.memory_space<vmem>>, vector<128x128xf32>
      tpu.vector_store %arg16[%90, %c0_56], %89 {strides = array<i32>} : memref<512x128xf32, #tpu.memory_space<vmem>>, vector<128x128xf32>,
      %c0_57 = arith.constant 0 : index
      %c0_58 = arith.constant 0 : index
      %92 = vector.load %arg17[%c0_57, %c0_58] : memref<1x128xf32, #tpu.memory_space<vmem>>, vector<1x128xf32>
      %cst_59 = arith.constant dense<0.000000e+00> : vector<128xf32>
      %93 = vector.multi_reduction <add>, %89, %cst_59 [0] : vector<128x128xf32> to vector<128xf32>
      %94 = vector.shape_cast %93 : vector<128xf32> to vector<1x128xf32>
      %95 = arith.addf %92, %94 : vector<1x128xf32>
      %c0_60 = arith.constant 0 : index
      %c0_61 = arith.constant 0 : index
      %96 = vector.load %arg17[%c0_60, %c0_61] : memref<1x128xf32, #tpu.memory_space<vmem>>, vector<1x128xf32>
      tpu.vector_store %arg17[%c0_60, %c0_61], %95 {strides = array<i32>} : memref<1x128xf32, #tpu.memory_space<vmem>>, vector<1x128xf32>,
      %c0_62 = arith.constant 0 : index
      %c0_63 = arith.constant 0 : index
      %97 = vector.load %arg18[%c0_62, %c0_63] : memref<1x128xf32, #tpu.memory_space<vmem>>, vector<1x128xf32>
      %98 = arith.mulf %89, %89 : vector<128x128xf32>
      %cst_64 = arith.constant dense<0.000000e+00> : vector<128xf32>
      %99 = vector.multi_reduction <add>, %98, %cst_64 [0] : vector<128x128xf32> to vector<128xf32>
      %100 = vector.shape_cast %99 : vector<128xf32> to vector<1x128xf32>
      %101 = arith.addf %97, %100 : vector<1x128xf32>
      %c0_65 = arith.constant 0 : index
      %c0_66 = arith.constant 0 : index
      %102 = vector.load %arg18[%c0_65, %c0_66] : memref<1x128xf32, #tpu.memory_space<vmem>>, vector<1x128xf32>
      tpu.vector_store %arg18[%c0_65, %c0_66], %101 {strides = array<i32>} : memref<1x128xf32, #tpu.memory_space<vmem>>, vector<1x128xf32>,
    } else {
    }
    %c2_i32 = arith.constant 2 : i32
    %11 = arith.cmpi eq, %arg0, %c2_i32 : i32
    %12 = arith.extui %11 : i1 to i32
    %c0_i32_3 = arith.constant 0 : i32
    %13 = arith.cmpi ne, %12, %c0_i32_3 : i32
    scf.if %13 {
      %c0 = arith.constant 0 : index
      %c0_6 = arith.constant 0 : index
      %20 = vector.load %arg17[%c0, %c0_6] : memref<1x128xf32, #tpu.memory_space<vmem>>, vector<1x128xf32>
      %cst = arith.constant 0.001953125 : f32
      %21 = vector.broadcast %cst : f32 to vector<1x128xf32>
      %22 = arith.mulf %20, %21 : vector<1x128xf32>
      %c0_7 = arith.constant 0 : index
      %c0_8 = arith.constant 0 : index
      %23 = vector.load %arg18[%c0_7, %c0_8] : memref<1x128xf32, #tpu.memory_space<vmem>>, vector<1x128xf32>
      %cst_9 = arith.constant 0.001953125 : f32
      %24 = vector.broadcast %cst_9 : f32 to vector<1x128xf32>
      %25 = arith.mulf %23, %24 : vector<1x128xf32>
      %26 = arith.mulf %22, %22 : vector<1x128xf32>
      %27 = arith.subf %25, %26 : vector<1x128xf32>
      %cst_10 = arith.constant 9.99999974E-6 : f32
      %28 = vector.broadcast %cst_10 : f32 to vector<1x128xf32>
      %29 = arith.addf %27, %28 : vector<1x128xf32>
      %30 = math.rsqrt %29 : vector<1x128xf32>
      %c0_11 = arith.constant 0 : index
      %c0_12 = arith.constant 0 : index
      %31 = vector.load %arg6[%c0_11, %c0_12] : memref<1x128xf32, #tpu.memory_space<vmem>>, vector<1x128xf32>
      %32 = arith.mulf %30, %31 : vector<1x128xf32>
      %c0_13 = arith.constant 0 : index
      %c0_14 = arith.constant 0 : index
      %33 = vector.load %arg7[%c0_13, %c0_14] : memref<1x128xf32, #tpu.memory_space<vmem>>, vector<1x128xf32>
      %34 = arith.mulf %22, %32 : vector<1x128xf32>
      %35 = arith.subf %33, %34 : vector<1x128xf32>
      %36 = arith.index_cast %4 : i32 to index
      %c0_15 = arith.constant 0 : index
      %37 = vector.load %arg16[%36, %c0_15] : memref<512x128xf32, #tpu.memory_space<vmem>>, vector<128x128xf32>
      %38 = vector.broadcast %32 : vector<1x128xf32> to vector<128x128xf32>
      %39 = arith.mulf %37, %38 : vector<128x128xf32>
      %40 = vector.broadcast %35 : vector<1x128xf32> to vector<128x128xf32>
      %41 = arith.addf %39, %40 : vector<128x128xf32>
      %cst_16 = arith.constant 0.000000e+00 : f32
      %42 = vector.broadcast %cst_16 : f32 to vector<128x128xf32>
      %43 = arith.cmpf ogt, %41, %42 : vector<128x128xf32>
      %cst_17 = arith.constant 2.000000e-01 : f32
      %44 = vector.broadcast %cst_17 : f32 to vector<128x128xf32>
      %45 = arith.mulf %44, %41 : vector<128x128xf32>
      %46 = arith.select %43, %41, %45 : vector<128x128xi1>, vector<128x128xf32>
      %47 = vector.shape_cast %46 : vector<128x128xf32> to vector<8x16x128xf32>
      %c1_i32_18 = arith.constant 1 : i32
      %48 = arith.addi %c1_i32_18, %0 : i32
      %49 = arith.index_cast %arg1 : i32 to index
      %50 = arith.index_cast %48 : i32 to index
      %c1 = arith.constant 1 : index
      %c0_19 = arith.constant 0 : index
      %51 = vector.load %arg14[%49, %50, %c1, %c0_19] : memref<2x18x18x128xf32, #tpu.memory_space<vmem>>, vector<1x8x16x128xf32>
      %52 = vector.shape_cast %51 : vector<1x8x16x128xf32> to vector<8x16x128xf32>
      %53 = vector.shape_cast %47 : vector<8x16x128xf32> to vector<1x8x16x128xf32>
      tpu.vector_store %arg14[%49, %50, %c1, %c0_19], %53 {strides = array<i32>} : memref<2x18x18x128xf32, #tpu.memory_space<vmem>>, vector<1x8x16x128xf32>,
    } else {
    }
    %c3_i32 = arith.constant 3 : i32
    %14 = arith.cmpi eq, %arg0, %c3_i32 : i32
    %15 = arith.extui %14 : i1 to i32
    %c0_i32_4 = arith.constant 0 : i32
    %16 = arith.cmpi ne, %15, %c0_i32_4 : i32
    scf.if %16 {
      %c0_i32_6 = arith.constant 0 : i32
      %20 = arith.addi %0, %c0_i32_6 : i32
      %21 = arith.index_cast %arg1 : i32 to index
      %22 = arith.index_cast %20 : i32 to index
      %c0 = arith.constant 0 : index
      %c0_7 = arith.constant 0 : index
      %23 = vector.load %arg14[%21, %22, %c0, %c0_7] : memref<2x18x18x128xf32, #tpu.memory_space<vmem>>, vector<1x8x16x128xf32>
      %24 = vector.shape_cast %23 : vector<1x8x16x128xf32> to vector<8x16x128xf32>
      %25 = arith.truncf %24 : vector<8x16x128xf32> to vector<8x16x128xbf16>
      %c0_8 = arith.constant 0 : index
      %c0_9 = arith.constant 0 : index
      %c0_10 = arith.constant 0 : index
      %26 = vector.load %arg15[%c0_8, %c0_9, %c0_10] : memref<8x16x1152xbf16, #tpu.memory_space<vmem>>, vector<8x16x128xbf16>
      tpu.vector_store %arg15[%c0_8, %c0_9, %c0_10], %25 {strides = array<i32>} : memref<8x16x1152xbf16, #tpu.memory_space<vmem>>, vector<8x16x128xbf16>,
      %c0_i32_11 = arith.constant 0 : i32
      %27 = arith.addi %0, %c0_i32_11 : i32
      %28 = arith.index_cast %arg1 : i32 to index
      %29 = arith.index_cast %27 : i32 to index
      %c1 = arith.constant 1 : index
      %c0_12 = arith.constant 0 : index
      %30 = vector.load %arg14[%28, %29, %c1, %c0_12] : memref<2x18x18x128xf32, #tpu.memory_space<vmem>>, vector<1x8x16x128xf32>
      %31 = vector.shape_cast %30 : vector<1x8x16x128xf32> to vector<8x16x128xf32>
      %32 = arith.truncf %31 : vector<8x16x128xf32> to vector<8x16x128xbf16>
      %c0_13 = arith.constant 0 : index
      %c0_14 = arith.constant 0 : index
      %c128 = arith.constant 128 : index
      %33 = vector.load %arg15[%c0_13, %c0_14, %c128] : memref<8x16x1152xbf16, #tpu.memory_space<vmem>>, vector<8x16x128xbf16>
      tpu.vector_store %arg15[%c0_13, %c0_14, %c128], %32 {strides = array<i32>} : memref<8x16x1152xbf16, #tpu.memory_space<vmem>>, vector<8x16x128xbf16>,
      %c0_i32_15 = arith.constant 0 : i32
      %34 = arith.addi %0, %c0_i32_15 : i32
      %35 = arith.index_cast %arg1 : i32 to index
      %36 = arith.index_cast %34 : i32 to index
      %c2 = arith.constant 2 : index
      %c0_16 = arith.constant 0 : index
      %37 = vector.load %arg14[%35, %36, %c2, %c0_16] : memref<2x18x18x128xf32, #tpu.memory_space<vmem>>, vector<1x8x16x128xf32>
      %38 = vector.shape_cast %37 : vector<1x8x16x128xf32> to vector<8x16x128xf32>
      %39 = arith.truncf %38 : vector<8x16x128xf32> to vector<8x16x128xbf16>
      %c0_17 = arith.constant 0 : index
      %c0_18 = arith.constant 0 : index
      %c256 = arith.constant 256 : index
      %40 = vector.load %arg15[%c0_17, %c0_18, %c256] : memref<8x16x1152xbf16, #tpu.memory_space<vmem>>, vector<8x16x128xbf16>
      tpu.vector_store %arg15[%c0_17, %c0_18, %c256], %39 {strides = array<i32>} : memref<8x16x1152xbf16, #tpu.memory_space<vmem>>, vector<8x16x128xbf16>,
      %c1_i32_19 = arith.constant 1 : i32
      %41 = arith.addi %0, %c1_i32_19 : i32
      %42 = arith.index_cast %arg1 : i32 to index
      %43 = arith.index_cast %41 : i32 to index
      %c0_20 = arith.constant 0 : index
      %c0_21 = arith.constant 0 : index
      %44 = vector.load %arg14[%42, %43, %c0_20, %c0_21] : memref<2x18x18x128xf32, #tpu.memory_space<vmem>>, vector<1x8x16x128xf32>
      %45 = vector.shape_cast %44 : vector<1x8x16x128xf32> to vector<8x16x128xf32>
      %46 = arith.truncf %45 : vector<8x16x128xf32> to vector<8x16x128xbf16>
      %c0_22 = arith.constant 0 : index
      %c0_23 = arith.constant 0 : index
      %c384 = arith.constant 384 : index
      %47 = vector.load %arg15[%c0_22, %c0_23, %c384] : memref<8x16x1152xbf16, #tpu.memory_space<vmem>>, vector<8x16x128xbf16>
      tpu.vector_store %arg15[%c0_22, %c0_23, %c384], %46 {strides = array<i32>} : memref<8x16x1152xbf16, #tpu.memory_space<vmem>>, vector<8x16x128xbf16>,
      %c1_i32_24 = arith.constant 1 : i32
      %48 = arith.addi %0, %c1_i32_24 : i32
      %49 = arith.index_cast %arg1 : i32 to index
      %50 = arith.index_cast %48 : i32 to index
      %c1_25 = arith.constant 1 : index
      %c0_26 = arith.constant 0 : index
      %51 = vector.load %arg14[%49, %50, %c1_25, %c0_26] : memref<2x18x18x128xf32, #tpu.memory_space<vmem>>, vector<1x8x16x128xf32>
      %52 = vector.shape_cast %51 : vector<1x8x16x128xf32> to vector<8x16x128xf32>
      %53 = arith.truncf %52 : vector<8x16x128xf32> to vector<8x16x128xbf16>
      %c0_27 = arith.constant 0 : index
      %c0_28 = arith.constant 0 : index
      %c512 = arith.constant 512 : index
      %54 = vector.load %arg15[%c0_27, %c0_28, %c512] : memref<8x16x1152xbf16, #tpu.memory_space<vmem>>, vector<8x16x128xbf16>
      tpu.vector_store %arg15[%c0_27, %c0_28, %c512], %53 {strides = array<i32>} : memref<8x16x1152xbf16, #tpu.memory_space<vmem>>, vector<8x16x128xbf16>,
      %c1_i32_29 = arith.constant 1 : i32
      %55 = arith.addi %0, %c1_i32_29 : i32
      %56 = arith.index_cast %arg1 : i32 to index
      %57 = arith.index_cast %55 : i32 to index
      %c2_30 = arith.constant 2 : index
      %c0_31 = arith.constant 0 : index
      %58 = vector.load %arg14[%56, %57, %c2_30, %c0_31] : memref<2x18x18x128xf32, #tpu.memory_space<vmem>>, vector<1x8x16x128xf32>
      %59 = vector.shape_cast %58 : vector<1x8x16x128xf32> to vector<8x16x128xf32>
      %60 = arith.truncf %59 : vector<8x16x128xf32> to vector<8x16x128xbf16>
      %c0_32 = arith.constant 0 : index
      %c0_33 = arith.constant 0 : index
      %c640 = arith.constant 640 : index
      %61 = vector.load %arg15[%c0_32, %c0_33, %c640] : memref<8x16x1152xbf16, #tpu.memory_space<vmem>>, vector<8x16x128xbf16>
      tpu.vector_store %arg15[%c0_32, %c0_33, %c640], %60 {strides = array<i32>} : memref<8x16x1152xbf16, #tpu.memory_space<vmem>>, vector<8x16x128xbf16>,
      %c2_i32_34 = arith.constant 2 : i32
      %62 = arith.addi %0, %c2_i32_34 : i32
      %63 = arith.index_cast %arg1 : i32 to index
      %64 = arith.index_cast %62 : i32 to index
      %c0_35 = arith.constant 0 : index
      %c0_36 = arith.constant 0 : index
      %65 = vector.load %arg14[%63, %64, %c0_35, %c0_36] : memref<2x18x18x128xf32, #tpu.memory_space<vmem>>, vector<1x8x16x128xf32>
      %66 = vector.shape_cast %65 : vector<1x8x16x128xf32> to vector<8x16x128xf32>
      %67 = arith.truncf %66 : vector<8x16x128xf32> to vector<8x16x128xbf16>
      %c0_37 = arith.constant 0 : index
      %c0_38 = arith.constant 0 : index
      %c768 = arith.constant 768 : index
      %68 = vector.load %arg15[%c0_37, %c0_38, %c768] : memref<8x16x1152xbf16, #tpu.memory_space<vmem>>, vector<8x16x128xbf16>
      tpu.vector_store %arg15[%c0_37, %c0_38, %c768], %67 {strides = array<i32>} : memref<8x16x1152xbf16, #tpu.memory_space<vmem>>, vector<8x16x128xbf16>,
      %c2_i32_39 = arith.constant 2 : i32
      %69 = arith.addi %0, %c2_i32_39 : i32
      %70 = arith.index_cast %arg1 : i32 to index
      %71 = arith.index_cast %69 : i32 to index
      %c1_40 = arith.constant 1 : index
      %c0_41 = arith.constant 0 : index
      %72 = vector.load %arg14[%70, %71, %c1_40, %c0_41] : memref<2x18x18x128xf32, #tpu.memory_space<vmem>>, vector<1x8x16x128xf32>
      %73 = vector.shape_cast %72 : vector<1x8x16x128xf32> to vector<8x16x128xf32>
      %74 = arith.truncf %73 : vector<8x16x128xf32> to vector<8x16x128xbf16>
      %c0_42 = arith.constant 0 : index
      %c0_43 = arith.constant 0 : index
      %c896 = arith.constant 896 : index
      %75 = vector.load %arg15[%c0_42, %c0_43, %c896] : memref<8x16x1152xbf16, #tpu.memory_space<vmem>>, vector<8x16x128xbf16>
      tpu.vector_store %arg15[%c0_42, %c0_43, %c896], %74 {strides = array<i32>} : memref<8x16x1152xbf16, #tpu.memory_space<vmem>>, vector<8x16x128xbf16>,
      %c2_i32_44 = arith.constant 2 : i32
      %76 = arith.addi %0, %c2_i32_44 : i32
      %77 = arith.index_cast %arg1 : i32 to index
      %78 = arith.index_cast %76 : i32 to index
      %c2_45 = arith.constant 2 : index
      %c0_46 = arith.constant 0 : index
      %79 = vector.load %arg14[%77, %78, %c2_45, %c0_46] : memref<2x18x18x128xf32, #tpu.memory_space<vmem>>, vector<1x8x16x128xf32>
      %80 = vector.shape_cast %79 : vector<1x8x16x128xf32> to vector<8x16x128xf32>
      %81 = arith.truncf %80 : vector<8x16x128xf32> to vector<8x16x128xbf16>
      %c0_47 = arith.constant 0 : index
      %c0_48 = arith.constant 0 : index
      %c1024 = arith.constant 1024 : index
      %82 = vector.load %arg15[%c0_47, %c0_48, %c1024] : memref<8x16x1152xbf16, #tpu.memory_space<vmem>>, vector<8x16x128xbf16>
      tpu.vector_store %arg15[%c0_47, %c0_48, %c1024], %81 {strides = array<i32>} : memref<8x16x1152xbf16, #tpu.memory_space<vmem>>, vector<8x16x128xbf16>,
      %c0_49 = arith.constant 0 : index
      %c0_50 = arith.constant 0 : index
      %c0_51 = arith.constant 0 : index
      %83 = vector.load %arg15[%c0_49, %c0_50, %c0_51] : memref<8x16x1152xbf16, #tpu.memory_space<vmem>>, vector<8x16x1152xbf16>
      %84 = vector.shape_cast %83 : vector<8x16x1152xbf16> to vector<128x1152xbf16>
      %c0_52 = arith.constant 0 : index
      %c0_53 = arith.constant 0 : index
      %85 = vector.load %arg8[%c0_52, %c0_53] : memref<1152x128xbf16, #tpu.memory_space<vmem>>, vector<1152x128xbf16>
      %cst = arith.constant dense<0.000000e+00> : vector<128x128xf32>
      %86 = tpu.matmul %84, %85, %cst {dimension_numbers = #tpu.dot_dimension_numbers<[1], [0], [0], [1], [0, 0, 1, 1], [], []>} : vector<128x1152xbf16>, vector<1152x128xbf16>, vector<128x128xf32> -> vector<128x128xf32>
      %c0_54 = arith.constant 0 : index
      %c0_55 = arith.constant 0 : index
      %87 = vector.load %arg9[%c0_54, %c0_55] : memref<1x128xf32, #tpu.memory_space<vmem>>, vector<1x128xf32>
      %88 = vector.broadcast %87 : vector<1x128xf32> to vector<128x128xf32>
      %89 = arith.addf %86, %88 : vector<128x128xf32>
      %90 = arith.index_cast %4 : i32 to index
      %c0_56 = arith.constant 0 : index
      %91 = vector.load %arg16[%90, %c0_56] : memref<512x128xf32, #tpu.memory_space<vmem>>, vector<128x128xf32>
      tpu.vector_store %arg16[%90, %c0_56], %89 {strides = array<i32>} : memref<512x128xf32, #tpu.memory_space<vmem>>, vector<128x128xf32>,
      %c0_57 = arith.constant 0 : index
      %c0_58 = arith.constant 0 : index
      %92 = vector.load %arg19[%c0_57, %c0_58] : memref<1x128xf32, #tpu.memory_space<vmem>>, vector<1x128xf32>
      %cst_59 = arith.constant dense<0.000000e+00> : vector<128xf32>
      %93 = vector.multi_reduction <add>, %89, %cst_59 [0] : vector<128x128xf32> to vector<128xf32>
      %94 = vector.shape_cast %93 : vector<128xf32> to vector<1x128xf32>
      %95 = arith.addf %92, %94 : vector<1x128xf32>
      %c0_60 = arith.constant 0 : index
      %c0_61 = arith.constant 0 : index
      %96 = vector.load %arg19[%c0_60, %c0_61] : memref<1x128xf32, #tpu.memory_space<vmem>>, vector<1x128xf32>
      tpu.vector_store %arg19[%c0_60, %c0_61], %95 {strides = array<i32>} : memref<1x128xf32, #tpu.memory_space<vmem>>, vector<1x128xf32>,
      %c0_62 = arith.constant 0 : index
      %c0_63 = arith.constant 0 : index
      %97 = vector.load %arg20[%c0_62, %c0_63] : memref<1x128xf32, #tpu.memory_space<vmem>>, vector<1x128xf32>
      %98 = arith.mulf %89, %89 : vector<128x128xf32>
      %cst_64 = arith.constant dense<0.000000e+00> : vector<128xf32>
      %99 = vector.multi_reduction <add>, %98, %cst_64 [0] : vector<128x128xf32> to vector<128xf32>
      %100 = vector.shape_cast %99 : vector<128xf32> to vector<1x128xf32>
      %101 = arith.addf %97, %100 : vector<1x128xf32>
      %c0_65 = arith.constant 0 : index
      %c0_66 = arith.constant 0 : index
      %102 = vector.load %arg20[%c0_65, %c0_66] : memref<1x128xf32, #tpu.memory_space<vmem>>, vector<1x128xf32>
      tpu.vector_store %arg20[%c0_65, %c0_66], %101 {strides = array<i32>} : memref<1x128xf32, #tpu.memory_space<vmem>>, vector<1x128xf32>,
    } else {
    }
    %c4_i32 = arith.constant 4 : i32
    %17 = arith.cmpi eq, %arg0, %c4_i32 : i32
    %18 = arith.extui %17 : i1 to i32
    %c0_i32_5 = arith.constant 0 : i32
    %19 = arith.cmpi ne, %18, %c0_i32_5 : i32
    scf.if %19 {
      %c0 = arith.constant 0 : index
      %c0_6 = arith.constant 0 : index
      %20 = vector.load %arg19[%c0, %c0_6] : memref<1x128xf32, #tpu.memory_space<vmem>>, vector<1x128xf32>
      %cst = arith.constant 0.001953125 : f32
      %21 = vector.broadcast %cst : f32 to vector<1x128xf32>
      %22 = arith.mulf %20, %21 : vector<1x128xf32>
      %c0_7 = arith.constant 0 : index
      %c0_8 = arith.constant 0 : index
      %23 = vector.load %arg20[%c0_7, %c0_8] : memref<1x128xf32, #tpu.memory_space<vmem>>, vector<1x128xf32>
      %cst_9 = arith.constant 0.001953125 : f32
      %24 = vector.broadcast %cst_9 : f32 to vector<1x128xf32>
      %25 = arith.mulf %23, %24 : vector<1x128xf32>
      %26 = arith.mulf %22, %22 : vector<1x128xf32>
      %27 = arith.subf %25, %26 : vector<1x128xf32>
      %cst_10 = arith.constant 9.99999974E-6 : f32
      %28 = vector.broadcast %cst_10 : f32 to vector<1x128xf32>
      %29 = arith.addf %27, %28 : vector<1x128xf32>
      %30 = math.rsqrt %29 : vector<1x128xf32>
      %c0_11 = arith.constant 0 : index
      %c0_12 = arith.constant 0 : index
      %31 = vector.load %arg10[%c0_11, %c0_12] : memref<1x128xf32, #tpu.memory_space<vmem>>, vector<1x128xf32>
      %32 = arith.mulf %30, %31 : vector<1x128xf32>
      %c0_13 = arith.constant 0 : index
      %c0_14 = arith.constant 0 : index
      %33 = vector.load %arg11[%c0_13, %c0_14] : memref<1x128xf32, #tpu.memory_space<vmem>>, vector<1x128xf32>
      %34 = arith.mulf %22, %32 : vector<1x128xf32>
      %35 = arith.subf %33, %34 : vector<1x128xf32>
      %36 = arith.index_cast %4 : i32 to index
      %c0_15 = arith.constant 0 : index
      %37 = vector.load %arg16[%36, %c0_15] : memref<512x128xf32, #tpu.memory_space<vmem>>, vector<128x128xf32>
      %38 = vector.broadcast %32 : vector<1x128xf32> to vector<128x128xf32>
      %39 = arith.mulf %37, %38 : vector<128x128xf32>
      %40 = vector.broadcast %35 : vector<1x128xf32> to vector<128x128xf32>
      %41 = arith.addf %39, %40 : vector<128x128xf32>
      %cst_16 = arith.constant 0.000000e+00 : f32
      %42 = vector.broadcast %cst_16 : f32 to vector<128x128xf32>
      %43 = arith.cmpf ogt, %41, %42 : vector<128x128xf32>
      %cst_17 = arith.constant 2.000000e-01 : f32
      %44 = vector.broadcast %cst_17 : f32 to vector<128x128xf32>
      %45 = arith.mulf %44, %41 : vector<128x128xf32>
      %46 = arith.select %43, %41, %45 : vector<128x128xi1>, vector<128x128xf32>
      %47 = arith.index_cast %4 : i32 to index
      %c0_18 = arith.constant 0 : index
      %48 = vector.load %arg12[%47, %c0_18] : memref<512x128xf32, #tpu.memory_space<vmem>>, vector<128x128xf32>
      tpu.vector_store %arg12[%47, %c0_18], %46 {strides = array<i32>} : memref<512x128xf32, #tpu.memory_space<vmem>>, vector<128x128xf32>,
    } else {
    }
    return
  }
  func.func @transform_0(%arg0: i32, %arg1: i32, %arg2: i32) -> (i32, i32, i32, i32) {
    %c0_i32 = arith.constant 0 : i32
    %c0_i32_0 = arith.constant 0 : i32
    %c0_i32_1 = arith.constant 0 : i32
    return %arg1, %arg2, %c0_i32, %c0_i32_0 : i32, i32, i32, i32
  }
  func.func @transform_1(%arg0: i32, %arg1: i32, %arg2: i32) -> (i32, i32) {
    %c0_i32 = arith.constant 0 : i32
    %c0_i32_0 = arith.constant 0 : i32
    %c0_i32_1 = arith.constant 0 : i32
    return %c0_i32, %c0_i32_0 : i32, i32
  }
  func.func @transform_2(%arg0: i32, %arg1: i32, %arg2: i32) -> (i32, i32) {
    %c0_i32 = arith.constant 0 : i32
    %c0_i32_0 = arith.constant 0 : i32
    %c0_i32_1 = arith.constant 0 : i32
    return %c0_i32, %c0_i32_0 : i32, i32
  }
  func.func @transform_3(%arg0: i32, %arg1: i32, %arg2: i32) -> (i32, i32) {
    %c0_i32 = arith.constant 0 : i32
    %c0_i32_0 = arith.constant 0 : i32
    %c0_i32_1 = arith.constant 0 : i32
    return %c0_i32, %c0_i32_0 : i32, i32
  }
  func.func @transform_4(%arg0: i32, %arg1: i32, %arg2: i32) -> (i32, i32) {
    %c0_i32 = arith.constant 0 : i32
    %c0_i32_0 = arith.constant 0 : i32
    %c0_i32_1 = arith.constant 0 : i32
    return %c0_i32, %c0_i32_0 : i32, i32
  }
  func.func @transform_5(%arg0: i32, %arg1: i32, %arg2: i32) -> (i32, i32) {
    %c0_i32 = arith.constant 0 : i32
    %c0_i32_0 = arith.constant 0 : i32
    %c0_i32_1 = arith.constant 0 : i32
    return %c0_i32, %c0_i32_0 : i32, i32
  }
  func.func @transform_6(%arg0: i32, %arg1: i32, %arg2: i32) -> (i32, i32) {
    %c0_i32 = arith.constant 0 : i32
    %c0_i32_0 = arith.constant 0 : i32
    %c0_i32_1 = arith.constant 0 : i32
    return %c0_i32, %c0_i32_0 : i32, i32
  }
  func.func @transform_7(%arg0: i32, %arg1: i32, %arg2: i32) -> (i32, i32) {
    %c0_i32 = arith.constant 0 : i32
    %c0_i32_0 = arith.constant 0 : i32
    %c0_i32_1 = arith.constant 0 : i32
    return %c0_i32, %c0_i32_0 : i32, i32
  }
  func.func @transform_8(%arg0: i32, %arg1: i32, %arg2: i32) -> (i32, i32) {
    %c0_i32 = arith.constant 0 : i32
    %c0_i32_0 = arith.constant 0 : i32
    %c0_i32_1 = arith.constant 0 : i32
    return %c0_i32, %c0_i32_0 : i32, i32
  }
  func.func @transform_9(%arg0: i32, %arg1: i32, %arg2: i32) -> (i32, i32) {
    %c0_i32 = arith.constant 0 : i32
    %c0_i32_0 = arith.constant 0 : i32
    %c0_i32_1 = arith.constant 0 : i32
    return %c0_i32, %c0_i32_0 : i32, i32
  }
}

</mosaic_0001>

<bundles_post_ra>
// kernel: double_conv.1
= control target key start
LH: loop header
LB: loop body
LE: loop exit
PB: predicated region body
PF: predicated region fallthrough
CT: control target
= control target key end

     0   :  { %s5500_s30 = smov 0   ;;  %s5502_s10 = smov 0   ;;  %s7081_s0 = inlined_call_operand.vmem [shape: bf16[2,16,16,128], index: 0, kind: input, shape index: {}]   ;;  %s7082_s1 = inlined_call_operand.vmem [shape: bf16[1152,128], index: 1, kind: input, shape index: {}]   ;;  %s7083_s2 = inlined_call_operand.vmem [shape: f32[1,128], index: 2, kind: input, shape index: {}]   ;;  %s7084_s3 = inlined_call_operand.vmem [shape: f32[1,128], index: 3, kind: input, shape index: {}]   ;;  %s7085_s4 = inlined_call_operand.vmem [shape: f32[1,128], index: 4, kind: input, shape index: {}]   ;;  %s7086_s5 = inlined_call_operand.vmem [shape: bf16[1152,128], index: 5, kind: input, shape index: {}]   ;;  %s7087_s6 = inlined_call_operand.vmem [shape: f32[1,128], index: 6, kind: input, shape index: {}]   ;;  %s7088_s7 = inlined_call_operand.vmem [shape: f32[1,128], index: 7, kind: input, shape index: {}]   ;;  %s7089_s8 = inlined_call_operand.vmem [shape: f32[1,128], index: 8, kind: input, shape index: {}]   ;;  %s7090_s9 = inlined_call_operand.vmem [shape: f32[512,128], index: 9, kind: output, shape index: {}]  }
   0x1   :  { %s5504_s11 = smov 0   ;;  %s5506_s12 = smov 0  }
   0x2   :  { %s5508_s13 = smov 0   ;;  %s5510_s14 = smov 0  }
   0x3   :  { %s5512_s15 = smov 0  }
   0x4 LB: > { %s31_s16 = sadd.s32 1, %s5435_s12  ;;  %s34_s17 = sadd.s32 1, %s5439_s13  ;;  %s5447_s15 = sphi %s5512_s15, %s19_s15   ;;  %s5443_s14 = sphi %s5510_s14, %s7100_s14   ;;  %s5439_s13 = sphi %s5508_s13, %s7099_s13   ;;  %s5435_s12 = sphi %s5506_s12, %s7098_s12   ;;  %s5431_s11 = sphi %s5504_s11, %s7097_s11   ;;  %s5427_s10 = sphi %s5502_s10, %s7096_s10   ;;  %s5423_s30 = sphi %s5500_s30, %s7095_s30  }
   0x5   : > { %p32_p0 = scmp.ge.s32.totalorder %s31_s16, 2  ;;  %p4110_p1 = scmp.ge.s32.totalorder %s5447_s15, 1 }
   0x6   : > { %p309_p2 = scmp.lt.s32.totalorder %s5447_s15, 21  ;;  %s38_s18 = sadd.s32 1, %s5443_s14 }
   0x7   : > { %s7102_s16 = smov (%p32_p0, %s31_s16), 0  ;;  %s7104_s17 = smov (!%p32_p0, %s34_s17), %s5439_s13 }
   0x8   : > { %p310_p3 = pnand %p4110_p1, %p309_p2  ;;  %p36_p4 = scmp.ge.s32.totalorder %s7104_s17, 2 }
   0x9   : > { %s4111_s19 = sshll.u32 (!%p310_p3), %s5423_s30, 3  ;;  %p346_p6 = scmp.lt.s32.totalorder (!%p310_p3), %s5427_s10, 1 }
   0xa   : > { %s7106_s17 = smov (%p36_p4, %s7104_s17), 0  ;;  %s7108_s18 = smov (!%p36_p4, %s38_s18), %s5443_s14 }
   0xb   : > { %7091 = sst [smem:[#allocation10_spill]] %s7106_s17  ;;  %p40_p5 = scmp.ge.s32.totalorder %s7108_s18, 5 }
   0xc   : > { %313 = sbr.rel (%p310_p3) target bundleno = 1114 (0x45a), region = 56  ;;  %p348_p7 = scmp.lt.s32.totalorder (!%p310_p3), %s4111_s19, 15 }
   0xd   : > { %s7110_s18 = smov (%p40_p5, %s7108_s18), 0  ;;  %s4116_s20 = sshll.u32 (!%p310_p3), %s5427_s10, 4 }
   0xe   : > { %7092 = sst [smem:[#allocation11_spill]] %s7110_s18  ;;  %s359_s24 = sadd.s32 (!%p310_p3), %s4116_s20, %s4111_s19 }
   0xf   : > { %s5552_s26 = sshll.u32 (!%p310_p3), %s359_s24, 4  ;;  %p4118_p8 = scmp.ne.s32.totalorder (!%p310_p3), %s5431_s11, 0 }
  0x13   : > { %s347_s21 = scalar_select %p346_p6, %s5427_s10, 1 }
  0x14   : > { %s349_s22 = scalar_select %p348_p7, %s4111_s19, 15 }
  0x15   : > { %s4113_s23 = sshll.u32 %s347_s21, 5  ;;  %364 = sbr.rel (%p4118_p8) target bundleno = 152 (0x98), region = 60 }
  0x16   : > { %s4112_s25 = sshll.u32 %s349_s22, 1  ;;  %p365_p9 = scmp.eq.s32.totalorder (!%p4118_p8), %s5427_s10, 0 }
  0x17   : > { %s352_s27 = sadd.s32 %s4113_s23, %s4112_s25  ;;  %p366_p10 = scmp.eq.s32.totalorder (!%p4118_p8), %s5423_s30, 0 }
  0x18   : > { %s4114_s28 = sshll.u32 %s352_s27, 2 }
  0x19   : > { %s5557_s17 = scalar_lea.vmem %s7081_s0, %s4114_s28  ;;  %p367_p11 = pnand (!%p4118_p8), %p366_p10, %p365_p9 }
  0x1c   : > { %370 = sbr.rel (%p367_p11) target bundleno = 139 (0x8b), region = 64  ;;  %v5449_v0 = vmov (!%p367_p11), 0.0  }
  0x1d   : > { %371 = vst [vmem:[#allocation2] sm:$0xff] (!%p367_p11), %v5449_v0  ;;  %372 = vst [vmem:[#allocation2 + $0x8] sm:$0xff] (!%p367_p11), %v5449_v0 }
  0x1e   : > { %373 = vst [vmem:[#allocation2 + $0x10] sm:$0x3] (!%p367_p11), %v5449_v0  ;;  %374 = vst [vmem:[#allocation2 + $0x18] sm:$0xff] (!%p367_p11), %v5449_v0 }
  0x1f   : > { %375 = vst [vmem:[#allocation2 + $0x20] sm:$0xff] (!%p367_p11), %v5449_v0  ;;  %376 = vst [vmem:[#allocation2 + $0x28] sm:$0x3] (!%p367_p11), %v5449_v0 }
  0x20   : > { %377 = vst [vmem:[#allocation2 + $0x30] sm:$0xff] (!%p367_p11), %v5449_v0  ;;  %378 = vst [vmem:[#allocation2 + $0x38] sm:$0xff] (!%p367_p11), %v5449_v0 }
  0x21   : > { %379 = vst [vmem:[#allocation2 + $0x40] sm:$0x3] (!%p367_p11), %v5449_v0  ;;  %380 = vst [vmem:[#allocation2 + $0x48] sm:$0xff] (!%p367_p11), %v5449_v0 }
  0x22   : > { %381 = vst [vmem:[#allocation2 + $0x50] sm:$0xff] (!%p367_p11), %v5449_v0  ;;  %382 = vst [vmem:[#allocation2 + $0x58] sm:$0x3] (!%p367_p11), %v5449_v0 }
  0x23   : > { %383 = vst [vmem:[#allocation2 + $0x60] sm:$0xff] %v5449_v0  ;;  %384 = vst [vmem:[#allocation2 + $0x68] sm:$0xff] %v5449_v0 }
  0x24   : > { %385 = vst [vmem:[#allocation2 + $0x70] sm:$0x3] %v5449_v0  ;;  %386 = vst [vmem:[#allocation2 + $0x78] sm:$0xff] %v5449_v0 }
  0x25   : > { %387 = vst [vmem:[#allocation2 + $0x80] sm:$0xff] %v5449_v0  ;;  %388 = vst [vmem:[#allocation2 + $0x88] sm:$0x3] %v5449_v0 }
  0x26   : > { %389 = vst [vmem:[#allocation2 + $0x90] sm:$0xff] %v5449_v0  ;;  %390 = vst [vmem:[#allocation2 + $0x98] sm:$0xff] %v5449_v0 }
  0x27   : > { %391 = vst [vmem:[#allocation2 + $0xa0] sm:$0x3] %v5449_v0  ;;  %392 = vst [vmem:[#allocation2 + $0xa8] sm:$0xff] %v5449_v0 }
  0x28   : > { %393 = vst [vmem:[#allocation2 + $0xb0] sm:$0xff] %v5449_v0  ;;  %394 = vst [vmem:[#allocation2 + $0xb8] sm:$0x3] %v5449_v0 }
  0x29   : > { %395 = vst [vmem:[#allocation2 + $0xc0] sm:$0xff] %v5449_v0  ;;  %396 = vst [vmem:[#allocation2 + $0xc8] sm:$0xff] %v5449_v0 }
  0x2a   : > { %397 = vst [vmem:[#allocation2 + $0xd0] sm:$0x3] %v5449_v0  ;;  %398 = vst [vmem:[#allocation2 + $0xd8] sm:$0xff] %v5449_v0 }
  0x2b   : > { %399 = vst [vmem:[#allocation2 + $0xe0] sm:$0xff] %v5449_v0  ;;  %400 = vst [vmem:[#allocation2 + $0xe8] sm:$0x3] %v5449_v0 }
  0x2c   : > { %401 = vst [vmem:[#allocation2 + $0xf0] sm:$0xff] %v5449_v0  ;;  %402 = vst [vmem:[#allocation2 + $0xf8] sm:$0xff] %v5449_v0 }
  0x2d   : > { %403 = vst [vmem:[#allocation2 + $0x100] sm:$0x3] %v5449_v0  ;;  %404 = vst [vmem:[#allocation2 + $0x108] sm:$0xff] %v5449_v0 }
  0x2e   : > { %405 = vst [vmem:[#allocation2 + $0x110] sm:$0xff] %v5449_v0  ;;  %406 = vst [vmem:[#allocation2 + $0x118] sm:$0x3] %v5449_v0 }
  0x2f   : > { %407 = vst [vmem:[#allocation2 + $0x120] sm:$0xff] %v5449_v0  ;;  %408 = vst [vmem:[#allocation2 + $0x128] sm:$0xff] %v5449_v0 }
  0x30   : > { %409 = vst [vmem:[#allocation2 + $0x130] sm:$0x3] %v5449_v0  ;;  %410 = vst [vmem:[#allocation2 + $0x138] sm:$0xff] %v5449_v0 }
  0x31   : > { %411 = vst [vmem:[#allocation2 + $0x140] sm:$0xff] %v5449_v0  ;;  %412 = vst [vmem:[#allocation2 + $0x148] sm:$0x3] %v5449_v0 }
  0x32   : > { %413 = vst [vmem:[#allocation2 + $0x150] sm:$0xff] %v5449_v0  ;;  %414 = vst [vmem:[#allocation2 + $0x158] sm:$0xff] %v5449_v0 }
  0x33   : > { %415 = vst [vmem:[#allocation2 + $0x160] sm:$0x3] %v5449_v0  ;;  %416 = vst [vmem:[#allocation2 + $0x168] sm:$0xff] %v5449_v0 }
  0x34   : > { %417 = vst [vmem:[#allocation2 + $0x170] sm:$0xff] %v5449_v0  ;;  %418 = vst [vmem:[#allocation2 + $0x178] sm:$0x3] %v5449_v0 }
  0x35   : > { %419 = vst [vmem:[#allocation2 + $0x180] sm:$0xff] %v5449_v0  ;;  %420 = vst [vmem:[#allocation2 + $0x188] sm:$0xff] %v5449_v0 }
  0x36   : > { %421 = vst [vmem:[#allocation2 + $0x190] sm:$0x3] %v5449_v0  ;;  %422 = vst [vmem:[#allocation2 + $0x198] sm:$0xff] %v5449_v0 }
  0x37   : > { %423 = vst [vmem:[#allocation2 + $0x1a0] sm:$0xff] %v5449_v0  ;;  %424 = vst [vmem:[#allocation2 + $0x1a8] sm:$0x3] %v5449_v0 }
  0x38   : > { %425 = vst [vmem:[#allocation2 + $0x1b0] sm:$0xff] %v5449_v0  ;;  %426 = vst [vmem:[#allocation2 + $0x1b8] sm:$0xff] %v5449_v0 }
  0x39   : > { %427 = vst [vmem:[#allocation2 + $0x1c0] sm:$0x3] %v5449_v0  ;;  %428 = vst [vmem:[#allocation2 + $0x1c8] sm:$0xff] %v5449_v0 }
  0x3a   : > { %429 = vst [vmem:[#allocation2 + $0x1d0] sm:$0xff] %v5449_v0  ;;  %430 = vst [vmem:[#allocation2 + $0x1d8] sm:$0x3] %v5449_v0 }
  0x3b   : > { %431 = vst [vmem:[#allocation2 + $0x1e0] sm:$0xff] %v5449_v0  ;;  %432 = vst [vmem:[#allocation2 + $0x1e8] sm:$0xff] %v5449_v0 }
  0x3c   : > { %433 = vst [vmem:[#allocation2 + $0x1f0] sm:$0x3] %v5449_v0  ;;  %434 = vst [vmem:[#allocation2 + $0x1f8] sm:$0xff] %v5449_v0 }
  0x3d   : > { %435 = vst [vmem:[#allocation2 + $0x200] sm:$0xff] %v5449_v0  ;;  %436 = vst [vmem:[#allocation2 + $0x208] sm:$0x3] %v5449_v0 }
  0x3e   : > { %437 = vst [vmem:[#allocation2 + $0x210] sm:$0xff] %v5449_v0  ;;  %438 = vst [vmem:[#allocation2 + $0x218] sm:$0xff] %v5449_v0 }
  0x3f   : > { %439 = vst [vmem:[#allocation2 + $0x220] sm:$0x3] %v5449_v0  ;;  %440 = vst [vmem:[#allocation2 + $0x228] sm:$0xff] %v5449_v0 }
  0x40   : > { %441 = vst [vmem:[#allocation2 + $0x230] sm:$0xff] %v5449_v0  ;;  %442 = vst [vmem:[#allocation2 + $0x238] sm:$0x3] %v5449_v0 }
  0x41   : > { %443 = vst [vmem:[#allocation2 + $0x240] sm:$0xff] %v5449_v0  ;;  %444 = vst [vmem:[#allocation2 + $0x248] sm:$0xff] %v5449_v0 }
  0x42   : > { %445 = vst [vmem:[#allocation2 + $0x250] sm:$0x3] %v5449_v0  ;;  %446 = vst [vmem:[#allocation2 + $0x258] sm:$0xff] %v5449_v0 }
  0x43   : > { %447 = vst [vmem:[#allocation2 + $0x260] sm:$0xff] %v5449_v0  ;;  %448 = vst [vmem:[#allocation2 + $0x268] sm:$0x3] %v5449_v0 }
  0x44   : > { %449 = vst [vmem:[#allocation2 + $0x270] sm:$0xff] %v5449_v0  ;;  %450 = vst [vmem:[#allocation2 + $0x278] sm:$0xff] %v5449_v0 }
  0x45   : > { %451 = vst [vmem:[#allocation2 + $0x280] sm:$0x3] %v5449_v0  ;;  %452 = vst [vmem:[#allocation2 + $0x288] sm:$0xff] %v5449_v0 }
  0x46   : > { %453 = vst [vmem:[#allocation2 + $0x290] sm:$0xff] %v5449_v0  ;;  %454 = vst [vmem:[#allocation2 + $0x298] sm:$0x3] %v5449_v0 }
  0x47   : > { %455 = vst [vmem:[#allocation2 + $0x2a0] sm:$0xff] %v5449_v0  ;;  %456 = vst [vmem:[#allocation2 + $0x2a8] sm:$0xff] %v5449_v0 }
  0x48   : > { %457 = vst [vmem:[#allocation2 + $0x2b0] sm:$0x3] %v5449_v0  ;;  %458 = vst [vmem:[#allocation2 + $0x2b8] sm:$0xff] %v5449_v0 }
  0x49   : > { %459 = vst [vmem:[#allocation2 + $0x2c0] sm:$0xff] %v5449_v0  ;;  %460 = vst [vmem:[#allocation2 + $0x2c8] sm:$0x3] %v5449_v0 }
  0x4a   : > { %461 = vst [vmem:[#allocation2 + $0x2d0] sm:$0xff] %v5449_v0  ;;  %462 = vst [vmem:[#allocation2 + $0x2d8] sm:$0xff] %v5449_v0 }
  0x4b   : > { %463 = vst [vmem:[#allocation2 + $0x2e0] sm:$0x3] %v5449_v0  ;;  %464 = vst [vmem:[#allocation2 + $0x2e8] sm:$0xff] %v5449_v0 }
  0x4c   : > { %465 = vst [vmem:[#allocation2 + $0x2f0] sm:$0xff] %v5449_v0  ;;  %466 = vst [vmem:[#allocation2 + $0x2f8] sm:$0x3] %v5449_v0 }
  0x4d   : > { %467 = vst [vmem:[#allocation2 + $0x300] sm:$0xff] %v5449_v0  ;;  %468 = vst [vmem:[#allocation2 + $0x308] sm:$0xff] %v5449_v0 }
  0x4e   : > { %469 = vst [vmem:[#allocation2 + $0x310] sm:$0x3] %v5449_v0  ;;  %470 = vst [vmem:[#allocation2 + $0x318] sm:$0xff] %v5449_v0 }
  0x4f   : > { %471 = vst [vmem:[#allocation2 + $0x320] sm:$0xff] %v5449_v0  ;;  %472 = vst [vmem:[#allocation2 + $0x328] sm:$0x3] %v5449_v0 }
  0x50   : > { %473 = vst [vmem:[#allocation2 + $0x330] sm:$0xff] %v5449_v0  ;;  %474 = vst [vmem:[#allocation2 + $0x338] sm:$0xff] %v5449_v0 }
  0x51   : > { %475 = vst [vmem:[#allocation2 + $0x340] sm:$0x3] %v5449_v0  ;;  %476 = vst [vmem:[#allocation2 + $0x348] sm:$0xff] %v5449_v0 }
  0x52   : > { %477 = vst [vmem:[#allocation2 + $0x350] sm:$0xff] %v5449_v0  ;;  %478 = vst [vmem:[#allocation2 + $0x358] sm:$0x3] %v5449_v0 }
  0x53   : > { %479 = vst [vmem:[#allocation3] sm:$0xff] %v5449_v0  ;;  %480 = vst [vmem:[#allocation3 + $0x8] sm:$0xff] %v5449_v0 }
  0x54   : > { %481 = vst [vmem:[#allocation3 + $0x10] sm:$0x3] %v5449_v0  ;;  %482 = vst [vmem:[#allocation3 + $0x18] sm:$0xff] %v5449_v0 }
  0x55   : > { %483 = vst [vmem:[#allocation3 + $0x20] sm:$0xff] %v5449_v0  ;;  %484 = vst [vmem:[#allocation3 + $0x28] sm:$0x3] %v5449_v0 }
  0x56   : > { %485 = vst [vmem:[#allocation3 + $0x30] sm:$0xff] %v5449_v0  ;;  %486 = vst [vmem:[#allocation3 + $0x38] sm:$0xff] %v5449_v0 }
  0x57   : > { %487 = vst [vmem:[#allocation3 + $0x40] sm:$0x3] %v5449_v0  ;;  %488 = vst [vmem:[#allocation3 + $0x48] sm:$0xff] %v5449_v0 }
  0x58   : > { %489 = vst [vmem:[#allocation3 + $0x50] sm:$0xff] %v5449_v0  ;;  %490 = vst [vmem:[#allocation3 + $0x58] sm:$0x3] %v5449_v0 }
  0x59   : > { %491 = vst [vmem:[#allocation3 + $0x60] sm:$0xff] %v5449_v0  ;;  %492 = vst [vmem:[#allocation3 + $0x68] sm:$0xff] %v5449_v0 }
  0x5a   : > { %493 = vst [vmem:[#allocation3 + $0x70] sm:$0x3] %v5449_v0  ;;  %494 = vst [vmem:[#allocation3 + $0x78] sm:$0xff] %v5449_v0 }
  0x5b   : > { %495 = vst [vmem:[#allocation3 + $0x80] sm:$0xff] %v5449_v0  ;;  %496 = vst [vmem:[#allocation3 + $0x88] sm:$0x3] %v5449_v0 }
  0x5c   : > { %497 = vst [vmem:[#allocation3 + $0x90] sm:$0xff] %v5449_v0  ;;  %498 = vst [vmem:[#allocation3 + $0x98] sm:$0xff] %v5449_v0 }
  0x5d   : > { %499 = vst [vmem:[#allocation3 + $0xa0] sm:$0x3] %v5449_v0  ;;  %500 = vst [vmem:[#allocation3 + $0xa8] sm:$0xff] %v5449_v0 }
  0x5e   : > { %501 = vst [vmem:[#allocation3 + $0xb0] sm:$0xff] %v5449_v0  ;;  %502 = vst [vmem:[#allocation3 + $0xb8] sm:$0x3] %v5449_v0 }
  0x5f   : > { %503 = vst [vmem:[#allocation3 + $0xc0] sm:$0xff] %v5449_v0  ;;  %504 = vst [vmem:[#allocation3 + $0xc8] sm:$0xff] %v5449_v0 }
  0x60   : > { %505 = vst [vmem:[#allocation3 + $0xd0] sm:$0x3] %v5449_v0  ;;  %506 = vst [vmem:[#allocation3 + $0xd8] sm:$0xff] %v5449_v0 }
  0x61   : > { %507 = vst [vmem:[#allocation3 + $0xe0] sm:$0xff] %v5449_v0  ;;  %508 = vst [vmem:[#allocation3 + $0xe8] sm:$0x3] %v5449_v0 }
  0x62   : > { %509 = vst [vmem:[#allocation3 + $0xf0] sm:$0xff] %v5449_v0  ;;  %510 = vst [vmem:[#allocation3 + $0xf8] sm:$0xff] %v5449_v0 }
  0x63   : > { %511 = vst [vmem:[#allocation3 + $0x100] sm:$0x3] %v5449_v0  ;;  %512 = vst [vmem:[#allocation3 + $0x108] sm:$0xff] %v5449_v0 }
  0x64   : > { %513 = vst [vmem:[#allocation3 + $0x110] sm:$0xff] %v5449_v0  ;;  %514 = vst [vmem:[#allocation3 + $0x118] sm:$0x3] %v5449_v0 }
  0x65   : > { %515 = vst [vmem:[#allocation3 + $0x120] sm:$0xff] %v5449_v0  ;;  %516 = vst [vmem:[#allocation3 + $0x128] sm:$0xff] %v5449_v0 }
  0x66   : > { %517 = vst [vmem:[#allocation3 + $0x130] sm:$0x3] %v5449_v0  ;;  %518 = vst [vmem:[#allocation3 + $0x138] sm:$0xff] %v5449_v0 }
  0x67   : > { %519 = vst [vmem:[#allocation3 + $0x140] sm:$0xff] %v5449_v0  ;;  %520 = vst [vmem:[#allocation3 + $0x148] sm:$0x3] %v5449_v0 }
  0x68   : > { %521 = vst [vmem:[#allocation3 + $0x150] sm:$0xff] %v5449_v0  ;;  %522 = vst [vmem:[#allocation3 + $0x158] sm:$0xff] %v5449_v0 }
  0x69   : > { %523 = vst [vmem:[#allocation3 + $0x160] sm:$0x3] %v5449_v0  ;;  %524 = vst [vmem:[#allocation3 + $0x168] sm:$0xff] %v5449_v0 }
  0x6a   : > { %525 = vst [vmem:[#allocation3 + $0x170] sm:$0xff] %v5449_v0  ;;  %526 = vst [vmem:[#allocation3 + $0x178] sm:$0x3] %v5449_v0 }
  0x6b   : > { %527 = vst [vmem:[#allocation3 + $0x180] sm:$0xff] %v5449_v0  ;;  %528 = vst [vmem:[#allocation3 + $0x188] sm:$0xff] %v5449_v0 }
  0x6c   : > { %529 = vst [vmem:[#allocation3 + $0x190] sm:$0x3] %v5449_v0  ;;  %530 = vst [vmem:[#allocation3 + $0x198] sm:$0xff] %v5449_v0 }
  0x6d   : > { %531 = vst [vmem:[#allocation3 + $0x1a0] sm:$0xff] %v5449_v0  ;;  %532 = vst [vmem:[#allocation3 + $0x1a8] sm:$0x3] %v5449_v0 }
  0x6e   : > { %533 = vst [vmem:[#allocation3 + $0x1b0] sm:$0xff] %v5449_v0  ;;  %534 = vst [vmem:[#allocation3 + $0x1b8] sm:$0xff] %v5449_v0 }
  0x6f   : > { %535 = vst [vmem:[#allocation3 + $0x1c0] sm:$0x3] %v5449_v0  ;;  %536 = vst [vmem:[#allocation3 + $0x1c8] sm:$0xff] %v5449_v0 }
  0x70   : > { %537 = vst [vmem:[#allocation3 + $0x1d0] sm:$0xff] %v5449_v0  ;;  %538 = vst [vmem:[#allocation3 + $0x1d8] sm:$0x3] %v5449_v0 }
  0x71   : > { %539 = vst [vmem:[#allocation3 + $0x1e0] sm:$0xff] %v5449_v0  ;;  %540 = vst [vmem:[#allocation3 + $0x1e8] sm:$0xff] %v5449_v0 }
  0x72   : > { %541 = vst [vmem:[#allocation3 + $0x1f0] sm:$0x3] %v5449_v0  ;;  %542 = vst [vmem:[#allocation3 + $0x1f8] sm:$0xff] %v5449_v0 }
  0x73   : > { %543 = vst [vmem:[#allocation3 + $0x200] sm:$0xff] %v5449_v0  ;;  %544 = vst [vmem:[#allocation3 + $0x208] sm:$0x3] %v5449_v0 }
  0x74   : > { %545 = vst [vmem:[#allocation3 + $0x210] sm:$0xff] %v5449_v0  ;;  %546 = vst [vmem:[#allocation3 + $0x218] sm:$0xff] %v5449_v0 }
  0x75   : > { %547 = vst [vmem:[#allocation3 + $0x220] sm:$0x3] %v5449_v0  ;;  %548 = vst [vmem:[#allocation3 + $0x228] sm:$0xff] %v5449_v0 }
  0x76   : > { %549 = vst [vmem:[#allocation3 + $0x230] sm:$0xff] %v5449_v0  ;;  %550 = vst [vmem:[#allocation3 + $0x238] sm:$0x3] %v5449_v0 }
  0x77   : > { %551 = vst [vmem:[#allocation3 + $0x240] sm:$0xff] %v5449_v0  ;;  %552 = vst [vmem:[#allocation3 + $0x248] sm:$0xff] %v5449_v0 }
  0x78   : > { %553 = vst [vmem:[#allocation3 + $0x250] sm:$0x3] %v5449_v0  ;;  %554 = vst [vmem:[#allocation3 + $0x258] sm:$0xff] %v5449_v0 }
  0x79   : > { %555 = vst [vmem:[#allocation3 + $0x260] sm:$0xff] %v5449_v0  ;;  %556 = vst [vmem:[#allocation3 + $0x268] sm:$0x3] %v5449_v0 }
  0x7a   : > { %557 = vst [vmem:[#allocation3 + $0x270] sm:$0xff] %v5449_v0  ;;  %558 = vst [vmem:[#allocation3 + $0x278] sm:$0xff] %v5449_v0 }
  0x7b   : > { %559 = vst [vmem:[#allocation3 + $0x280] sm:$0x3] %v5449_v0  ;;  %560 = vst [vmem:[#allocation3 + $0x288] sm:$0xff] %v5449_v0 }
  0x7c   : > { %561 = vst [vmem:[#allocation3 + $0x290] sm:$0xff] %v5449_v0  ;;  %562 = vst [vmem:[#allocation3 + $0x298] sm:$0x3] %v5449_v0 }
  0x7d   : > { %563 = vst [vmem:[#allocation3 + $0x2a0] sm:$0xff] %v5449_v0  ;;  %564 = vst [vmem:[#allocation3 + $0x2a8] sm:$0xff] %v5449_v0 }
  0x7e   : > { %565 = vst [vmem:[#allocation3 + $0x2b0] sm:$0x3] %v5449_v0  ;;  %566 = vst [vmem:[#allocation3 + $0x2b8] sm:$0xff] %v5449_v0 }
  0x7f   : > { %567 = vst [vmem:[#allocation3 + $0x2c0] sm:$0xff] %v5449_v0  ;;  %568 = vst [vmem:[#allocation3 + $0x2c8] sm:$0x3] %v5449_v0 }
  0x80   : > { %569 = vst [vmem:[#allocation3 + $0x2d0] sm:$0xff] %v5449_v0  ;;  %570 = vst [vmem:[#allocation3 + $0x2d8] sm:$0xff] %v5449_v0 }
  0x81   : > { %571 = vst [vmem:[#allocation3 + $0x2e0] sm:$0x3] %v5449_v0  ;;  %572 = vst [vmem:[#allocation3 + $0x2e8] sm:$0xff] %v5449_v0 }
  0x82   : > { %573 = vst [vmem:[#allocation3 + $0x2f0] sm:$0xff] %v5449_v0  ;;  %574 = vst [vmem:[#allocation3 + $0x2f8] sm:$0x3] %v5449_v0 }
  0x83   : > { %575 = vst [vmem:[#allocation3 + $0x300] sm:$0xff] %v5449_v0  ;;  %576 = vst [vmem:[#allocation3 + $0x308] sm:$0xff] %v5449_v0 }
  0x84   : > { %577 = vst [vmem:[#allocation3 + $0x310] sm:$0x3] %v5449_v0  ;;  %578 = vst [vmem:[#allocation3 + $0x318] sm:$0xff] %v5449_v0 }
  0x85   : > { %579 = vst [vmem:[#allocation3 + $0x320] sm:$0xff] %v5449_v0  ;;  %580 = vst [vmem:[#allocation3 + $0x328] sm:$0x3] %v5449_v0 }
  0x86   : > { %581 = vst [vmem:[#allocation3 + $0x330] sm:$0xff] %v5449_v0  ;;  %582 = vst [vmem:[#allocation3 + $0x338] sm:$0xff] %v5449_v0 }
  0x87   : > { %583 = vst [vmem:[#allocation3 + $0x340] sm:$0x3] %v5449_v0  ;;  %584 = vst [vmem:[#allocation3 + $0x348] sm:$0xff] %v5449_v0 }
  0x88   : > { %585 = vst [vmem:[#allocation3 + $0x350] sm:$0xff] %v5449_v0  ;;  %586 = vst [vmem:[#allocation3 + $0x358] sm:$0x3] %v5449_v0 }
  0x89   : > { %587 = vst [vmem:[#allocation6] sm:$0x1] %v5449_v0  ;;  %588 = vst [vmem:[#allocation7] sm:$0x1] %v5449_v0 }
  0x8a   : > { %589 = vst [vmem:[#allocation8] sm:$0x1] %v5449_v0  ;;  %590 = vst [vmem:[#allocation9] sm:$0x1] %v5449_v0 }
  0x8b PF: > { %v4510_v1 = vld [vmem:[%s5557_s17] sm:$0xff]   ;;  %s4120_s18 = smul.u32 192, %s5423_s30  ;;  %v4541_v2 = vld [vmem:[%s5557_s17 + $0x8] sm:$0xff]   ;;  %v4542_v3 = vld [vmem:[%s5557_s17 + $0x10] sm:$0xff]  }
  0x8c   : > { %v4511_v4 = vunpack.c.l.bf16 %v4510_v1  ;;  %s4012_s19 = smul.u32 432, %s5427_s10  ;;  %v4512_v5 = vunpack.c.h.bf16 %v4510_v1  ;;  %v4515_v6 = vunpack.c.l.bf16 %v4541_v2  ;;  %v4516_v7 = vunpack.c.h.bf16 %v4541_v2  ;;  %v4543_v8 = vld [vmem:[%s5557_s17 + $0x18] sm:$0xff]   ;;  %v4544_v9 = vld [vmem:[%s5557_s17 + $0x20] sm:$0xff]   ;;  %v4545_v10 = vld [vmem:[%s5557_s17 + $0x28] sm:$0xff]  }
  0x8d   : > { %v4519_v11 = vunpack.c.l.bf16 %v4542_v3  ;;  %v4520_v12 = vunpack.c.h.bf16 %v4542_v3  ;;  %v4523_v13 = vunpack.c.l.bf16 %v4543_v8  ;;  %v4524_v14 = vunpack.c.h.bf16 %v4543_v8  ;;  %v4546_v15 = vld [vmem:[%s5557_s17 + $0x30] sm:$0xff]   ;;  %v4547_v16 = vld [vmem:[%s5557_s17 + $0x38] sm:$0xff]  }
  0x8e   : > { %s4013_s20 = sadd.s32 %s4120_s18, %s4012_s19  ;;  %v4527_v17 = vunpack.c.l.bf16 %v4544_v9  ;;  %v4528_v18 = vunpack.c.h.bf16 %v4544_v9  ;;  %v4531_v19 = vunpack.c.l.bf16 %v4545_v10  ;;  %v4532_v20 = vunpack.c.h.bf16 %v4545_v10 }
  0x8f   : > { %v4535_v21 = vunpack.c.l.bf16 %v4546_v15  ;;  %v4536_v22 = vunpack.c.h.bf16 %v4546_v15  ;;  %v4539_v23 = vunpack.c.l.bf16 %v4547_v16  ;;  %v4540_v24 = vunpack.c.h.bf16 %v4547_v16  ;;  %s4014_s21 = scalar_lea.vmem [#allocation2], %s4013_s20 }
  0x90   : > { %4121 = vst [vmem:[%s4014_s21 + $0x19] sm:$0xff] %v4511_v4  ;;  %4122 = vst [vmem:[%s4014_s21 + $0x21] sm:$0xff] %v4512_v5 }
  0x91   : > { %4123 = vst [vmem:[%s4014_s21 + $0x31] sm:$0xff] %v4515_v6  ;;  %4124 = vst [vmem:[%s4014_s21 + $0x39] sm:$0xff] %v4516_v7 }
  0x92   : > { %4125 = vst [vmem:[%s4014_s21 + $0x49] sm:$0xff] %v4519_v11  ;;  %4126 = vst [vmem:[%s4014_s21 + $0x51] sm:$0xff] %v4520_v12 }
  0x93   : > { %4127 = vst [vmem:[%s4014_s21 + $0x61] sm:$0xff] %v4523_v13  ;;  %4128 = vst [vmem:[%s4014_s21 + $0x69] sm:$0xff] %v4524_v14 }
  0x94   : > { %4129 = vst [vmem:[%s4014_s21 + $0x79] sm:$0xff] %v4527_v17  ;;  %4130 = vst [vmem:[%s4014_s21 + $0x81] sm:$0xff] %v4528_v18 }
  0x95   : > { %4131 = vst [vmem:[%s4014_s21 + $0x91] sm:$0xff] %v4531_v19  ;;  %4132 = vst [vmem:[%s4014_s21 + $0x99] sm:$0xff] %v4532_v20 }
  0x96   : > { %4133 = vst [vmem:[%s4014_s21 + $0xa9] sm:$0xff] %v4535_v21  ;;  %4134 = vst [vmem:[%s4014_s21 + $0xb1] sm:$0xff] %v4536_v22 }
  0x97   : > { %4135 = vst [vmem:[%s4014_s21 + $0xc1] sm:$0xff] %v4539_v23  ;;  %4136 = vst [vmem:[%s4014_s21 + $0xc9] sm:$0xff] %v4540_v24 }
  0x98 PF: > { %p4137_p12 = scmp.ne.s32.totalorder %s5431_s11, 1 }
  0x99   : > { %v5245_v25 = vld [vmem:[%s7082_s1 + $0x40] sm:$0xff] (!%p4137_p12)   ;;  %v5249_v29 = vld [vmem:[%s7082_s1 + $0x48] sm:$0xff] (!%p4137_p12)   ;;  %v5253_v33 = vld [vmem:[%s7082_s1 + $0x50] sm:$0xff] (!%p4137_p12)   ;;  %s4138_s18 = smul.u32 (!%p4137_p12), 192, %s5423_s30  ;;  %s6304_s22 = scalar_lea.vmem (!%p4137_p12), [#allocation5], %s5552_s26 }
  0x9a   : > { %647 = sbr.rel (%p4137_p12) target bundleno = 580 (0x244), region = 68  ;;  %v5246_v26 = vld [vmem:[%s7082_s1 + $0xc0] sm:$0xff] (!%p4137_p12)   ;;  %4548 = vmatprep.subr.bf16.mxu0 (!%p4137_p12), %v5245_v25  ;;  %v5250_v30 = vld [vmem:[%s7082_s1 + $0xc8] sm:$0xff] (!%p4137_p12)   ;;  %v5254_v34 = vld [vmem:[%s7082_s1 + $0xd0] sm:$0xff] (!%p4137_p12)  }
  0x9b   : > { %v5247_v27 = vld [vmem:[%s7082_s1] sm:$0xff] (!%p4137_p12)   ;;  %4612 = vmatprep.subr.bf16.mxu1 (!%p4137_p12), %v5246_v26  ;;  %v5251_v31 = vld [vmem:[%s7082_s1 + $0x8] sm:$0xff] (!%p4137_p12)   ;;  %v5255_v35 = vld [vmem:[%s7082_s1 + $0x10] sm:$0xff] (!%p4137_p12)   ;;  %s649_s21 = smul.u32 (!%p4137_p12), 432, %s5427_s10 }
  0x9c   : > { %v5248_v28 = vld [vmem:[%s7082_s1 + $0x80] sm:$0xff] (!%p4137_p12)   ;;  %4549 = vmatpush3.bf16.msra.mxu0 (!%p4137_p12), %v5247_v27  ;;  %v5252_v32 = vld [vmem:[%s7082_s1 + $0x88] sm:$0xff] (!%p4137_p12)   ;;  %v5256_v36 = vld [vmem:[%s7082_s1 + $0x90] sm:$0xff] (!%p4137_p12)  }
  0x9d   : > { %4613 = vmatpush3.bf16.msra.mxu1 (!%p4137_p12), %v5248_v28  ;;  %4550 = vmatprep.subr.bf16.mxu0 (!%p4137_p12), %v5249_v29  ;;  %v5257_v37 = vld [vmem:[%s7082_s1 + $0x58] sm:$0xff] (!%p4137_p12)   ;;  %v5261_v41 = vld [vmem:[%s7082_s1 + $0x60] sm:$0xff] (!%p4137_p12)   ;;  %v5265_v45 = vld [vmem:[%s7082_s1 + $0x68] sm:$0xff] (!%p4137_p12)   ;;  %s650_s19 = sadd.s32 (!%p4137_p12), %s4138_s18, %s649_s21 }
  0x9e   : > { %4614 = vmatprep.subr.bf16.mxu1 (!%p4137_p12), %v5250_v30  ;;  %v5258_v38 = vld [vmem:[%s7082_s1 + $0xd8] sm:$0xff] (!%p4137_p12)   ;;  %v5262_v42 = vld [vmem:[%s7082_s1 + $0xe0] sm:$0xff] (!%p4137_p12)   ;;  %v5266_v46 = vld [vmem:[%s7082_s1 + $0xe8] sm:$0xff] (!%p4137_p12)   ;;  %s5891_s29 = scalar_lea.vmem (!%p4137_p12), [#allocation2], %s650_s19 }
  0x9f   : > { %v5259_v39 = vld [vmem:[%s7082_s1 + $0x18] sm:$0xff] (!%p4137_p12)   ;;  %v5263_v43 = vld [vmem:[%s7082_s1 + $0x20] sm:$0xff] (!%p4137_p12)   ;;  %v5267_v47 = vld [vmem:[%s7082_s1 + $0x28] sm:$0xff] (!%p4137_p12)  }
  0xa0   : > { %4551 = vmatpush3.bf16.msra.mxu0 (!%p4137_p12), %v5251_v31  ;;  %v5260_v40 = vld [vmem:[%s7082_s1 + $0x98] sm:$0xff] (!%p4137_p12)   ;;  %v5264_v44 = vld [vmem:[%s7082_s1 + $0xa0] sm:$0xff] (!%p4137_p12)   ;;  %v5268_v48 = vld [vmem:[%s7082_s1 + $0xa8] sm:$0xff] (!%p4137_p12)  }
  0xa1   : > { %4615 = vmatpush3.bf16.msra.mxu1 %v5252_v32  ;;  %4552 = vmatprep.subr.bf16.mxu0 %v5253_v33  ;;  %v5269_v49 = vld [vmem:[%s7082_s1 + $0x70] sm:$0xff]   ;;  %v5273_v53 = vld [vmem:[%s7082_s1 + $0x78] sm:$0xff]   ;;  %v684_v57 = vld [vmem:[%s5891_s29 + $0x1] sm:$0xff] }
  0xa2   : > { %4616 = vmatprep.subr.bf16.mxu1 %v5254_v34  ;;  %v5270_v50 = vld [vmem:[%s7082_s1 + $0xf0] sm:$0xff]   ;;  %v5274_v54 = vld [vmem:[%s7082_s1 + $0xf8] sm:$0xff]   ;;  %v4142_v61 = vld [vmem:[%s5891_s29 + $0x20] sm:$0xff] }
  0xa3   : > { %v5271_v51 = vld [vmem:[%s7082_s1 + $0x30] sm:$0xff]   ;;  %v5275_v55 = vld [vmem:[%s7082_s1 + $0x38] sm:$0xff]   ;;  %v652_v62 = vld [vmem:[%s5891_s29] sm:$0xff] }
  0xa4   : > { %4553 = vmatpush3.bf16.msra.mxu0 %v5255_v35  ;;  %v5272_v52 = vld [vmem:[%s7082_s1 + $0xb0] sm:$0xff]   ;;  %v5276_v56 = vld [vmem:[%s7082_s1 + $0xb8] sm:$0xff]   ;;  %v653_v63 = vld [vmem:[%s5891_s29 + $0x8] sm:$0xff] }
  0xa5   : > { %4617 = vmatpush3.bf16.msra.mxu1 %v5256_v36  ;;  %4554 = vmatprep.subr.bf16.mxu0 %v5257_v37  ;;  %v685_v58 = vld [vmem:[%s5891_s29 + $0x9] sm:$0xff]  ;;  %v4141_v59 = vld [vmem:[%s5891_s29 + $0x18] sm:$0xff]  ;;  %v668_v1 = vpack.c.bf16 %v653_v63, %v652_v62  ;;  %v5277_v5 = vld [vmem:[%s7082_s1 + $0x140] sm:$0xff]  }
  0xa6   : > { %4618 = vmatprep.subr.bf16.mxu1 %v5258_v38  ;;  %v700_v60 = vpack.c.bf16 %v685_v58, %v684_v57  ;;  %v768_v0 = vpack.c.bf16 %v4142_v61, %v4141_v59  ;;  %v716_v2 = vld [vmem:[%s5891_s29 + $0x2] sm:$0xff]  ;;  %v717_v3 = vld [vmem:[%s5891_s29 + $0xa] sm:$0xff]  ;;  %v686_v7 = vld [vmem:[%s5891_s29 + $0x19] sm:$0xff] }
  0xa7   : > { %v732_v4 = vpack.c.bf16 %v717_v3, %v716_v2  ;;  %v5278_v6 = vld [vmem:[%s7082_s1 + $0x100] sm:$0xff]   ;;  %v4143_v9 = vld [vmem:[%s5891_s29 + $0x30] sm:$0xff]  ;;  %v4144_v10 = vld [vmem:[%s5891_s29 + $0x38] sm:$0xff] }
  0xa8   : > { %4555 = vmatpush3.bf16.msra.mxu0 %v5259_v39  ;;  %1635 = vmatprep.mubr.bf16.mxu0 %v700_v60  ;;  %v687_v8 = vld [vmem:[%s5891_s29 + $0x21] sm:$0xff]  ;;  %v5913_v12 = vpack.c.bf16 %v4144_v10, %v4143_v9  ;;  %v688_v18 = vld [vmem:[%s5891_s29 + $0x31] sm:$0xff]  ;;  %v689_v19 = vld [vmem:[%s5891_s29 + $0x39] sm:$0xff] }
  0xa9   : > { %4619 = vmatpush3.bf16.msra.mxu1 %v5260_v40  ;;  %4556 = vmatprep.subr.bf16.mxu0 %v5261_v41  ;;  %v5911_v11 = vpack.c.bf16 %v687_v8, %v686_v7  ;;  %v718_v13 = vld [vmem:[%s5891_s29 + $0x1a] sm:$0xff]  ;;  %v719_v14 = vld [vmem:[%s5891_s29 + $0x22] sm:$0xff]  ;;  %v4146_v21 = vld [vmem:[%s5891_s29 + $0x50] sm:$0xff]  ;;  %v5931_v22 = vpack.c.bf16 %v689_v19, %v688_v18 }
  0xaa   : > { %4620 = vmatprep.subr.bf16.mxu1 %v5262_v42  ;;  %1732 = vmatprep.mubr.bf16.mxu1 %v768_v0  ;;  %v5917_v15 = vpack.c.bf16 %v719_v14, %v718_v13  ;;  %v5279_v16 = vld [vmem:[%s7082_s1 + $0x148] sm:$0xff]   ;;  %v720_v24 = vld [vmem:[%s5891_s29 + $0x32] sm:$0xff]  ;;  %v721_v25 = vld [vmem:[%s5891_s29 + $0x3a] sm:$0xff] }
  0xab   : > { %v5280_v17 = vld [vmem:[%s7082_s1 + $0x108] sm:$0xff]   ;;  %v5937_v26 = vpack.c.bf16 %v721_v25, %v720_v24  ;;  %v5281_v27 = vld [vmem:[%s7082_s1 + $0x150] sm:$0xff]   ;;  %v5282_v28 = vld [vmem:[%s7082_s1 + $0x1c0] sm:$0xff]  }
  0xac   : > { %4557 = vmatpush3.bf16.msra.mxu0 %v5263_v43  ;;  %v4145_v20 = vld [vmem:[%s5891_s29 + $0x48] sm:$0xff]  ;;  %v5283_v29 = vld [vmem:[%s7082_s1 + $0x110] sm:$0xff]   ;;  %v5284_v30 = vld [vmem:[%s7082_s1 + $0x180] sm:$0xff]  }
  0xad   : > { %4621 = vmatpush3.bf16.msra.mxu1 %v5264_v44  ;;  %4558 = vmatprep.subr.bf16.mxu0 %v5265_v45  ;;  %v5933_v23 = vpack.c.bf16 %v4146_v21, %v4145_v20  ;;  %v690_v31 = vld [vmem:[%s5891_s29 + $0x49] sm:$0xff]  ;;  %v691_v32 = vld [vmem:[%s5891_s29 + $0x51] sm:$0xff]  ;;  %v4147_v33 = vld [vmem:[%s5891_s29 + $0x60] sm:$0xff] }
  0xae   : > { %4622 = vmatprep.subr.bf16.mxu1 %v5266_v46  ;;  %v4148_v34 = vld [vmem:[%s5891_s29 + $0x68] sm:$0xff]  ;;  %v5958_v35 = vpack.c.bf16 %v691_v32, %v690_v31  ;;  %v723_v38 = vld [vmem:[%s5891_s29 + $0x52] sm:$0xff]  ;;  %v726_v63 = vld [vmem:[%s5891_s29 + $0x7a] sm:$0xff] }
  0xaf   : > { %v5960_v36 = vpack.c.bf16 %v4148_v34, %v4147_v33  ;;  %v722_v37 = vld [vmem:[%s5891_s29 + $0x4a] sm:$0xff]  ;;  %v5285_v40 = vld [vmem:[%s7082_s1 + $0x158] sm:$0xff]   ;;  %v692_v44 = vld [vmem:[%s5891_s29 + $0x61] sm:$0xff] }
  0xb0   : > { %4559 = vmatpush3.bf16.msra.mxu0 %v5267_v47  ;;  %v5964_v39 = vpack.c.bf16 %v723_v38, %v722_v37  ;;  %v5286_v41 = vld [vmem:[%s7082_s1 + $0x1c8] sm:$0xff]   ;;  %v5287_v42 = vld [vmem:[%s7082_s1 + $0x118] sm:$0xff]   ;;  %v4150_v47 = vld [vmem:[%s5891_s29 + $0x80] sm:$0xff] }
  0xb1   : > { %4623 = vmatpush3.bf16.msra.mxu1 %v5268_v48  ;;  %4560 = vmatprep.subr.bf16.mxu0 %v5269_v49  ;;  %v5288_v43 = vld [vmem:[%s7082_s1 + $0x188] sm:$0xff]   ;;  %v4149_v46 = vld [vmem:[%s5891_s29 + $0x78] sm:$0xff]  ;;  %v4151_v59 = vld [vmem:[%s5891_s29 + $0x90] sm:$0xff] }
  0xb2   : > { %4624 = vmatprep.subr.bf16.mxu1 %v5270_v50  ;;  %v693_v45 = vld [vmem:[%s5891_s29 + $0x69] sm:$0xff]  ;;  %v5988_v49 = vpack.c.bf16 %v4150_v47, %v4149_v46  ;;  %v694_v57 = vld [vmem:[%s5891_s29 + $0x79] sm:$0xff]  ;;  %v695_v58 = vld [vmem:[%s5891_s29 + $0x81] sm:$0xff] }
  0xb3   : > { %v5986_v48 = vpack.c.bf16 %v693_v45, %v692_v44  ;;  %v724_v50 = vld [vmem:[%s5891_s29 + $0x62] sm:$0xff]  ;;  %v4152_v60 = vld [vmem:[%s5891_s29 + $0x98] sm:$0xff]  ;;  %v6011_v61 = vpack.c.bf16 %v695_v58, %v694_v57  ;;  %v4154_v9 = vld [vmem:[%s5891_s29 + $0xb0] sm:$0xff] }
  0xb4   : > { %4561 = vmatpush3.bf16.msra.mxu0 %v5271_v51  ;;  %v725_v51 = vld [vmem:[%s5891_s29 + $0x6a] sm:$0xff]  ;;  %v6013_v62 = vpack.c.bf16 %v4152_v60, %v4151_v59  ;;  %v5294_v3 = vld [vmem:[%s7082_s1 + $0x1d8] sm:$0xff]   ;;  %v5298_v19 = vld [vmem:[%s7082_s1 + $0x1e0] sm:$0xff]  }
  0xb5   : > { %4625 = vmatpush3.bf16.msra.mxu1 %v5272_v52  ;;  %4562 = vmatprep.subr.bf16.mxu0 %v5273_v53  ;;  %v5992_v52 = vpack.c.bf16 %v725_v51, %v724_v50  ;;  %v5289_v53 = vld [vmem:[%s7082_s1 + $0x160] sm:$0xff]   ;;  %v5293_v2 = vld [vmem:[%s7082_s1 + $0x168] sm:$0xff]   ;;  %v728_v14 = vld [vmem:[%s5891_s29 + $0x92] sm:$0xff] }
  0xb6   : > { %4626 = vmatprep.subr.bf16.mxu1 %v5274_v54  ;;  %v5290_v54 = vld [vmem:[%s7082_s1 + $0x1d0] sm:$0xff]   ;;  %v697_v7 = vld [vmem:[%s5891_s29 + $0x99] sm:$0xff]  ;;  %v4153_v8 = vld [vmem:[%s5891_s29 + $0xa8] sm:$0xff] }
  0xb7   : > { %v6040_v13 = vpack.c.bf16 %v4154_v9, %v4153_v8  ;;  %v5297_v18 = vld [vmem:[%s7082_s1 + $0x170] sm:$0xff]   ;;  %v5300_v21 = vld [vmem:[%s7082_s1 + $0x1a0] sm:$0xff]   ;;  %v5301_v24 = vld [vmem:[%s7082_s1 + $0x1e8] sm:$0xff]  }
  0xb8   : > { %4563 = vmatpush3.bf16.msra.mxu0 %v5275_v55  ;;  %v5291_v55 = vld [vmem:[%s7082_s1 + $0x120] sm:$0xff]   ;;  %v5299_v20 = vld [vmem:[%s7082_s1 + $0x130] sm:$0xff]   ;;  %v5302_v25 = vld [vmem:[%s7082_s1 + $0x1a8] sm:$0xff]  }
  0xb9   : > { %4627 = vmatpush3.bf16.msra.mxu1 %v5276_v56  ;;  %4676 = vmatprep.subr.bf16.mxu0 %v5277_v5  ;;  %v5292_v56 = vld [vmem:[%s7082_s1 + $0x190] sm:$0xff]   ;;  %v5296_v5 = vld [vmem:[%s7082_s1 + $0x198] sm:$0xff]   ;;  %v5309_v45 = vld [vmem:[%s7082_s1 + $0x200] sm:$0xff]  }
  0xba   : > { %4740 = vmatprep.subr.bf16.mxu1 %v5282_v28  ;;  %v699_v28 = vld [vmem:[%s5891_s29 + $0xb1] sm:$0xff]  ;;  %v4219_v46 = vld [vmem:[%s5891_s29 + $0xc1] sm:$0xff]  ;;  %v4220_v47 = vld [vmem:[%s5891_s29 + $0xc9] sm:$0xff] }
  0xbb   : > { %1636 = vmatmul.mubr.bf16.vlgmr.msra.gmra.mrb[0].mxu0 %v668_v1  ;;  %v730_v33 = vld [vmem:[%s5891_s29 + $0xaa] sm:$0xff]  ;;  %v731_v34 = vld [vmem:[%s5891_s29 + $0xb2] sm:$0xff]  ;;  %v6111_v50 = vpack.c.bf16 %v4220_v47, %v4219_v46  ;;  %v4187_v51 = vld [vmem:[%s5891_s29 + $0xc2] sm:$0xff] }
  0xbc   : > { %1733 = vmatmul.mubr.bf16.vlgmr.msra.gmra.mrb[0].mxu1 %v732_v4  ;;  %4677 = vmatpush3.bf16.msra.mxu0 %v5278_v6  ;;  %v5295_v4 = vld [vmem:[%s7082_s1 + $0x128] sm:$0xff]   ;;  %v696_v6 = vld [vmem:[%s5891_s29 + $0x91] sm:$0xff]  ;;  %v6078_v37 = vpack.c.bf16 %v731_v34, %v730_v33  ;;  %v6129_v59 = vld [vmem:[%s5891_s29 + $0xe0] sm:$0xff] }
  0xbd   : > { %1643 = vmatprep.mubr.bf16.mxu0 %v5911_v11  ;;  %1740 = vmatprep.mubr.bf16.mxu1 %v5913_v12  ;;  %v6038_v10 = vpack.c.bf16 %v697_v7, %v696_v6  ;;  %v5303_v38 = vld [vmem:[%s7082_s1 + $0x178] sm:$0xff]  }
  0xbe   : > { %4678 = vmatprep.subr.bf16.mxu0 %v5279_v16  ;;  %4741 = vmatpush3.bf16.msra.mxu1 %v5284_v30  ;;  %v729_v16 = vld [vmem:[%s5891_s29 + $0x9a] sm:$0xff]  ;;  %v4156_v30 = vld [vmem:[%s5891_s29 + $0xc8] sm:$0xff] }
  0xbf   : > { %4742 = vmatprep.subr.bf16.mxu1 %v5286_v41  ;;  %v5305_v41 = vld [vmem:[%s7082_s1 + $0x138] sm:$0xff]  }
  0xc0   : > { %4679 = vmatpush3.bf16.msra.mxu0 %v5280_v17  ;;  %v6044_v17 = vpack.c.bf16 %v729_v16, %v728_v14  ;;  %v5308_v44 = vld [vmem:[%s7082_s1 + $0x1b8] sm:$0xff]  }
  0xc1   : > { %4680 = vmatprep.subr.bf16.mxu0 %v5281_v27  ;;  %v698_v27 = vld [vmem:[%s5891_s29 + $0xa9] sm:$0xff]  ;;  %v6124_v57 = vld [vmem:[%s5891_s29 + $0xd8] sm:$0xff] }
  0xc2   : > { %4743 = vmatpush3.bf16.msra.mxu1 %v5288_v43  ;;  %v6072_v31 = vpack.c.bf16 %v699_v28, %v698_v27  ;;  %v5307_v43 = vld [vmem:[%s7082_s1 + $0x1f8] sm:$0xff]   ;;  %v875_v60 = vpack.c.bf16 %v6129_v59, %v6124_v57 }
  0xc3   : > { %1644 = vmatmul.mubr.bf16.gmra.mrb[4].mxu0 %v768_v0  ;;  %4744 = vmatprep.subr.bf16.mxu1 %v5290_v54  ;;  %v727_v0 = vld [vmem:[%s5891_s29 + $0x82] sm:$0xff] }
  0xc4   : > { %1741 = vmatmul.mubr.bf16.gmra.mrb[4].mxu1 %v5917_v15  ;;  %1651 = vmatprep.mubr.bf16.mxu0 %v5931_v22  ;;  %v6019_v1 = vpack.c.bf16 %v727_v0, %v726_v63  ;;  %v6134_v63 = vld [vmem:[%s5891_s29 + $0xda] sm:$0xff]  ;;  %v6137_v0 = vld [vmem:[%s5891_s29 + $0xe2] sm:$0xff] }
  0xc5   : > { %1748 = vmatprep.mubr.bf16.mxu1 %v5933_v23  ;;  %4681 = vmatpush3.bf16.msra.mxu0 %v5283_v29  ;;  %v4155_v29 = vld [vmem:[%s5891_s29 + $0xc0] sm:$0xff] }
  0xc6   : > { %4682 = vmatprep.subr.bf16.mxu0 %v5285_v40  ;;  %4745 = vmatpush3.bf16.msra.mxu1 %v5292_v56  ;;  %v6074_v32 = vpack.c.bf16 %v4156_v30, %v4155_v29  ;;  %v5304_v40 = vld [vmem:[%s7082_s1 + $0x1f0] sm:$0xff]   ;;  %v6121_v56 = vld [vmem:[%s5891_s29 + $0xe1] sm:$0xff] }
  0xc7   : > { %4746 = vmatprep.subr.bf16.mxu1 %v5294_v3  ;;  %v5310_v3 = vld [vmem:[%s7082_s1 + $0x208] sm:$0xff]  }
  0xc9   : > { %4683 = vmatpush3.bf16.msra.mxu0 %v5287_v42  ;;  %v5306_v42 = vld [vmem:[%s7082_s1 + $0x1b0] sm:$0xff]  }
  0xca   : > { %4684 = vmatprep.subr.bf16.mxu0 %v5289_v53  ;;  %4747 = vmatpush3.bf16.msra.mxu1 %v5296_v5  ;;  %v4188_v53 = vld [vmem:[%s5891_s29 + $0xca] sm:$0xff] }
  0xcb   : > { %1652 = vmatmul.mubr.bf16.gmra.mrb[8].mxu0 %v5913_v12  ;;  %4748 = vmatprep.subr.bf16.mxu1 %v5298_v19  ;;  %v6115_v54 = vpack.c.bf16 %v4188_v53, %v4187_v51 }
  0xcc   : > { %1749 = vmatmul.mubr.bf16.gmra.mrb[8].mxu1 %v5937_v26  ;;  %1659 = vmatprep.mubr.bf16.mxu0 %v5958_v35 }
  0xcd   : > { %1756 = vmatprep.mubr.bf16.mxu1 %v5960_v36  ;;  %4685 = vmatpush3.bf16.msra.mxu0 %v5291_v55  ;;  %v6118_v55 = vld [vmem:[%s5891_s29 + $0xd9] sm:$0xff] }
  0xce   : > { %4686 = vmatprep.subr.bf16.mxu0 %v5293_v2  ;;  %4749 = vmatpush3.bf16.msra.mxu1 %v5300_v21  ;;  %v907_v58 = vpack.c.bf16 %v6121_v56, %v6118_v55  ;;  %v939_v2 = vpack.c.bf16 %v6137_v0, %v6134_v63 }
  0xcf   : > { %4750 = vmatprep.subr.bf16.mxu1 %v5301_v24 }
  0xd1   : > { %4687 = vmatpush3.bf16.msra.mxu0 %v5295_v4  ;;  %v5311_v4 = vld [vmem:[%s7082_s1 + $0x210] sm:$0xff]  }
  0xd2   : > { %4688 = vmatprep.subr.bf16.mxu0 %v5297_v18  ;;  %4751 = vmatpush3.bf16.msra.mxu1 %v5302_v25 }
  0xd3   : > { %1660 = vmatmul.mubr.bf16.gmra.mrb[12].mxu0 %v5933_v23  ;;  %4752 = vmatprep.subr.bf16.mxu1 %v5304_v40 }
  0xd4   : > { %1757 = vmatmul.mubr.bf16.gmra.mrb[12].mxu1 %v5964_v39  ;;  %1667 = vmatprep.mubr.bf16.mxu0 %v5986_v48 }
  0xd5   : > { %1764 = vmatprep.mubr.bf16.mxu1 %v5988_v49  ;;  %4689 = vmatpush3.bf16.msra.mxu0 %v5299_v20 }
  0xd6   : > { %4690 = vmatprep.subr.bf16.mxu0 %v5303_v38  ;;  %4753 = vmatpush3.bf16.msra.mxu1 %v5306_v42 }
  0xd7   : > { %4754 = vmatprep.subr.bf16.mxu1 %v5307_v43 }
  0xd9   : > { %4691 = vmatpush3.bf16.msra.mxu0 %v5305_v41 }
  0xda   : > { %5092 = vmatprep.subr.bf16.mxu0 %v5309_v45  ;;  %4755 = vmatpush3.bf16.msra.mxu1 %v5308_v44 }
  0xdb   : > { %1668 = vmatmul.mubr.bf16.gmra.mrb[16].mxu0 %v5960_v36  ;;  %5156 = vmatprep.subr.bf16.mxu1 %v5309_v45 }
  0xdc   : > { %1765 = vmatmul.mubr.bf16.gmra.mrb[16].mxu1 %v5992_v52  ;;  %1675 = vmatprep.mubr.bf16.mxu0 %v6011_v61 }
  0xdd   : > { %1772 = vmatprep.mubr.bf16.mxu1 %v6013_v62 }
  0xe3   : > { %1676 = vmatmul.mubr.bf16.gmra.mrb[20].mxu0 %v5988_v49 }
  0xe4   : > { %1773 = vmatmul.mubr.bf16.gmra.mrb[20].mxu1 %v6019_v1  ;;  %1683 = vmatprep.mubr.bf16.mxu0 %v6038_v10 }
  0xe5   : > { %1780 = vmatprep.mubr.bf16.mxu1 %v6040_v13 }
  0xeb   : > { %1684 = vmatmul.mubr.bf16.gmra.mrb[24].mxu0 %v6013_v62 }
  0xec   : > { %1781 = vmatmul.mubr.bf16.gmra.mrb[24].mxu1 %v6044_v17  ;;  %1691 = vmatprep.mubr.bf16.mxu0 %v6072_v31 }
  0xed   : > { %1788 = vmatprep.mubr.bf16.mxu1 %v6074_v32 }
  0xf3   : > { %1692 = vmatmul.mubr.bf16.gmra.mrb[28].mxu0 %v6040_v13 }
  0xf4   : > { %1789 = vmatmul.mubr.bf16.gmra.mrb[28].mxu1 %v6078_v37  ;;  %1829 = vmatprep.mubr.bf16.mxu0 %v5917_v15  ;;  %v5314_v15 = vld [vmem:[%s7082_s1 + $0x228] sm:$0xff]  }
  0xf5   : > { %1926 = vmatprep.mubr.bf16.mxu1 %v5931_v22 }
  0xfb   : > { %1830 = vmatmul.mubr.bf16.vlgmr.msra.gmra.mrb[32].mxu0 %v5911_v11  ;;  %v5312_v11 = vld [vmem:[%s7082_s1 + $0x218] sm:$0xff]  }
  0xfc   : > { %1927 = vmatmul.mubr.bf16.vlgmr.msra.gmra.mrb[32].mxu1 %v5913_v12  ;;  %5093 = vmatpush3.bf16.msra.mxu0 %v5309_v45  ;;  %v5313_v12 = vld [vmem:[%s7082_s1 + $0x220] sm:$0xff]  }
  0xfd   : > { %1837 = vmatprep.mubr.bf16.mxu0 %v5937_v26  ;;  %1934 = vmatprep.mubr.bf16.mxu1 %v5958_v35 }
  0xfe   : > { %5094 = vmatprep.subr.bf16.mxu0 %v5310_v3  ;;  %5164 = vmatpush3.bf16.msra.mxu1 %v5309_v45 }
  0xff   : > { %5157 = vmatprep.subr.bf16.mxu1 %v5310_v3 }
 0x100   : > { %5095 = vmatpush3.bf16.msra.mxu0 %v5310_v3 }
 0x101   : > { %5096 = vmatprep.subr.bf16.mxu0 %v5311_v4 }
 0x102   : > { %5165 = vmatpush3.bf16.msra.mxu1 %v5310_v3 }
 0x103   : > { %1838 = vmatmul.mubr.bf16.gmra.mrb[36].mxu0 %v5931_v22  ;;  %5158 = vmatprep.subr.bf16.mxu1 %v5311_v4  ;;  %v5315_v22 = vld [vmem:[%s7082_s1 + $0x230] sm:$0xff]  }
 0x104   : > { %1935 = vmatmul.mubr.bf16.gmra.mrb[36].mxu1 %v5933_v23  ;;  %1845 = vmatprep.mubr.bf16.mxu0 %v5964_v39  ;;  %v5316_v23 = vld [vmem:[%s7082_s1 + $0x238] sm:$0xff]  }
 0x105   : > { %1942 = vmatprep.mubr.bf16.mxu1 %v5986_v48  ;;  %5097 = vmatpush3.bf16.msra.mxu0 %v5311_v4 }
 0x106   : > { %5098 = vmatprep.subr.bf16.mxu0 %v5312_v11  ;;  %5166 = vmatpush3.bf16.msra.mxu1 %v5311_v4 }
 0x107   : > { %5159 = vmatprep.subr.bf16.mxu1 %v5312_v11 }
 0x109   : > { %5099 = vmatpush3.bf16.msra.mxu0 %v5312_v11 }
 0x10a   : > { %5100 = vmatprep.subr.bf16.mxu0 %v5313_v12  ;;  %5167 = vmatpush3.bf16.msra.mxu1 %v5312_v11 }
 0x10b   : > { %1846 = vmatmul.mubr.bf16.gmra.mrb[40].mxu0 %v5958_v35  ;;  %5160 = vmatprep.subr.bf16.mxu1 %v5313_v12 }
 0x10c   : > { %1943 = vmatmul.mubr.bf16.gmra.mrb[40].mxu1 %v5960_v36  ;;  %1853 = vmatprep.mubr.bf16.mxu0 %v5992_v52 }
 0x10d   : > { %1950 = vmatprep.mubr.bf16.mxu1 %v6011_v61  ;;  %5101 = vmatpush3.bf16.msra.mxu0 %v5313_v12 }
 0x10e   : > { %5102 = vmatprep.subr.bf16.mxu0 %v5314_v15  ;;  %5168 = vmatpush3.bf16.msra.mxu1 %v5313_v12 }
 0x10f   : > { %5161 = vmatprep.subr.bf16.mxu1 %v5314_v15 }
 0x111   : > { %5103 = vmatpush3.bf16.msra.mxu0 %v5314_v15 }
 0x112   : > { %5104 = vmatprep.subr.bf16.mxu0 %v5315_v22  ;;  %5169 = vmatpush3.bf16.msra.mxu1 %v5314_v15 }
 0x113   : > { %1854 = vmatmul.mubr.bf16.gmra.mrb[44].mxu0 %v5986_v48  ;;  %5162 = vmatprep.subr.bf16.mxu1 %v5315_v22 }
 0x114   : > { %1951 = vmatmul.mubr.bf16.gmra.mrb[44].mxu1 %v5988_v49  ;;  %1861 = vmatprep.mubr.bf16.mxu0 %v6019_v1 }
 0x115   : > { %1958 = vmatprep.mubr.bf16.mxu1 %v6038_v10  ;;  %5105 = vmatpush3.bf16.msra.mxu0 %v5315_v22 }
 0x116   : > { %5106 = vmatprep.subr.bf16.mxu0 %v5316_v23  ;;  %5170 = vmatpush3.bf16.msra.mxu1 %v5315_v22 }
 0x117   : > { %5163 = vmatprep.subr.bf16.mxu1 %v5316_v23 }
 0x119   : > { %5107 = vmatpush3.bf16.msra.mxu0 %v5316_v23 }
 0x11a   : > { %5171 = vmatpush3.bf16.msra.mxu1 %v5316_v23 }
 0x11b   : > { %1862 = vmatmul.mubr.bf16.gmra.mrb[48].mxu0 %v6011_v61 }
 0x11c   : > { %1959 = vmatmul.mubr.bf16.gmra.mrb[48].mxu1 %v6013_v62  ;;  %1869 = vmatprep.mubr.bf16.mxu0 %v6044_v17 }
 0x11d   : > { %1966 = vmatprep.mubr.bf16.mxu1 %v6072_v31 }
 0x123   : > { %1870 = vmatmul.mubr.bf16.gmra.mrb[52].mxu0 %v6038_v10 }
 0x124   : > { %1967 = vmatmul.mubr.bf16.gmra.mrb[52].mxu1 %v6040_v13  ;;  %1877 = vmatprep.mubr.bf16.mxu0 %v6078_v37 }
 0x125   : > { %1974 = vmatprep.mubr.bf16.mxu1 %v6111_v50 }
 0x12b   : > { %1878 = vmatmul.mubr.bf16.gmra.mrb[56].mxu0 %v6072_v31 }
 0x12c   : > { %1975 = vmatmul.mubr.bf16.gmra.mrb[56].mxu1 %v6074_v32  ;;  %1885 = vmatprep.mubr.bf16.mxu0 %v6115_v54 }
 0x12d   : > { %1982 = vmatprep.mubr.bf16.mxu1 %v907_v58 }
 0x133   : > { %1886 = vmatmul.mubr.bf16.gmra.mrb[60].mxu0 %v6111_v50 }
 0x134   : > { %1983 = vmatmul.mubr.bf16.gmra.mrb[60].mxu1 %v875_v60  ;;  %5108 = vmatprep.mubr.bf16.mxu0 %v5937_v26  ;;  %v6213_v26 = vld [vmem:[%s7083_s2] ss:$0 sm:$0xff] }
 0x135   : > { %5116 = vmatprep.mubr.bf16.mxu1 %v6044_v17 }
 0x13b   : > { %5109 = vmatmul.mubr.bf16.vlgmr.msra.gmra.mrb[64].mxu0 %v5964_v39 }
 0x13c   : > { %5117 = vmatmul.mubr.bf16.vlgmr.msra.gmra.mrb[64].mxu1 %v6078_v37  ;;  %5112 = vmatprep.mubr.bf16.mxu0 %v5992_v52 }
 0x13d   : > { %5120 = vmatprep.mubr.bf16.mxu1 %v6115_v54 }
 0x143   : > { %5113 = vmatmul.mubr.bf16.gmra.mrb[68].mxu0 %v6019_v1 }
 0x144   : > { %5121 = vmatmul.mubr.bf16.gmra.mrb[68].mxu1 %v939_v2 }
 0x18e   : > { %v4564_v35 = vpop.f32.mrb[0].mxu0 }
 0x18f   : > { %v4565_v36 = vpop.f32.mrb[1].mxu0  ;;  %v4628_v39 = vpop.f32.mrb[0].mxu1 }
 0x190   : > { %v4566_v48 = vadd.f32 %v4565_v36, %v4564_v35  ;;  %v4567_v49 = vpop.f32.mrb[2].mxu0  ;;  %v4629_v61 = vpop.f32.mrb[1].mxu1 }
 0x191   : > { %v4568_v52 = vpop.f32.mrb[3].mxu0  ;;  %v4630_v62 = vadd.f32 %v4629_v61, %v4628_v39  ;;  %v4631_v5 = vpop.f32.mrb[2].mxu1 }
 0x192   : > { %v1638_v1 = vadd.f32 %v4566_v48, %v6213_v26  ;;  %v4569_v6 = vadd.f32 %v4568_v52, %v4567_v49  ;;  %v4632_v7 = vpop.f32.mrb[3].mxu1 }
 0x193   : > { %v4633_v8 = vadd.f32 %v4632_v7, %v4631_v5 }
 0x194   : > { %v1641_v9 = vadd.f32 %v4569_v6, %v6213_v26  ;;  %v6217_v10 = vadd.f32 %v4630_v62, %v1638_v1 }
 0x196   : > { %v6219_v13 = vadd.f32 %v4633_v8, %v1641_v9  ;;  %v4570_v14 = vpop.f32.mrb[4].mxu0 }
 0x197   : > { %v4571_v16 = vpop.f32.mrb[5].mxu0  ;;  %v4634_v17 = vpop.f32.mrb[4].mxu1 }
 0x198   : > { %v4572_v18 = vadd.f32 %v4571_v16, %v4570_v14  ;;  %v4573_v19 = vpop.f32.mrb[6].mxu0  ;;  %v4635_v20 = vpop.f32.mrb[5].mxu1 }
 0x199   : > { %v4574_v21 = vpop.f32.mrb[7].mxu0  ;;  %v4636_v24 = vadd.f32 %v4635_v20, %v4634_v17  ;;  %v4637_v25 = vpop.f32.mrb[6].mxu1 }
 0x19a   : > { %v1646_v27 = vadd.f32 %v4572_v18, %v6213_v26  ;;  %v4575_v28 = vadd.f32 %v4574_v21, %v4573_v19  ;;  %v4638_v29 = vpop.f32.mrb[7].mxu1 }
 0x19b   : > { %v4639_v30 = vadd.f32 %v4638_v29, %v4637_v25 }
 0x19c   : > { %v1649_v31 = vadd.f32 %v4575_v28, %v6213_v26  ;;  %v6223_v32 = vadd.f32 %v4636_v24, %v1646_v27 }
 0x19e   : > { %v6225_v33 = vadd.f32 %v4639_v30, %v1649_v31  ;;  %v4576_v34 = vpop.f32.mrb[8].mxu0 }
 0x19f   : > { %v4577_v37 = vpop.f32.mrb[9].mxu0  ;;  %v4640_v38 = vpop.f32.mrb[8].mxu1 }
 0x1a0   : > { %v4578_v40 = vadd.f32 %v4577_v37, %v4576_v34  ;;  %v4579_v41 = vpop.f32.mrb[10].mxu0  ;;  %v4641_v42 = vpop.f32.mrb[9].mxu1 }
 0x1a1   : > { %v4580_v43 = vpop.f32.mrb[11].mxu0  ;;  %v4642_v44 = vadd.f32 %v4641_v42, %v4640_v38  ;;  %v4643_v45 = vpop.f32.mrb[10].mxu1 }
 0x1a2   : > { %v1654_v46 = vadd.f32 %v4578_v40, %v6213_v26  ;;  %v4581_v47 = vadd.f32 %v4580_v43, %v4579_v41  ;;  %v4644_v50 = vpop.f32.mrb[11].mxu1 }
 0x1a3   : > { %v4645_v51 = vadd.f32 %v4644_v50, %v4643_v45 }
 0x1a4   : > { %v1657_v53 = vadd.f32 %v4581_v47, %v6213_v26  ;;  %v6229_v54 = vadd.f32 %v4642_v44, %v1654_v46 }
 0x1a6   : > { %v6231_v55 = vadd.f32 %v4645_v51, %v1657_v53  ;;  %v4582_v56 = vpop.f32.mrb[12].mxu0 }
 0x1a7   : > { %v4583_v57 = vpop.f32.mrb[13].mxu0  ;;  %v4646_v58 = vpop.f32.mrb[12].mxu1 }
 0x1a8   : > { %v4584_v59 = vadd.f32 %v4583_v57, %v4582_v56  ;;  %v4585_v60 = vpop.f32.mrb[14].mxu0  ;;  %v4647_v63 = vpop.f32.mrb[13].mxu1 }
 0x1a9   : > { %v4586_v0 = vpop.f32.mrb[15].mxu0  ;;  %v4648_v2 = vadd.f32 %v4647_v63, %v4646_v58  ;;  %v4649_v3 = vpop.f32.mrb[14].mxu1 }
 0x1aa   : > { %v1662_v4 = vadd.f32 %v4584_v59, %v6213_v26  ;;  %v4587_v11 = vadd.f32 %v4586_v0, %v4585_v60  ;;  %v4650_v12 = vpop.f32.mrb[15].mxu1 }
 0x1ab   : > { %v4651_v15 = vadd.f32 %v4650_v12, %v4649_v3 }
 0x1ac   : > { %v1665_v22 = vadd.f32 %v4587_v11, %v6213_v26  ;;  %v6235_v23 = vadd.f32 %v4648_v2, %v1662_v4 }
 0x1ae   : > { %v6237_v35 = vadd.f32 %v4651_v15, %v1665_v22  ;;  %v4588_v36 = vpop.f32.mrb[16].mxu0 }
 0x1af   : > { %v4589_v39 = vpop.f32.mrb[17].mxu0  ;;  %v4652_v48 = vpop.f32.mrb[16].mxu1 }
 0x1b0   : > { %v4590_v49 = vadd.f32 %v4589_v39, %v4588_v36  ;;  %v4591_v61 = vpop.f32.mrb[18].mxu0  ;;  %v4653_v52 = vpop.f32.mrb[17].mxu1 }
 0x1b1   : > { %v4592_v62 = vpop.f32.mrb[19].mxu0  ;;  %v4654_v5 = vadd.f32 %v4653_v52, %v4652_v48  ;;  %v4655_v1 = vpop.f32.mrb[18].mxu1 }
 0x1b2   : > { %v1670_v6 = vadd.f32 %v4590_v49, %v6213_v26  ;;  %v4593_v7 = vadd.f32 %v4592_v62, %v4591_v61  ;;  %v4656_v8 = vpop.f32.mrb[19].mxu1 }
 0x1b3   : > { %v4657_v9 = vadd.f32 %v4656_v8, %v4655_v1 }
 0x1b4   : > { %v1673_v14 = vadd.f32 %v4593_v7, %v6213_v26  ;;  %v6241_v16 = vadd.f32 %v4654_v5, %v1670_v6 }
 0x1b6   : > { %v6243_v17 = vadd.f32 %v4657_v9, %v1673_v14  ;;  %v4594_v18 = vpop.f32.mrb[20].mxu0 }
 0x1b7   : > { %v4595_v19 = vpop.f32.mrb[21].mxu0  ;;  %v4658_v20 = vpop.f32.mrb[20].mxu1 }
 0x1b8   : > { %v4596_v21 = vadd.f32 %v4595_v19, %v4594_v18  ;;  %v4597_v24 = vpop.f32.mrb[22].mxu0  ;;  %v4659_v25 = vpop.f32.mrb[21].mxu1 }
 0x1b9   : > { %v4598_v27 = vpop.f32.mrb[23].mxu0  ;;  %v4660_v28 = vadd.f32 %v4659_v25, %v4658_v20  ;;  %v4661_v29 = vpop.f32.mrb[22].mxu1 }
 0x1ba   : > { %v1678_v30 = vadd.f32 %v4596_v21, %v6213_v26  ;;  %v4599_v31 = vadd.f32 %v4598_v27, %v4597_v24  ;;  %v4662_v34 = vpop.f32.mrb[23].mxu1 }
 0x1bb   : > { %v4663_v37 = vadd.f32 %v4662_v34, %v4661_v29 }
 0x1bc   : > { %v1681_v38 = vadd.f32 %v4599_v31, %v6213_v26  ;;  %v6247_v40 = vadd.f32 %v4660_v28, %v1678_v30 }
 0x1be   : > { %v6249_v41 = vadd.f32 %v4663_v37, %v1681_v38  ;;  %v4600_v42 = vpop.f32.mrb[24].mxu0 }
 0x1bf   : > { %v4601_v43 = vpop.f32.mrb[25].mxu0  ;;  %v4664_v44 = vpop.f32.mrb[24].mxu1 }
 0x1c0   : > { %v4602_v45 = vadd.f32 %v4601_v43, %v4600_v42  ;;  %v4603_v46 = vpop.f32.mrb[26].mxu0  ;;  %v4665_v47 = vpop.f32.mrb[25].mxu1 }
 0x1c1   : > { %v4604_v50 = vpop.f32.mrb[27].mxu0  ;;  %v4666_v51 = vadd.f32 %v4665_v47, %v4664_v44  ;;  %v4667_v53 = vpop.f32.mrb[26].mxu1 }
 0x1c2   : > { %v1686_v56 = vadd.f32 %v4602_v45, %v6213_v26  ;;  %v4605_v57 = vadd.f32 %v4604_v50, %v4603_v46  ;;  %v4668_v58 = vpop.f32.mrb[27].mxu1 }
 0x1c3   : > { %v4669_v59 = vadd.f32 %v4668_v58, %v4667_v53 }
 0x1c4   : > { %v1689_v60 = vadd.f32 %v4605_v57, %v6213_v26  ;;  %v6253_v63 = vadd.f32 %v4666_v51, %v1686_v56 }
 0x1c6   : > { %v6255_v0 = vadd.f32 %v4669_v59, %v1689_v60  ;;  %v4606_v2 = vpop.f32.mrb[28].mxu0 }
 0x1c7   : > { %v4607_v3 = vpop.f32.mrb[29].mxu0  ;;  %v4670_v4 = vpop.f32.mrb[28].mxu1 }
 0x1c8   : > { %v4608_v11 = vadd.f32 %v4607_v3, %v4606_v2  ;;  %v4609_v12 = vpop.f32.mrb[30].mxu0  ;;  %v4671_v15 = vpop.f32.mrb[29].mxu1 }
 0x1c9   : > { %v4610_v22 = vpop.f32.mrb[31].mxu0  ;;  %v4672_v36 = vadd.f32 %v4671_v15, %v4670_v4  ;;  %v4673_v39 = vpop.f32.mrb[30].mxu1 }
 0x1ca   : > { %v1694_v48 = vadd.f32 %v4608_v11, %v6213_v26  ;;  %v4611_v49 = vadd.f32 %v4610_v22, %v4609_v12  ;;  %v4674_v61 = vpop.f32.mrb[31].mxu1 }
 0x1cb   : > { %v4675_v52 = vadd.f32 %v4674_v61, %v4673_v39 }
 0x1cc   : > { %v1697_v62 = vadd.f32 %v4611_v49, %v6213_v26  ;;  %v6259_v5 = vadd.f32 %v4672_v36, %v1694_v48 }
 0x1ce   : > { %v6261_v1 = vadd.f32 %v4675_v52, %v1697_v62  ;;  %v4692_v6 = vpop.f32.mrb[32].mxu0 }
 0x1cf   : > { %v4693_v7 = vpop.f32.mrb[33].mxu0  ;;  %v4756_v8 = vpop.f32.mrb[32].mxu1 }
 0x1d0   : > { %v4694_v9 = vadd.f32 %v4693_v7, %v4692_v6  ;;  %v4695_v14 = vpop.f32.mrb[34].mxu0  ;;  %v4757_v18 = vpop.f32.mrb[33].mxu1 }
 0x1d1   : > { %v4696_v19 = vpop.f32.mrb[35].mxu0  ;;  %v4758_v20 = vadd.f32 %v4757_v18, %v4756_v8  ;;  %v4759_v21 = vpop.f32.mrb[34].mxu1 }
 0x1d2   : > { %v1832_v24 = vadd.f32 %v4694_v9, %v6217_v10  ;;  %v4697_v25 = vadd.f32 %v4696_v19, %v4695_v14  ;;  %v4760_v27 = vpop.f32.mrb[35].mxu1 }
 0x1d3   : > { %v4761_v28 = vadd.f32 %v4760_v27, %v4759_v21 }
 0x1d4   : > { %v1835_v26 = vadd.f32 %v4697_v25, %v6219_v13  ;;  %v6265_v29 = vadd.f32 %v4758_v20, %v1832_v24 }
 0x1d6   : > { %v4698_v30 = vpop.f32.mrb[36].mxu0  ;;  %v6267_v31 = vadd.f32 %v4761_v28, %v1835_v26 }
 0x1d7   : > { %v4699_v34 = vpop.f32.mrb[37].mxu0  ;;  %v4762_v37 = vpop.f32.mrb[36].mxu1 }
 0x1d8   : > { %v4700_v38 = vadd.f32 %v4699_v34, %v4698_v30  ;;  %v4701_v42 = vpop.f32.mrb[38].mxu0  ;;  %v4763_v43 = vpop.f32.mrb[37].mxu1 }
 0x1d9   : > { %v4702_v44 = vpop.f32.mrb[39].mxu0  ;;  %v4764_v45 = vadd.f32 %v4763_v43, %v4762_v37  ;;  %v4765_v46 = vpop.f32.mrb[38].mxu1 }
 0x1da   : > { %v1840_v10 = vadd.f32 %v4700_v38, %v6223_v32  ;;  %v4703_v47 = vadd.f32 %v4702_v44, %v4701_v42  ;;  %v4766_v50 = vpop.f32.mrb[39].mxu1 }
 0x1db   : > { %v4767_v51 = vadd.f32 %v4766_v50, %v4765_v46 }
 0x1dc   : > { %v1843_v13 = vadd.f32 %v4703_v47, %v6225_v33  ;;  %v6271_v53 = vadd.f32 %v4764_v45, %v1840_v10 }
 0x1de   : > { %v4704_v56 = vpop.f32.mrb[40].mxu0  ;;  %v6273_v57 = vadd.f32 %v4767_v51, %v1843_v13 }
 0x1df   : > { %v4705_v58 = vpop.f32.mrb[41].mxu0  ;;  %v4768_v59 = vpop.f32.mrb[40].mxu1 }
 0x1e0   : > { %v4706_v60 = vadd.f32 %v4705_v58, %v4704_v56  ;;  %v4707_v2 = vpop.f32.mrb[42].mxu0  ;;  %v4769_v3 = vpop.f32.mrb[41].mxu1 }
 0x1e1   : > { %v4708_v4 = vpop.f32.mrb[43].mxu0  ;;  %v4770_v11 = vadd.f32 %v4769_v3, %v4768_v59  ;;  %v4771_v12 = vpop.f32.mrb[42].mxu1 }
 0x1e2   : > { %v1848_v32 = vadd.f32 %v4706_v60, %v6229_v54  ;;  %v4709_v15 = vadd.f32 %v4708_v4, %v4707_v2  ;;  %v4772_v22 = vpop.f32.mrb[43].mxu1 }
 0x1e3   : > { %v4773_v36 = vadd.f32 %v4772_v22, %v4771_v12 }
 0x1e4   : > { %v1851_v33 = vadd.f32 %v4709_v15, %v6231_v55  ;;  %v6277_v39 = vadd.f32 %v4770_v11, %v1848_v32 }
 0x1e6   : > { %v4710_v48 = vpop.f32.mrb[44].mxu0  ;;  %v6279_v49 = vadd.f32 %v4773_v36, %v1851_v33 }
 0x1e7   : > { %v4711_v61 = vpop.f32.mrb[45].mxu0  ;;  %v4774_v52 = vpop.f32.mrb[44].mxu1 }
 0x1e8   : > { %v4712_v62 = vadd.f32 %v4711_v61, %v4710_v48  ;;  %v4713_v6 = vpop.f32.mrb[46].mxu0  ;;  %v4775_v7 = vpop.f32.mrb[45].mxu1 }
 0x1e9   : > { %v4714_v8 = vpop.f32.mrb[47].mxu0  ;;  %v4776_v9 = vadd.f32 %v4775_v7, %v4774_v52  ;;  %v4777_v14 = vpop.f32.mrb[46].mxu1 }
 0x1ea   : > { %v1856_v54 = vadd.f32 %v4712_v62, %v6235_v23  ;;  %v4715_v18 = vadd.f32 %v4714_v8, %v4713_v6  ;;  %v4778_v19 = vpop.f32.mrb[47].mxu1 }
 0x1eb   : > { %v4779_v20 = vadd.f32 %v4778_v19, %v4777_v14 }
 0x1ec   : > { %v1859_v55 = vadd.f32 %v4715_v18, %v6237_v35  ;;  %v6283_v21 = vadd.f32 %v4776_v9, %v1856_v54 }
 0x1ee   : > { %v4716_v24 = vpop.f32.mrb[48].mxu0  ;;  %v6285_v25 = vadd.f32 %v4779_v20, %v1859_v55 }
 0x1ef   : > { %v4717_v27 = vpop.f32.mrb[49].mxu0  ;;  %v4780_v28 = vpop.f32.mrb[48].mxu1 }
 0x1f0   : > { %v4718_v26 = vadd.f32 %v4717_v27, %v4716_v24  ;;  %v4719_v30 = vpop.f32.mrb[50].mxu0  ;;  %v4781_v34 = vpop.f32.mrb[49].mxu1 }
 0x1f1   : > { %v4720_v37 = vpop.f32.mrb[51].mxu0  ;;  %v4782_v38 = vadd.f32 %v4781_v34, %v4780_v28  ;;  %v4783_v42 = vpop.f32.mrb[50].mxu1 }
 0x1f2   : > { %v1864_v23 = vadd.f32 %v4718_v26, %v6241_v16  ;;  %v4721_v43 = vadd.f32 %v4720_v37, %v4719_v30  ;;  %v4784_v44 = vpop.f32.mrb[51].mxu1 }
 0x1f3   : > { %v4785_v45 = vadd.f32 %v4784_v44, %v4783_v42 }
 0x1f4   : > { %v1867_v35 = vadd.f32 %v4721_v43, %v6243_v17  ;;  %v1961_v46 = vadd.f32 %v4782_v38, %v1864_v23 }
 0x1f6   : > { %v4722_v10 = vpop.f32.mrb[52].mxu0  ;;  %v6289_v47 = vadd.f32 %v4785_v45, %v1867_v35 }
 0x1f7   : > { %v4723_v50 = vpop.f32.mrb[53].mxu0  ;;  %v4786_v51 = vpop.f32.mrb[52].mxu1 }
 0x1f8   : > { %v4724_v13 = vadd.f32 %v4723_v50, %v4722_v10  ;;  %v4725_v56 = vpop.f32.mrb[54].mxu0  ;;  %v4787_v58 = vpop.f32.mrb[53].mxu1 }
 0x1f9   : > { %v4726_v59 = vpop.f32.mrb[55].mxu0  ;;  %v4788_v60 = vadd.f32 %v4787_v58, %v4786_v51  ;;  %v4789_v2 = vpop.f32.mrb[54].mxu1 }
 0x1fa   : > { %v1872_v3 = vadd.f32 %v4724_v13, %v6247_v40  ;;  %v4727_v16 = vadd.f32 %v4726_v59, %v4725_v56  ;;  %v4790_v4 = vpop.f32.mrb[55].mxu1 }
 0x1fb   : > { %v4791_v11 = vadd.f32 %v4790_v4, %v4789_v2 }
 0x1fc   : > { %v1875_v12 = vadd.f32 %v4727_v16, %v6249_v41  ;;  %v1969_v17 = vadd.f32 %v4788_v60, %v1872_v3 }
 0x1fe   : > { %v4728_v32 = vpop.f32.mrb[56].mxu0  ;;  %v1972_v15 = vadd.f32 %v4791_v11, %v1875_v12 }
 0x1ff   : > { %v4729_v22 = vpop.f32.mrb[57].mxu0  ;;  %v4792_v36 = vpop.f32.mrb[56].mxu1 }
 0x200   : > { %v4730_v33 = vadd.f32 %v4729_v22, %v4728_v32  ;;  %v4731_v48 = vpop.f32.mrb[58].mxu0  ;;  %v4793_v61 = vpop.f32.mrb[57].mxu1 }
 0x201   : > { %v4732_v52 = vpop.f32.mrb[59].mxu0  ;;  %v4794_v62 = vadd.f32 %v4793_v61, %v4792_v36  ;;  %v4795_v6 = vpop.f32.mrb[58].mxu1 }
 0x202   : > { %v1880_v7 = vadd.f32 %v4730_v33, %v6253_v63  ;;  %v4733_v8 = vadd.f32 %v4732_v52, %v4731_v48  ;;  %v4796_v40 = vpop.f32.mrb[59].mxu1 }
 0x203   : > { %v4797_v9 = vadd.f32 %v4796_v40, %v4795_v6 }
 0x204   : > { %v1883_v14 = vadd.f32 %v4733_v8, %v6255_v0  ;;  %v1977_v54 = vadd.f32 %v4794_v62, %v1880_v7 }
 0x206   : > { %v4734_v41 = vpop.f32.mrb[60].mxu0  ;;  %v6295_v18 = vadd.f32 %v4797_v9, %v1883_v14 }
 0x207   : > { %v4735_v19 = vpop.f32.mrb[61].mxu0  ;;  %v4798_v20 = vpop.f32.mrb[60].mxu1 }
 0x208   : > { %v4736_v55 = vadd.f32 %v4735_v19, %v4734_v41  ;;  %v4737_v24 = vpop.f32.mrb[62].mxu0  ;;  %v4799_v27 = vpop.f32.mrb[61].mxu1 }
 0x209   : > { %v4738_v28 = vpop.f32.mrb[63].mxu0  ;;  %v4800_v26 = vadd.f32 %v4799_v27, %v4798_v20  ;;  %v4801_v30 = vpop.f32.mrb[62].mxu1 }
 0x20a   : > { %v1888_v63 = vadd.f32 %v4736_v55, %v6259_v5  ;;  %v4739_v34 = vadd.f32 %v4738_v28, %v4737_v24  ;;  %v4802_v37 = vpop.f32.mrb[63].mxu1 }
 0x20b   : > { %v4803_v38 = vadd.f32 %v4802_v37, %v4801_v30 }
 0x20c   : > { %v1891_v0 = vadd.f32 %v4739_v34, %v6261_v1  ;;  %v1985_v42 = vadd.f32 %v4800_v26, %v1888_v63 }
 0x20e   : > { %v5110_v23 = vpop.f32.mrb[64].mxu0  ;;  %v1988_v43 = vadd.f32 %v4803_v38, %v1891_v0 }
 0x20f   : > { %v2034_v44 = vadd.f32 %v5110_v23, %v6271_v53  ;;  %v5118_v45 = vpop.f32.mrb[64].mxu1  ;;  %v2025_v35 = vpop.f32.mrb[65].mxu0 }
 0x210   : > { %v6300_v10 = vadd.f32 %v5118_v45, %v1969_v17  ;;  %v2026_v50 = vadd.f32 %v2025_v35, %v6265_v29  ;;  %v2057_v51 = vpop.f32.mrb[65].mxu1  ;;  %v5111_v13 = vpop.f32.mrb[66].mxu0 }
 0x211   : > { %2091 = vst [vmem:[%s6304_s22 + $0x10] sm:$0xff] %v2034_v44  ;;  %v2058_v5 = vadd.f32 %v2057_v51, %v1961_v46  ;;  %v2037_v1 = vadd.f32 %v5111_v13, %v6273_v57  ;;  %v5119_v53 = vpop.f32.mrb[66].mxu1  ;;  %v2028_v56 = vpop.f32.mrb[67].mxu0  ;;  %v2132_v3 = vmul.f32 %v2034_v44, %v2034_v44 }
 0x212   : > { %2099 = vst [vmem:[%s6304_s22 + $0x50] sm:$0xff] %v6300_v10  ;;  %2089 = vst [vmem:[%s6304_s22] sm:$0xff] %v2026_v50  ;;  %v6311_v29 = vadd.f32 %v5119_v53, %v1972_v15  ;;  %v2029_v58 = vadd.f32 %v2028_v56, %v6267_v31  ;;  %v2060_v59 = vpop.f32.mrb[67].mxu1  ;;  %v2130_v2 = vmul.f32 %v2026_v50, %v2026_v50 }
 0x213   : > { %2097 = vst [vmem:[%s6304_s22 + $0x40] sm:$0xff] %v2058_v5  ;;  %2092 = vst [vmem:[%s6304_s22 + $0x18] sm:$0xff] %v2037_v1  ;;  %v2061_v60 = vadd.f32 %v2060_v59, %v6289_v47  ;;  %v2133_v12 = vmul.f32 %v2037_v1, %v2037_v1  ;;  %v2138_v26 = vmul.f32 %v2058_v5, %v2058_v5 }
 0x214   : > { %2100 = vst [vmem:[%s6304_s22 + $0x58] sm:$0xff] %v6311_v29  ;;  %2090 = vst [vmem:[%s6304_s22 + $0x8] sm:$0xff] %v2029_v58  ;;  %v2106_v57 = vadd.f32 %v2029_v58, %v2026_v50  ;;  %v2131_v46 = vmul.f32 %v2029_v58, %v2029_v58 }
 0x215   : > { %2098 = vst [vmem:[%s6304_s22 + $0x48] sm:$0xff] %v2061_v60  ;;  %v2139_v34 = vmul.f32 %v2061_v60, %v2061_v60 }
 0x216   : > { %v2107_v16 = vadd.f32 %v2106_v57, %v2034_v44  ;;  %v2146_v4 = vadd.f32 %v2131_v46, %v2130_v2  ;;  %v5114_v11 = vpop.f32.mrb[68].mxu0 }
 0x217   : > { %v2050_v31 = vadd.f32 %v5114_v11, %v6283_v21  ;;  %v5122_v17 = vpop.f32.mrb[68].mxu1  ;;  %v2041_v32 = vpop.f32.mrb[69].mxu0 }
 0x218   : > { %v2147_v47 = vadd.f32 %v2146_v4, %v2132_v3  ;;  %v2082_v15 = vadd.f32 %v5122_v17, %v1985_v42  ;;  %v2042_v22 = vadd.f32 %v2041_v32, %v6277_v39  ;;  %v2108_v36 = vadd.f32 %v2107_v16, %v2037_v1  ;;  %v2073_v33 = vpop.f32.mrb[69].mxu1  ;;  %v5115_v48 = vpop.f32.mrb[70].mxu0  ;;  %v2129_v32 = vld [vmem:[#allocation7] sm:$0x1] }
 0x219   : > { %2095 = vst [vmem:[%s6304_s22 + $0x30] sm:$0xff] %v2050_v31  ;;  %v2074_v61 = vadd.f32 %v2073_v33, %v1977_v54  ;;  %v2053_v52 = vadd.f32 %v5115_v48, %v6285_v25  ;;  %v5123_v62 = vpop.f32.mrb[70].mxu1  ;;  %v2044_v6 = vpop.f32.mrb[71].mxu0  ;;  %v2136_v19 = vmul.f32 %v2050_v31, %v2050_v31  ;;  %v2141_v42 = vmul.f32 %v6311_v29, %v6311_v29 }
 0x21a   : > { %2103 = vst [vmem:[%s6304_s22 + $0x70] sm:$0xff] %v2082_v15  ;;  %2093 = vst [vmem:[%s6304_s22 + $0x20] sm:$0xff] %v2042_v22  ;;  %v2109_v21 = vadd.f32 %v2108_v36, %v2042_v22  ;;  %v2134_v7 = vmul.f32 %v2042_v22, %v2042_v22  ;;  %v2148_v8 = vadd.f32 %v2147_v47, %v2133_v12  ;;  %v2076_v40 = vpop.f32.mrb[71].mxu1  ;;  %v2105_v12 = vld [vmem:[#allocation6] sm:$0x1] }
 0x21b   : > { %2101 = vst [vmem:[%s6304_s22 + $0x60] sm:$0xff] %v2074_v61  ;;  %2096 = vst [vmem:[%s6304_s22 + $0x38] sm:$0xff] %v2053_v52  ;;  %v2085_v39 = vadd.f32 %v5123_v62, %v1988_v43  ;;  %v2045_v9 = vadd.f32 %v2044_v6, %v6279_v49  ;;  %v2077_v54 = vadd.f32 %v2076_v40, %v6295_v18 }
 0x21c   : > { %v2149_v14 = vadd.f32 %v2148_v8, %v2134_v7  ;;  %v2137_v24 = vmul.f32 %v2053_v52, %v2053_v52  ;;  %v2140_v18 = vmul.f32 %v6300_v10, %v6300_v10  ;;  %v2142_v44 = vmul.f32 %v2074_v61, %v2074_v61 }
 0x21d   : > { %2104 = vst [vmem:[%s6304_s22 + $0x78] sm:$0xff] %v2085_v39  ;;  %2094 = vst [vmem:[%s6304_s22 + $0x28] sm:$0xff] %v2045_v9  ;;  %v2110_v25 = vadd.f32 %v2109_v21, %v2045_v9  ;;  %v2135_v41 = vmul.f32 %v2045_v9, %v2045_v9  ;;  %v2143_v51 = vmul.f32 %v2077_v54, %v2077_v54 }
 0x21e   : > { %2102 = vst [vmem:[%s6304_s22 + $0x68] sm:$0xff] %v2077_v54  ;;  %v2145_v56 = vmul.f32 %v2085_v39, %v2085_v39 }
 0x21f   : > { %v2111_v20 = vadd.f32 %v2110_v25, %v2050_v31  ;;  %v2150_v55 = vadd.f32 %v2149_v14, %v2135_v41 }
 0x221   : > { %v2112_v27 = vadd.f32 %v2111_v20, %v2053_v52  ;;  %v2151_v28 = vadd.f32 %v2150_v55, %v2136_v19 }
 0x223   : > { %v2113_v30 = vadd.f32 %v2112_v27, %v2058_v5  ;;  %v2152_v63 = vadd.f32 %v2151_v28, %v2137_v24  ;;  %v2144_v5 = vmul.f32 %v2082_v15, %v2082_v15 }
 0x225   : > { %v2153_v37 = vadd.f32 %v2152_v63, %v2138_v26  ;;  %v2114_v49 = vadd.f32 %v2113_v30, %v2061_v60 }
 0x227   : > { %v2115_v38 = vadd.f32 %v2114_v49, %v6300_v10  ;;  %v2154_v0 = vadd.f32 %v2153_v37, %v2139_v34 }
 0x229   : > { %v2116_v23 = vadd.f32 %v2115_v38, %v6311_v29  ;;  %v2155_v43 = vadd.f32 %v2154_v0, %v2140_v18 }
 0x22b   : > { %v2117_v45 = vadd.f32 %v2116_v23, %v2074_v61  ;;  %v2156_v35 = vadd.f32 %v2155_v43, %v2141_v42 }
 0x22d   : > { %v2118_v50 = vadd.f32 %v2117_v45, %v2077_v54  ;;  %v2157_v13 = vadd.f32 %v2156_v35, %v2142_v44 }
 0x22f   : > { %v2119_v1 = vadd.f32 %v2118_v50, %v2082_v15  ;;  %v2158_v53 = vadd.f32 %v2157_v13, %v2143_v51 }
 0x231   : > { %v2120_v58 = vadd.f32 %v2119_v1, %v2085_v39  ;;  %v2159_v59 = vadd.f32 %v2158_v53, %v2144_v5 }
 0x233   : > { %v2121_v10 = vrot.slane %v2120_v58, 4  ;;  %v2160_v60 = vadd.f32 %v2159_v59, %v2145_v56 }
 0x235   : > { %v2122_v2 = vadd.f32 %v2121_v10, %v2120_v58  ;;  %v2161_v57 = vrot.slane %v2160_v60, 4 }
 0x237   : > { %v2123_v46 = vrot.slane %v2122_v2, 2  ;;  %v2162_v3 = vadd.f32 %v2161_v57, %v2160_v60 }
 0x239   : > { %v2124_v29 = vadd.f32 %v2123_v46, %v2122_v2  ;;  %v2163_v16 = vrot.slane %v2162_v3, 2 }
 0x23b   : > { %v2125_v4 = vrot.slane %v2124_v29, 1  ;;  %v2164_v11 = vadd.f32 %v2163_v16, %v2162_v3 }
 0x23d   : > { %v2126_v31 = vadd.f32 %v2125_v4, %v2124_v29  ;;  %v2165_v17 = vrot.slane %v2164_v11, 1 }
 0x23f   : > { %v2127_v47 = vadd.f32 %v2126_v31, %v2105_v12  ;;  %v2166_v15 = vadd.f32 %v2165_v17, %v2164_v11 }
 0x241   : > { %2128 = vst [vmem:[#allocation6] sm:$0x1] %v2127_v47  ;;  %v2167_v22 = vadd.f32 %v2166_v15, %v2129_v32 }
 0x243   : > { %2168 = vst [vmem:[#allocation7] sm:$0x1] %v2167_v22 }
 0x244 PF: > { %p4312_p13 = scmp.ne.s32.totalorder %s5431_s11, 2 }
 0x245   : > { %v2204_v21 = vlaneseq (!%p4312_p13)  ;;  %v2181_v8 = vld [vmem:[%s7084_s3] sm:$0x1] (!%p4312_p13)  ;;  %s6348_s28 = scalar_lea.vmem (!%p4312_p13), [#allocation5], %s5552_s26  ;;  %s4314_s18 = smul.u32 (!%p4312_p13), 192, %s5423_s30 }
 0x246   : > { %2172 = sbr.rel (%p4312_p13) target bundleno = 633 (0x279), region = 72  ;;  %v2183_v14 = vld [vmem:[%s7085_s4] sm:$0x1] (!%p4312_p13)  ;;  %v2188_v25 = vld [vmem:[%s6348_s28 + $0x8] sm:$0xff] (!%p4312_p13)  ;;  %v2189_v41 = vld [vmem:[%s6348_s28 + $0x10] sm:$0xff] (!%p4312_p13) }
 0x247   : > { %v2205_v7 = vshrl.u32 (!%p4312_p13), %v2204_v21, 7  ;;  %v2187_v54 = vld [vmem:[%s6348_s28] sm:$0xff] (!%p4312_p13)  ;;  %v2190_v19 = vld [vmem:[%s6348_s28 + $0x18] sm:$0xff] (!%p4312_p13)  ;;  %s4044_s21 = smul.u32 (!%p4312_p13), 432, %s5427_s10  ;;  %v2192_v27 = vld [vmem:[%s6348_s28 + $0x28] sm:$0xff] (!%p4312_p13) }
 0x248   : > { %v2173_v36 = vld [vmem:[#allocation6] sm:$0x1] (!%p4312_p13)  ;;  %v2193_v28 = vld [vmem:[%s6348_s28 + $0x30] sm:$0xff] (!%p4312_p13)  ;;  %v2194_v26 = vld [vmem:[%s6348_s28 + $0x38] sm:$0xff] (!%p4312_p13) }
 0x249   : > { %v2174_v48 = vmul.f32 (!%p4312_p13), 0.001953125, %v2173_v36  ;;  %v2206_v40 = vsub.s32 (!%p4312_p13), 0, %v2205_v7  ;;  %v2191_v20 = vld [vmem:[%s6348_s28 + $0x20] sm:$0xff] (!%p4312_p13)  ;;  %v2196_v63 = vld [vmem:[%s6348_s28 + $0x48] sm:$0xff] (!%p4312_p13)  ;;  %v2197_v34 = vld [vmem:[%s6348_s28 + $0x50] sm:$0xff] (!%p4312_p13)  ;;  %s4045_s19 = sadd.s32 (!%p4312_p13), %s4314_s18, %s4044_s21 }
 0x24a   : > { %v2175_v33 = vld [vmem:[#allocation7] sm:$0x1] (!%p4312_p13)  ;;  %v2198_v0 = vld [vmem:[%s6348_s28 + $0x58] sm:$0xff] (!%p4312_p13)  ;;  %v2200_v23 = vld [vmem:[%s6348_s28 + $0x68] sm:$0xff] (!%p4312_p13)  ;;  %s6394_s20 = scalar_lea.vmem (!%p4312_p13), [#allocation3], %s4045_s19 }
 0x24b   : > { %v2176_v61 = vmul.f32 (!%p4312_p13), 0.001953125, %v2175_v33  ;;  %v2177_v52 = vmul.f32 (!%p4312_p13), %v2174_v48, %v2174_v48  ;;  %v2195_v30 = vld [vmem:[%s6348_s28 + $0x40] sm:$0xff] (!%p4312_p13) }
 0x24c   : > { %v2199_v42 = vld [vmem:[%s6348_s28 + $0x60] sm:$0xff] (!%p4312_p13) }
 0x24d   : > { %v2178_v62 = vsub.f32 %v2176_v61, %v2177_v52 }
 0x24f   : > { %v2179_v6 = vadd.f32 1e-05, %v2178_v62 }
 0x251   : > { %5317 = vrsqrt.f32 %v2179_v6 }
 0x25b   : > { %v5318_v39 = vpop.eup %5317 }
 0x25c   : > { %v2182_v9 = vmul.f32 %v5318_v39, %v2181_v8 }
 0x25e   : > { %v2184_v55 = vmul.f32 %v2182_v9, %v2174_v48  ;;  %v6356_v24 = vrot.slane %v2182_v9, %v2206_v40  ;;  %v2201_v9 = vld [vmem:[%s6348_s28 + $0x70] sm:$0xff] }
 0x260   : > { %v2185_v37 = vsub.f32 %v2183_v14, %v2184_v55  ;;  %v2209_v49 = vmul.f32 %v6356_v24, %v2187_v54  ;;  %v2210_v18 = vmul.f32 %v6356_v24, %v2188_v25  ;;  %v2211_v38 = vmul.f32 %v6356_v24, %v2189_v41  ;;  %v2202_v14 = vld [vmem:[%s6348_s28 + $0x78] sm:$0xff] }
 0x261   : > { %v2212_v43 = vmul.f32 %v6356_v24, %v2190_v19  ;;  %v2213_v44 = vmul.f32 %v6356_v24, %v2191_v20  ;;  %v2214_v45 = vmul.f32 %v6356_v24, %v2192_v27  ;;  %v2215_v35 = vmul.f32 %v6356_v24, %v2193_v28 }
 0x262   : > { %v6375_v50 = vrot.slane %v2185_v37, %v2206_v40  ;;  %v2216_v51 = vmul.f32 %v6356_v24, %v2194_v26  ;;  %v2217_v13 = vmul.f32 %v6356_v24, %v2195_v30  ;;  %v2218_v5 = vmul.f32 %v6356_v24, %v2196_v63 }
 0x263   : > { %v2219_v1 = vmul.f32 %v6356_v24, %v2197_v34  ;;  %v2220_v53 = vmul.f32 %v6356_v24, %v2198_v0  ;;  %v2221_v56 = vmul.f32 %v6356_v24, %v2199_v42  ;;  %v6384_v58 = vmul.f32 %v6356_v24, %v2200_v23 }
 0x264   : > { %v2231_v59 = vadd.f32 %v6375_v50, %v2209_v49  ;;  %v2232_v10 = vadd.f32 %v6375_v50, %v2210_v18  ;;  %v2233_v60 = vadd.f32 %v6375_v50, %v2211_v38  ;;  %v2234_v2 = vadd.f32 %v6375_v50, %v2212_v43 }
 0x265   : > { %v2235_v57 = vadd.f32 %v6375_v50, %v2213_v44  ;;  %v2236_v46 = vadd.f32 %v6375_v50, %v2214_v45  ;;  %v2237_v3 = vadd.f32 %v6375_v50, %v2215_v35  ;;  %v2238_v29 = vadd.f32 %v6375_v50, %v2216_v51 }
 0x266   : > { %vm2247_vm0 = vcmp.gt.f32.partialorder %v2231_v59, 0.0  ;;  %v2263_v16 = vmul.f32 0.2, %v2231_v59  ;;  %vm2248_vm1 = vcmp.gt.f32.partialorder %v2232_v10, 0.0  ;;  %v2264_v4 = vmul.f32 0.2, %v2232_v10 }
 0x267   : > { %vm2249_vm2 = vcmp.gt.f32.partialorder %v2233_v60, 0.0  ;;  %v2265_v11 = vmul.f32 0.2, %v2233_v60  ;;  %vm2250_vm3 = vcmp.gt.f32.partialorder %v2234_v2, 0.0  ;;  %v2266_v12 = vmul.f32 0.2, %v2234_v2 }
 0x268   : > { %v2279_v31 = vsel %vm2247_vm0, %v2231_v59, %v2263_v16  ;;  %v2280_v17 = vsel %vm2248_vm1, %v2232_v10, %v2264_v4  ;;  %vm2251_vm4 = vcmp.gt.f32.partialorder %v2235_v57, 0.0  ;;  %v2267_v32 = vmul.f32 0.2, %v2235_v57 }
 0x269   : > { %4315 = vst [vmem:[%s6394_s20 + $0x19] sm:$0xff] %v2279_v31  ;;  %4316 = vst [vmem:[%s6394_s20 + $0x21] sm:$0xff] %v2280_v17  ;;  %v2281_v47 = vsel %vm2249_vm2, %v2233_v60, %v2265_v11  ;;  %v2282_v15 = vsel %vm2250_vm3, %v2234_v2, %v2266_v12  ;;  %vm2252_vm5 = vcmp.gt.f32.partialorder %v2236_v46, 0.0  ;;  %v2268_v22 = vmul.f32 0.2, %v2236_v46 }
 0x26a   : > { %4317 = vst [vmem:[%s6394_s20 + $0x31] sm:$0xff] %v2281_v47  ;;  %4318 = vst [vmem:[%s6394_s20 + $0x39] sm:$0xff] %v2282_v15  ;;  %v2283_v36 = vsel %vm2251_vm4, %v2235_v57, %v2267_v32  ;;  %vm2253_vm6 = vcmp.gt.f32.partialorder %v2237_v3, 0.0  ;;  %v2269_v33 = vmul.f32 0.2, %v2237_v3  ;;  %vm2254_vm7 = vcmp.gt.f32.partialorder %v2238_v29, 0.0 }
 0x26b   : > { %4319 = vst [vmem:[%s6394_s20 + $0x49] sm:$0xff] %v2283_v36  ;;  %v2284_v48 = vsel %vm2252_vm5, %v2236_v46, %v2268_v22  ;;  %v2270_v61 = vmul.f32 0.2, %v2238_v29  ;;  %v2239_v52 = vadd.f32 %v6375_v50, %v2217_v13  ;;  %v2240_v62 = vadd.f32 %v6375_v50, %v2218_v5 }
 0x26c   : > { %4320 = vst [vmem:[%s6394_s20 + $0x51] sm:$0xff] %v2284_v48  ;;  %v2285_v6 = vsel %vm2253_vm6, %v2237_v3, %v2269_v33  ;;  %v2241_v21 = vadd.f32 %v6375_v50, %v2219_v1  ;;  %v2242_v7 = vadd.f32 %v6375_v50, %v2220_v53  ;;  %v2243_v8 = vadd.f32 %v6375_v50, %v2221_v56 }
 0x26d   : > { %4321 = vst [vmem:[%s6394_s20 + $0x61] sm:$0xff] %v2285_v6  ;;  %v2286_v40 = vsel %vm2254_vm7, %v2238_v29, %v2270_v61  ;;  %vm2255_vm8 = vcmp.gt.f32.partialorder %v2239_v52, 0.0  ;;  %v2271_v39 = vmul.f32 0.2, %v2239_v52  ;;  %vm2256_vm9 = vcmp.gt.f32.partialorder %v2240_v62, 0.0 }
 0x26e   : > { %4322 = vst [vmem:[%s6394_s20 + $0x69] sm:$0xff] %v2286_v40  ;;  %v2272_v54 = vmul.f32 0.2, %v2240_v62  ;;  %vm2257_vm10 = vcmp.gt.f32.partialorder %v2241_v21, 0.0  ;;  %v2273_v25 = vmul.f32 0.2, %v2241_v21  ;;  %v2244_v28 = vadd.f32 %v6375_v50, %v6384_v58 }
 0x26f   : > { %vm2258_vm11 = vcmp.gt.f32.partialorder %v2242_v7, 0.0  ;;  %v2287_v41 = vsel %vm2255_vm8, %v2239_v52, %v2271_v39  ;;  %v2274_v19 = vmul.f32 0.2, %v2242_v7  ;;  %vm2259_vm12 = vcmp.gt.f32.partialorder %v2243_v8, 0.0 }
 0x270   : > { %v2275_v20 = vmul.f32 0.2, %v2243_v8  ;;  %4323 = vst [vmem:[%s6394_s20 + $0x79] sm:$0xff] %v2287_v41  ;;  %v2288_v55 = vsel %vm2256_vm9, %v2240_v62, %v2272_v54  ;;  %v2289_v27 = vsel %vm2257_vm10, %v2241_v21, %v2273_v25  ;;  %v2223_v26 = vmul.f32 %v6356_v24, %v2201_v9 }
 0x271   : > { %4324 = vst [vmem:[%s6394_s20 + $0x81] sm:$0xff] %v2288_v55  ;;  %4325 = vst [vmem:[%s6394_s20 + $0x91] sm:$0xff] %v2289_v27  ;;  %v2290_v30 = vsel %vm2258_vm11, %v2242_v7, %v2274_v19  ;;  %v2224_v34 = vmul.f32 %v6356_v24, %v2202_v14  ;;  %vm2260_vm13 = vcmp.gt.f32.partialorder %v2244_v28, 0.0  ;;  %v2276_v37 = vmul.f32 0.2, %v2244_v28 }
 0x272   : > { %v2291_v63 = vsel %vm2259_vm12, %v2243_v8, %v2275_v20  ;;  %4326 = vst [vmem:[%s6394_s20 + $0x99] sm:$0xff] %v2290_v30  ;;  %v2245_v49 = vadd.f32 %v6375_v50, %v2223_v26 }
 0x273   : > { %4327 = vst [vmem:[%s6394_s20 + $0xa9] sm:$0xff] %v2291_v63  ;;  %v2246_v18 = vadd.f32 %v6375_v50, %v2224_v34  ;;  %v2292_v38 = vsel %vm2260_vm13, %v2244_v28, %v2276_v37 }
 0x274   : > { %vm2261_vm14 = vcmp.gt.f32.partialorder %v2245_v49, 0.0  ;;  %v2277_v0 = vmul.f32 0.2, %v2245_v49  ;;  %4328 = vst [vmem:[%s6394_s20 + $0xb1] sm:$0xff] %v2292_v38 }
 0x275   : > { %vm2262_vm15 = vcmp.gt.f32.partialorder %v2246_v18, 0.0  ;;  %v2278_v42 = vmul.f32 0.2, %v2246_v18 }
 0x276   : > { %v2293_v23 = vsel %vm2261_vm14, %v2245_v49, %v2277_v0 }
 0x277   : > { %4329 = vst [vmem:[%s6394_s20 + $0xc1] sm:$0xff] %v2293_v23  ;;  %v2294_v43 = vsel %vm2262_vm15, %v2246_v18, %v2278_v42 }
 0x278   : > { %4330 = vst [vmem:[%s6394_s20 + $0xc9] sm:$0xff] %v2294_v43 }
 0x279 PF: > { %p4331_p0 = scmp.ne.s32.totalorder %s5431_s11, 3 }
 0x27a   : > { %v5319_v24 = vld [vmem:[%s7086_s5 + $0x40] sm:$0xff] (!%p4331_p0)   ;;  %v5323_v50 = vld [vmem:[%s7086_s5 + $0x48] sm:$0xff] (!%p4331_p0)   ;;  %v5327_v1 = vld [vmem:[%s7086_s5 + $0x50] sm:$0xff] (!%p4331_p0)   ;;  %s4332_s18 = smul.u32 (!%p4331_p0), 192, %s5423_s30 }
 0x27b   : > { %2319 = sbr.rel (%p4331_p0) target bundleno = 1061 (0x425), region = 76  ;;  %v5320_v44 = vld [vmem:[%s7086_s5 + $0xc0] sm:$0xff] (!%p4331_p0)   ;;  %4820 = vmatprep.subr.bf16.mxu0 (!%p4331_p0), %v5319_v24  ;;  %v5324_v51 = vld [vmem:[%s7086_s5 + $0xc8] sm:$0xff] (!%p4331_p0)   ;;  %v5328_v53 = vld [vmem:[%s7086_s5 + $0xd0] sm:$0xff] (!%p4331_p0)  }
 0x27c   : > { %v5321_v45 = vld [vmem:[%s7086_s5] sm:$0xff] (!%p4331_p0)   ;;  %4884 = vmatprep.subr.bf16.mxu1 (!%p4331_p0), %v5320_v44  ;;  %v5325_v13 = vld [vmem:[%s7086_s5 + $0x8] sm:$0xff] (!%p4331_p0)   ;;  %v5329_v56 = vld [vmem:[%s7086_s5 + $0x10] sm:$0xff] (!%p4331_p0)   ;;  %s2321_s20 = smul.u32 (!%p4331_p0), 432, %s5427_s10 }
 0x27d   : > { %v5322_v35 = vld [vmem:[%s7086_s5 + $0x80] sm:$0xff] (!%p4331_p0)   ;;  %4821 = vmatpush3.bf16.msra.mxu0 (!%p4331_p0), %v5321_v45  ;;  %v5326_v5 = vld [vmem:[%s7086_s5 + $0x88] sm:$0xff] (!%p4331_p0)   ;;  %v5330_v58 = vld [vmem:[%s7086_s5 + $0x90] sm:$0xff] (!%p4331_p0)  }
 0x27e   : > { %4885 = vmatpush3.bf16.msra.mxu1 (!%p4331_p0), %v5322_v35  ;;  %4822 = vmatprep.subr.bf16.mxu0 (!%p4331_p0), %v5323_v50  ;;  %v5331_v59 = vld [vmem:[%s7086_s5 + $0x58] sm:$0xff] (!%p4331_p0)   ;;  %v5335_v57 = vld [vmem:[%s7086_s5 + $0x60] sm:$0xff] (!%p4331_p0)   ;;  %v5339_v16 = vld [vmem:[%s7086_s5 + $0x68] sm:$0xff] (!%p4331_p0)   ;;  %s2322_s10 = sadd.s32 (!%p4331_p0), %s4332_s18, %s2321_s20 }
 0x27f   : > { %4886 = vmatprep.subr.bf16.mxu1 (!%p4331_p0), %v5324_v51  ;;  %v5332_v10 = vld [vmem:[%s7086_s5 + $0xd8] sm:$0xff] (!%p4331_p0)   ;;  %v5336_v46 = vld [vmem:[%s7086_s5 + $0xe0] sm:$0xff] (!%p4331_p0)   ;;  %v5340_v4 = vld [vmem:[%s7086_s5 + $0xe8] sm:$0xff] (!%p4331_p0)   ;;  %s6524_s25 = scalar_lea.vmem (!%p4331_p0), [#allocation3], %s2322_s10 }
 0x280   : > { %v5333_v60 = vld [vmem:[%s7086_s5 + $0x18] sm:$0xff] (!%p4331_p0)   ;;  %v5337_v3 = vld [vmem:[%s7086_s5 + $0x20] sm:$0xff] (!%p4331_p0)   ;;  %v5341_v11 = vld [vmem:[%s7086_s5 + $0x28] sm:$0xff] (!%p4331_p0)  }
 0x281   : > { %4823 = vmatpush3.bf16.msra.mxu0 (!%p4331_p0), %v5325_v13  ;;  %v5334_v2 = vld [vmem:[%s7086_s5 + $0x98] sm:$0xff] (!%p4331_p0)   ;;  %v5338_v29 = vld [vmem:[%s7086_s5 + $0xa0] sm:$0xff] (!%p4331_p0)   ;;  %v5342_v12 = vld [vmem:[%s7086_s5 + $0xa8] sm:$0xff] (!%p4331_p0)  }
 0x282   : > { %4887 = vmatpush3.bf16.msra.mxu1 %v5326_v5  ;;  %4824 = vmatprep.subr.bf16.mxu0 %v5327_v1  ;;  %v5343_v31 = vld [vmem:[%s7086_s5 + $0x70] sm:$0xff]   ;;  %v5347_v15 = vld [vmem:[%s7086_s5 + $0x78] sm:$0xff]   ;;  %v2356_v48 = vld [vmem:[%s6524_s25 + $0x1] sm:$0xff] }
 0x283   : > { %4888 = vmatprep.subr.bf16.mxu1 %v5328_v53  ;;  %v5344_v17 = vld [vmem:[%s7086_s5 + $0xf0] sm:$0xff]   ;;  %v5348_v22 = vld [vmem:[%s7086_s5 + $0xf8] sm:$0xff]   ;;  %v4336_v6 = vld [vmem:[%s6524_s25 + $0x20] sm:$0xff] }
 0x284   : > { %v5345_v32 = vld [vmem:[%s7086_s5 + $0x30] sm:$0xff]   ;;  %v5349_v36 = vld [vmem:[%s7086_s5 + $0x38] sm:$0xff]   ;;  %v2324_v21 = vld [vmem:[%s6524_s25] sm:$0xff] }
 0x285   : > { %4825 = vmatpush3.bf16.msra.mxu0 %v5329_v56  ;;  %v5346_v47 = vld [vmem:[%s7086_s5 + $0xb0] sm:$0xff]   ;;  %v5350_v33 = vld [vmem:[%s7086_s5 + $0xb8] sm:$0xff]   ;;  %v2325_v7 = vld [vmem:[%s6524_s25 + $0x8] sm:$0xff] }
 0x286   : > { %4889 = vmatpush3.bf16.msra.mxu1 %v5330_v58  ;;  %4826 = vmatprep.subr.bf16.mxu0 %v5331_v59  ;;  %v2357_v61 = vld [vmem:[%s6524_s25 + $0x9] sm:$0xff]  ;;  %v4335_v52 = vld [vmem:[%s6524_s25 + $0x18] sm:$0xff]  ;;  %v2340_v40 = vpack.c.bf16 %v2325_v7, %v2324_v21  ;;  %v5351_v54 = vld [vmem:[%s7086_s5 + $0x140] sm:$0xff]  }
 0x287   : > { %4890 = vmatprep.subr.bf16.mxu1 %v5332_v10  ;;  %v2372_v62 = vpack.c.bf16 %v2357_v61, %v2356_v48  ;;  %v2440_v8 = vpack.c.bf16 %v4336_v6, %v4335_v52  ;;  %v2388_v39 = vld [vmem:[%s6524_s25 + $0x2] sm:$0xff]  ;;  %v2389_v9 = vld [vmem:[%s6524_s25 + $0xa] sm:$0xff]  ;;  %v2358_v41 = vld [vmem:[%s6524_s25 + $0x19] sm:$0xff] }
 0x288   : > { %v2404_v14 = vpack.c.bf16 %v2389_v9, %v2388_v39  ;;  %v5352_v25 = vld [vmem:[%s7086_s5 + $0x100] sm:$0xff]   ;;  %v4337_v20 = vld [vmem:[%s6524_s25 + $0x30] sm:$0xff]  ;;  %v4338_v55 = vld [vmem:[%s6524_s25 + $0x38] sm:$0xff] }
 0x289   : > { %4827 = vmatpush3.bf16.msra.mxu0 %v5333_v60  ;;  %3307 = vmatprep.mubr.bf16.mxu0 %v2372_v62  ;;  %v2359_v19 = vld [vmem:[%s6524_s25 + $0x21] sm:$0xff]  ;;  %v6546_v28 = vpack.c.bf16 %v4338_v55, %v4337_v20  ;;  %v2360_v49 = vld [vmem:[%s6524_s25 + $0x31] sm:$0xff]  ;;  %v2361_v18 = vld [vmem:[%s6524_s25 + $0x39] sm:$0xff] }
 0x28a   : > { %4891 = vmatpush3.bf16.msra.mxu1 %v5334_v2  ;;  %4828 = vmatprep.subr.bf16.mxu0 %v5335_v57  ;;  %v6544_v27 = vpack.c.bf16 %v2359_v19, %v2358_v41  ;;  %v2390_v26 = vld [vmem:[%s6524_s25 + $0x1a] sm:$0xff]  ;;  %v2391_v30 = vld [vmem:[%s6524_s25 + $0x22] sm:$0xff]  ;;  %v4340_v0 = vld [vmem:[%s6524_s25 + $0x50] sm:$0xff]  ;;  %v6564_v42 = vpack.c.bf16 %v2361_v18, %v2360_v49 }
 0x28b   : > { %4892 = vmatprep.subr.bf16.mxu1 %v5336_v46  ;;  %3404 = vmatprep.mubr.bf16.mxu1 %v2440_v8  ;;  %v6550_v63 = vpack.c.bf16 %v2391_v30, %v2390_v26  ;;  %v5353_v34 = vld [vmem:[%s7086_s5 + $0x148] sm:$0xff]   ;;  %v2392_v43 = vld [vmem:[%s6524_s25 + $0x32] sm:$0xff]  ;;  %v2393_v24 = vld [vmem:[%s6524_s25 + $0x3a] sm:$0xff] }
 0x28c   : > { %v5354_v37 = vld [vmem:[%s7086_s5 + $0x108] sm:$0xff]   ;;  %v6570_v44 = vpack.c.bf16 %v2393_v24, %v2392_v43  ;;  %v5355_v45 = vld [vmem:[%s7086_s5 + $0x150] sm:$0xff]   ;;  %v5356_v35 = vld [vmem:[%s7086_s5 + $0x1c0] sm:$0xff]  }
 0x28d   : > { %4829 = vmatpush3.bf16.msra.mxu0 %v5337_v3  ;;  %v4339_v38 = vld [vmem:[%s6524_s25 + $0x48] sm:$0xff]  ;;  %v5357_v50 = vld [vmem:[%s7086_s5 + $0x110] sm:$0xff]   ;;  %v5358_v51 = vld [vmem:[%s7086_s5 + $0x180] sm:$0xff]  }
 0x28e   : > { %4893 = vmatpush3.bf16.msra.mxu1 %v5338_v29  ;;  %4830 = vmatprep.subr.bf16.mxu0 %v5339_v16  ;;  %v6566_v23 = vpack.c.bf16 %v4340_v0, %v4339_v38  ;;  %v2362_v13 = vld [vmem:[%s6524_s25 + $0x49] sm:$0xff]  ;;  %v2363_v5 = vld [vmem:[%s6524_s25 + $0x51] sm:$0xff]  ;;  %v4341_v1 = vld [vmem:[%s6524_s25 + $0x60] sm:$0xff] }
 0x28f   : > { %4894 = vmatprep.subr.bf16.mxu1 %v5340_v4  ;;  %v4342_v53 = vld [vmem:[%s6524_s25 + $0x68] sm:$0xff]  ;;  %v6591_v56 = vpack.c.bf16 %v2363_v5, %v2362_v13  ;;  %v2395_v10 = vld [vmem:[%s6524_s25 + $0x52] sm:$0xff]  ;;  %v2398_v7 = vld [vmem:[%s6524_s25 + $0x7a] sm:$0xff] }
 0x290   : > { %v6593_v58 = vpack.c.bf16 %v4342_v53, %v4341_v1  ;;  %v2394_v59 = vld [vmem:[%s6524_s25 + $0x4a] sm:$0xff]  ;;  %v5359_v2 = vld [vmem:[%s7086_s5 + $0x158] sm:$0xff]   ;;  %v2364_v29 = vld [vmem:[%s6524_s25 + $0x61] sm:$0xff] }
 0x291   : > { %4831 = vmatpush3.bf16.msra.mxu0 %v5341_v11  ;;  %v6597_v60 = vpack.c.bf16 %v2395_v10, %v2394_v59  ;;  %v5360_v57 = vld [vmem:[%s7086_s5 + $0x1c8] sm:$0xff]   ;;  %v5361_v46 = vld [vmem:[%s7086_s5 + $0x118] sm:$0xff]   ;;  %v4344_v11 = vld [vmem:[%s6524_s25 + $0x80] sm:$0xff] }
 0x292   : > { %4895 = vmatpush3.bf16.msra.mxu1 %v5342_v12  ;;  %4832 = vmatprep.subr.bf16.mxu0 %v5343_v31  ;;  %v5362_v3 = vld [vmem:[%s7086_s5 + $0x188] sm:$0xff]   ;;  %v4343_v4 = vld [vmem:[%s6524_s25 + $0x78] sm:$0xff]  ;;  %v4345_v52 = vld [vmem:[%s6524_s25 + $0x90] sm:$0xff] }
 0x293   : > { %4896 = vmatprep.subr.bf16.mxu1 %v5344_v17  ;;  %v2365_v16 = vld [vmem:[%s6524_s25 + $0x69] sm:$0xff]  ;;  %v6621_v31 = vpack.c.bf16 %v4344_v11, %v4343_v4  ;;  %v2366_v48 = vld [vmem:[%s6524_s25 + $0x79] sm:$0xff]  ;;  %v2367_v61 = vld [vmem:[%s6524_s25 + $0x81] sm:$0xff] }
 0x294   : > { %v6619_v12 = vpack.c.bf16 %v2365_v16, %v2364_v29  ;;  %v2396_v17 = vld [vmem:[%s6524_s25 + $0x62] sm:$0xff]  ;;  %v4346_v62 = vld [vmem:[%s6524_s25 + $0x98] sm:$0xff]  ;;  %v6644_v6 = vpack.c.bf16 %v2367_v61, %v2366_v48  ;;  %v4348_v20 = vld [vmem:[%s6524_s25 + $0xb0] sm:$0xff] }
 0x295   : > { %4833 = vmatpush3.bf16.msra.mxu0 %v5345_v32  ;;  %v2397_v32 = vld [vmem:[%s6524_s25 + $0x6a] sm:$0xff]  ;;  %v6646_v21 = vpack.c.bf16 %v4346_v62, %v4345_v52  ;;  %v5368_v9 = vld [vmem:[%s7086_s5 + $0x1d8] sm:$0xff]   ;;  %v5372_v18 = vld [vmem:[%s7086_s5 + $0x1e0] sm:$0xff]  }
 0x296   : > { %4897 = vmatpush3.bf16.msra.mxu1 %v5346_v47  ;;  %4834 = vmatprep.subr.bf16.mxu0 %v5347_v15  ;;  %v6625_v47 = vpack.c.bf16 %v2397_v32, %v2396_v17  ;;  %v5363_v15 = vld [vmem:[%s7086_s5 + $0x160] sm:$0xff]   ;;  %v5367_v39 = vld [vmem:[%s7086_s5 + $0x168] sm:$0xff]   ;;  %v2400_v30 = vld [vmem:[%s6524_s25 + $0x92] sm:$0xff] }
 0x297   : > { %4898 = vmatprep.subr.bf16.mxu1 %v5348_v22  ;;  %v5364_v22 = vld [vmem:[%s7086_s5 + $0x1d0] sm:$0xff]   ;;  %v2369_v41 = vld [vmem:[%s6524_s25 + $0x99] sm:$0xff]  ;;  %v4347_v19 = vld [vmem:[%s6524_s25 + $0xa8] sm:$0xff] }
 0x298   : > { %v6673_v26 = vpack.c.bf16 %v4348_v20, %v4347_v19  ;;  %v5371_v49 = vld [vmem:[%s7086_s5 + $0x170] sm:$0xff]   ;;  %v5374_v0 = vld [vmem:[%s7086_s5 + $0x1a0] sm:$0xff]   ;;  %v5375_v43 = vld [vmem:[%s7086_s5 + $0x1e8] sm:$0xff]  }
 0x299   : > { %4835 = vmatpush3.bf16.msra.mxu0 %v5349_v36  ;;  %v5365_v36 = vld [vmem:[%s7086_s5 + $0x120] sm:$0xff]   ;;  %v5373_v38 = vld [vmem:[%s7086_s5 + $0x130] sm:$0xff]   ;;  %v5376_v24 = vld [vmem:[%s7086_s5 + $0x1a8] sm:$0xff]  }
 0x29a   : > { %4899 = vmatpush3.bf16.msra.mxu1 %v5350_v33  ;;  %4948 = vmatprep.subr.bf16.mxu0 %v5351_v54  ;;  %v5366_v33 = vld [vmem:[%s7086_s5 + $0x190] sm:$0xff]   ;;  %v5370_v54 = vld [vmem:[%s7086_s5 + $0x198] sm:$0xff]   ;;  %v5383_v16 = vld [vmem:[%s7086_s5 + $0x200] sm:$0xff]  }
 0x29b   : > { %5012 = vmatprep.subr.bf16.mxu1 %v5356_v35  ;;  %v2371_v35 = vld [vmem:[%s6524_s25 + $0xb1] sm:$0xff]  ;;  %v4413_v4 = vld [vmem:[%s6524_s25 + $0xc1] sm:$0xff]  ;;  %v4414_v11 = vld [vmem:[%s6524_s25 + $0xc9] sm:$0xff] }
 0x29c   : > { %3308 = vmatmul.mubr.bf16.vlgmr.msra.gmra.mrb[0].mxu0 %v2340_v40  ;;  %v2402_v1 = vld [vmem:[%s6524_s25 + $0xaa] sm:$0xff]  ;;  %v2403_v53 = vld [vmem:[%s6524_s25 + $0xb2] sm:$0xff]  ;;  %v6744_v17 = vpack.c.bf16 %v4414_v11, %v4413_v4  ;;  %v4381_v32 = vld [vmem:[%s6524_s25 + $0xc2] sm:$0xff] }
 0x29d   : > { %3405 = vmatmul.mubr.bf16.vlgmr.msra.gmra.mrb[0].mxu1 %v2404_v14  ;;  %4949 = vmatpush3.bf16.msra.mxu0 %v5352_v25  ;;  %v5369_v14 = vld [vmem:[%s7086_s5 + $0x128] sm:$0xff]   ;;  %v2368_v25 = vld [vmem:[%s6524_s25 + $0x91] sm:$0xff]  ;;  %v6711_v59 = vpack.c.bf16 %v2403_v53, %v2402_v1  ;;  %v6762_v52 = vld [vmem:[%s6524_s25 + $0xe0] sm:$0xff] }
 0x29e   : > { %3315 = vmatprep.mubr.bf16.mxu0 %v6544_v27  ;;  %3412 = vmatprep.mubr.bf16.mxu1 %v6546_v28  ;;  %v6671_v55 = vpack.c.bf16 %v2369_v41, %v2368_v25  ;;  %v5377_v10 = vld [vmem:[%s7086_s5 + $0x178] sm:$0xff]  }
 0x29f   : > { %4950 = vmatprep.subr.bf16.mxu0 %v5353_v34  ;;  %5013 = vmatpush3.bf16.msra.mxu1 %v5358_v51  ;;  %v2401_v34 = vld [vmem:[%s6524_s25 + $0x9a] sm:$0xff]  ;;  %v4350_v51 = vld [vmem:[%s6524_s25 + $0xc8] sm:$0xff] }
 0x2a0   : > { %5014 = vmatprep.subr.bf16.mxu1 %v5360_v57  ;;  %v5379_v57 = vld [vmem:[%s7086_s5 + $0x138] sm:$0xff]  }
 0x2a1   : > { %4951 = vmatpush3.bf16.msra.mxu0 %v5354_v37  ;;  %v6677_v37 = vpack.c.bf16 %v2401_v34, %v2400_v30  ;;  %v5382_v29 = vld [vmem:[%s7086_s5 + $0x1b8] sm:$0xff]  }
 0x2a2   : > { %4952 = vmatprep.subr.bf16.mxu0 %v5355_v45  ;;  %v2370_v45 = vld [vmem:[%s6524_s25 + $0xa9] sm:$0xff]  ;;  %v6757_v48 = vld [vmem:[%s6524_s25 + $0xd8] sm:$0xff] }
 0x2a3   : > { %5015 = vmatpush3.bf16.msra.mxu1 %v5362_v3  ;;  %v6705_v13 = vpack.c.bf16 %v2371_v35, %v2370_v45  ;;  %v5381_v3 = vld [vmem:[%s7086_s5 + $0x1f8] sm:$0xff]   ;;  %v2547_v62 = vpack.c.bf16 %v6762_v52, %v6757_v48 }
 0x2a4   : > { %3316 = vmatmul.mubr.bf16.gmra.mrb[4].mxu0 %v2440_v8  ;;  %5016 = vmatprep.subr.bf16.mxu1 %v5364_v22  ;;  %v2399_v8 = vld [vmem:[%s6524_s25 + $0x82] sm:$0xff] }
 0x2a5   : > { %3413 = vmatmul.mubr.bf16.gmra.mrb[4].mxu1 %v6550_v63  ;;  %3323 = vmatprep.mubr.bf16.mxu0 %v6564_v42  ;;  %v6652_v40 = vpack.c.bf16 %v2399_v8, %v2398_v7  ;;  %v6767_v7 = vld [vmem:[%s6524_s25 + $0xda] sm:$0xff]  ;;  %v6770_v8 = vld [vmem:[%s6524_s25 + $0xe2] sm:$0xff] }
 0x2a6   : > { %3420 = vmatprep.mubr.bf16.mxu1 %v6566_v23  ;;  %4953 = vmatpush3.bf16.msra.mxu0 %v5357_v50  ;;  %v4349_v50 = vld [vmem:[%s6524_s25 + $0xc0] sm:$0xff] }
 0x2a7   : > { %4954 = vmatprep.subr.bf16.mxu0 %v5359_v2  ;;  %5017 = vmatpush3.bf16.msra.mxu1 %v5366_v33  ;;  %v6707_v5 = vpack.c.bf16 %v4350_v51, %v4349_v50  ;;  %v5378_v2 = vld [vmem:[%s7086_s5 + $0x1f0] sm:$0xff]   ;;  %v6754_v33 = vld [vmem:[%s6524_s25 + $0xe1] sm:$0xff] }
 0x2a8   : > { %5018 = vmatprep.subr.bf16.mxu1 %v5368_v9  ;;  %v5384_v9 = vld [vmem:[%s7086_s5 + $0x208] sm:$0xff]  }
 0x2aa   : > { %4955 = vmatpush3.bf16.msra.mxu0 %v5361_v46  ;;  %v5380_v46 = vld [vmem:[%s7086_s5 + $0x1b0] sm:$0xff]  }
 0x2ab   : > { %4956 = vmatprep.subr.bf16.mxu0 %v5363_v15  ;;  %5019 = vmatpush3.bf16.msra.mxu1 %v5370_v54  ;;  %v4382_v15 = vld [vmem:[%s6524_s25 + $0xca] sm:$0xff] }
 0x2ac   : > { %3324 = vmatmul.mubr.bf16.gmra.mrb[8].mxu0 %v6546_v28  ;;  %5020 = vmatprep.subr.bf16.mxu1 %v5372_v18  ;;  %v6748_v22 = vpack.c.bf16 %v4382_v15, %v4381_v32 }
 0x2ad   : > { %3421 = vmatmul.mubr.bf16.gmra.mrb[8].mxu1 %v6570_v44  ;;  %3331 = vmatprep.mubr.bf16.mxu0 %v6591_v56 }
 0x2ae   : > { %3428 = vmatprep.mubr.bf16.mxu1 %v6593_v58  ;;  %4957 = vmatpush3.bf16.msra.mxu0 %v5365_v36  ;;  %v6751_v36 = vld [vmem:[%s6524_s25 + $0xd9] sm:$0xff]  ;;  %s6937_s25 = scalar_lea.vmem [#allocation5], %s5552_s26 }
 0x2af   : > { %4958 = vmatprep.subr.bf16.mxu0 %v5367_v39  ;;  %5021 = vmatpush3.bf16.msra.mxu1 %v5374_v0  ;;  %v2579_v61 = vpack.c.bf16 %v6754_v33, %v6751_v36  ;;  %v2611_v39 = vpack.c.bf16 %v6770_v8, %v6767_v7 }
 0x2b0   : > { %5022 = vmatprep.subr.bf16.mxu1 %v5375_v43 }
 0x2b2   : > { %4959 = vmatpush3.bf16.msra.mxu0 %v5369_v14  ;;  %v5385_v14 = vld [vmem:[%s7086_s5 + $0x210] sm:$0xff]  }
 0x2b3   : > { %4960 = vmatprep.subr.bf16.mxu0 %v5371_v49  ;;  %5023 = vmatpush3.bf16.msra.mxu1 %v5376_v24 }
 0x2b4   : > { %3332 = vmatmul.mubr.bf16.gmra.mrb[12].mxu0 %v6566_v23  ;;  %5024 = vmatprep.subr.bf16.mxu1 %v5378_v2 }
 0x2b5   : > { %3429 = vmatmul.mubr.bf16.gmra.mrb[12].mxu1 %v6597_v60  ;;  %3339 = vmatprep.mubr.bf16.mxu0 %v6619_v12 }
 0x2b6   : > { %3436 = vmatprep.mubr.bf16.mxu1 %v6621_v31  ;;  %4961 = vmatpush3.bf16.msra.mxu0 %v5373_v38 }
 0x2b7   : > { %4962 = vmatprep.subr.bf16.mxu0 %v5377_v10  ;;  %5025 = vmatpush3.bf16.msra.mxu1 %v5380_v46 }
 0x2b8   : > { %5026 = vmatprep.subr.bf16.mxu1 %v5381_v3 }
 0x2ba   : > { %4963 = vmatpush3.bf16.msra.mxu0 %v5379_v57 }
 0x2bb   : > { %5124 = vmatprep.subr.bf16.mxu0 %v5383_v16  ;;  %5027 = vmatpush3.bf16.msra.mxu1 %v5382_v29 }
 0x2bc   : > { %3340 = vmatmul.mubr.bf16.gmra.mrb[16].mxu0 %v6593_v58  ;;  %5172 = vmatprep.subr.bf16.mxu1 %v5383_v16 }
 0x2bd   : > { %3437 = vmatmul.mubr.bf16.gmra.mrb[16].mxu1 %v6625_v47  ;;  %3347 = vmatprep.mubr.bf16.mxu0 %v6644_v6 }
 0x2be   : > { %3444 = vmatprep.mubr.bf16.mxu1 %v6646_v21 }
 0x2c4   : > { %3348 = vmatmul.mubr.bf16.gmra.mrb[20].mxu0 %v6621_v31 }
 0x2c5   : > { %3445 = vmatmul.mubr.bf16.gmra.mrb[20].mxu1 %v6652_v40  ;;  %3355 = vmatprep.mubr.bf16.mxu0 %v6671_v55 }
 0x2c6   : > { %3452 = vmatprep.mubr.bf16.mxu1 %v6673_v26 }
 0x2cc   : > { %3356 = vmatmul.mubr.bf16.gmra.mrb[24].mxu0 %v6646_v21 }
 0x2cd   : > { %3453 = vmatmul.mubr.bf16.gmra.mrb[24].mxu1 %v6677_v37  ;;  %3363 = vmatprep.mubr.bf16.mxu0 %v6705_v13 }
 0x2ce   : > { %3460 = vmatprep.mubr.bf16.mxu1 %v6707_v5 }
 0x2d4   : > { %3364 = vmatmul.mubr.bf16.gmra.mrb[28].mxu0 %v6673_v26 }
 0x2d5   : > { %3461 = vmatmul.mubr.bf16.gmra.mrb[28].mxu1 %v6711_v59  ;;  %3501 = vmatprep.mubr.bf16.mxu0 %v6550_v63  ;;  %v5388_v63 = vld [vmem:[%s7086_s5 + $0x228] sm:$0xff]  }
 0x2d6   : > { %3598 = vmatprep.mubr.bf16.mxu1 %v6564_v42 }
 0x2dc   : > { %3502 = vmatmul.mubr.bf16.vlgmr.msra.gmra.mrb[32].mxu0 %v6544_v27  ;;  %v5386_v27 = vld [vmem:[%s7086_s5 + $0x218] sm:$0xff]  }
 0x2dd   : > { %3599 = vmatmul.mubr.bf16.vlgmr.msra.gmra.mrb[32].mxu1 %v6546_v28  ;;  %5125 = vmatpush3.bf16.msra.mxu0 %v5383_v16  ;;  %v5387_v28 = vld [vmem:[%s7086_s5 + $0x220] sm:$0xff]  }
 0x2de   : > { %3509 = vmatprep.mubr.bf16.mxu0 %v6570_v44  ;;  %3606 = vmatprep.mubr.bf16.mxu1 %v6591_v56 }
 0x2df   : > { %5126 = vmatprep.subr.bf16.mxu0 %v5384_v9  ;;  %5180 = vmatpush3.bf16.msra.mxu1 %v5383_v16 }
 0x2e0   : > { %5173 = vmatprep.subr.bf16.mxu1 %v5384_v9 }
 0x2e1   : > { %5127 = vmatpush3.bf16.msra.mxu0 %v5384_v9 }
 0x2e2   : > { %5128 = vmatprep.subr.bf16.mxu0 %v5385_v14 }
 0x2e3   : > { %5181 = vmatpush3.bf16.msra.mxu1 %v5384_v9 }
 0x2e4   : > { %3510 = vmatmul.mubr.bf16.gmra.mrb[36].mxu0 %v6564_v42  ;;  %5174 = vmatprep.subr.bf16.mxu1 %v5385_v14  ;;  %v5389_v42 = vld [vmem:[%s7086_s5 + $0x230] sm:$0xff]  }
 0x2e5   : > { %3607 = vmatmul.mubr.bf16.gmra.mrb[36].mxu1 %v6566_v23  ;;  %3517 = vmatprep.mubr.bf16.mxu0 %v6597_v60  ;;  %v5390_v23 = vld [vmem:[%s7086_s5 + $0x238] sm:$0xff]  }
 0x2e6   : > { %3614 = vmatprep.mubr.bf16.mxu1 %v6619_v12  ;;  %5129 = vmatpush3.bf16.msra.mxu0 %v5385_v14 }
 0x2e7   : > { %5130 = vmatprep.subr.bf16.mxu0 %v5386_v27  ;;  %5182 = vmatpush3.bf16.msra.mxu1 %v5385_v14 }
 0x2e8   : > { %5175 = vmatprep.subr.bf16.mxu1 %v5386_v27 }
 0x2ea   : > { %5131 = vmatpush3.bf16.msra.mxu0 %v5386_v27 }
 0x2eb   : > { %5132 = vmatprep.subr.bf16.mxu0 %v5387_v28  ;;  %5183 = vmatpush3.bf16.msra.mxu1 %v5386_v27 }
 0x2ec   : > { %3518 = vmatmul.mubr.bf16.gmra.mrb[40].mxu0 %v6591_v56  ;;  %5176 = vmatprep.subr.bf16.mxu1 %v5387_v28 }
 0x2ed   : > { %3615 = vmatmul.mubr.bf16.gmra.mrb[40].mxu1 %v6593_v58  ;;  %3525 = vmatprep.mubr.bf16.mxu0 %v6625_v47 }
 0x2ee   : > { %3622 = vmatprep.mubr.bf16.mxu1 %v6644_v6  ;;  %5133 = vmatpush3.bf16.msra.mxu0 %v5387_v28 }
 0x2ef   : > { %5134 = vmatprep.subr.bf16.mxu0 %v5388_v63  ;;  %5184 = vmatpush3.bf16.msra.mxu1 %v5387_v28 }
 0x2f0   : > { %5177 = vmatprep.subr.bf16.mxu1 %v5388_v63 }
 0x2f2   : > { %5135 = vmatpush3.bf16.msra.mxu0 %v5388_v63 }
 0x2f3   : > { %5136 = vmatprep.subr.bf16.mxu0 %v5389_v42  ;;  %5185 = vmatpush3.bf16.msra.mxu1 %v5388_v63 }
 0x2f4   : > { %3526 = vmatmul.mubr.bf16.gmra.mrb[44].mxu0 %v6619_v12  ;;  %5178 = vmatprep.subr.bf16.mxu1 %v5389_v42 }
 0x2f5   : > { %3623 = vmatmul.mubr.bf16.gmra.mrb[44].mxu1 %v6621_v31  ;;  %3533 = vmatprep.mubr.bf16.mxu0 %v6652_v40 }
 0x2f6   : > { %3630 = vmatprep.mubr.bf16.mxu1 %v6671_v55  ;;  %5137 = vmatpush3.bf16.msra.mxu0 %v5389_v42 }
 0x2f7   : > { %5138 = vmatprep.subr.bf16.mxu0 %v5390_v23  ;;  %5186 = vmatpush3.bf16.msra.mxu1 %v5389_v42 }
 0x2f8   : > { %5179 = vmatprep.subr.bf16.mxu1 %v5390_v23 }
 0x2fa   : > { %5139 = vmatpush3.bf16.msra.mxu0 %v5390_v23 }
 0x2fb   : > { %5187 = vmatpush3.bf16.msra.mxu1 %v5390_v23 }
 0x2fc   : > { %3534 = vmatmul.mubr.bf16.gmra.mrb[48].mxu0 %v6644_v6 }
 0x2fd   : > { %3631 = vmatmul.mubr.bf16.gmra.mrb[48].mxu1 %v6646_v21  ;;  %3541 = vmatprep.mubr.bf16.mxu0 %v6677_v37 }
 0x2fe   : > { %3638 = vmatprep.mubr.bf16.mxu1 %v6705_v13 }
 0x304   : > { %3542 = vmatmul.mubr.bf16.gmra.mrb[52].mxu0 %v6671_v55 }
 0x305   : > { %3639 = vmatmul.mubr.bf16.gmra.mrb[52].mxu1 %v6673_v26  ;;  %3549 = vmatprep.mubr.bf16.mxu0 %v6711_v59 }
 0x306   : > { %3646 = vmatprep.mubr.bf16.mxu1 %v6744_v17 }
 0x30c   : > { %3550 = vmatmul.mubr.bf16.gmra.mrb[56].mxu0 %v6705_v13 }
 0x30d   : > { %3647 = vmatmul.mubr.bf16.gmra.mrb[56].mxu1 %v6707_v5  ;;  %3557 = vmatprep.mubr.bf16.mxu0 %v6748_v22 }
 0x30e   : > { %3654 = vmatprep.mubr.bf16.mxu1 %v2579_v61 }
 0x314   : > { %3558 = vmatmul.mubr.bf16.gmra.mrb[60].mxu0 %v6744_v17 }
 0x315   : > { %3655 = vmatmul.mubr.bf16.gmra.mrb[60].mxu1 %v2547_v62  ;;  %5140 = vmatprep.mubr.bf16.mxu0 %v6570_v44  ;;  %v6846_v44 = vld [vmem:[%s7087_s6] ss:$0 sm:$0xff] }
 0x316   : > { %5148 = vmatprep.mubr.bf16.mxu1 %v6677_v37 }
 0x31c   : > { %5141 = vmatmul.mubr.bf16.vlgmr.msra.gmra.mrb[64].mxu0 %v6597_v60 }
 0x31d   : > { %5149 = vmatmul.mubr.bf16.vlgmr.msra.gmra.mrb[64].mxu1 %v6711_v59  ;;  %5144 = vmatprep.mubr.bf16.mxu0 %v6625_v47 }
 0x31e   : > { %5152 = vmatprep.mubr.bf16.mxu1 %v6748_v22 }
 0x324   : > { %5145 = vmatmul.mubr.bf16.gmra.mrb[68].mxu0 %v6652_v40 }
 0x325   : > { %5153 = vmatmul.mubr.bf16.gmra.mrb[68].mxu1 %v2611_v39 }
 0x36f   : > { %v4836_v56 = vpop.f32.mrb[0].mxu0 }
 0x370   : > { %v4837_v58 = vpop.f32.mrb[1].mxu0  ;;  %v4900_v60 = vpop.f32.mrb[0].mxu1 }
 0x371   : > { %v4838_v12 = vadd.f32 %v4837_v58, %v4836_v56  ;;  %v4839_v31 = vpop.f32.mrb[2].mxu0  ;;  %v4901_v6 = vpop.f32.mrb[1].mxu1 }
 0x372   : > { %v4840_v47 = vpop.f32.mrb[3].mxu0  ;;  %v4902_v21 = vadd.f32 %v4901_v6, %v4900_v60  ;;  %v4903_v54 = vpop.f32.mrb[2].mxu1 }
 0x373   : > { %v3310_v40 = vadd.f32 %v4838_v12, %v6846_v44  ;;  %v4841_v25 = vadd.f32 %v4840_v47, %v4839_v31  ;;  %v4904_v41 = vpop.f32.mrb[3].mxu1 }
 0x374   : > { %v4905_v19 = vadd.f32 %v4904_v41, %v4903_v54 }
 0x375   : > { %v3313_v20 = vadd.f32 %v4841_v25, %v6846_v44  ;;  %v6850_v55 = vadd.f32 %v4902_v21, %v3310_v40 }
 0x377   : > { %v6852_v26 = vadd.f32 %v4905_v19, %v3313_v20  ;;  %v4842_v30 = vpop.f32.mrb[4].mxu0 }
 0x378   : > { %v4843_v34 = vpop.f32.mrb[5].mxu0  ;;  %v4906_v37 = vpop.f32.mrb[4].mxu1 }
 0x379   : > { %v4844_v49 = vadd.f32 %v4843_v34, %v4842_v30  ;;  %v4845_v18 = vpop.f32.mrb[6].mxu0  ;;  %v4907_v38 = vpop.f32.mrb[5].mxu1 }
 0x37a   : > { %v4846_v0 = vpop.f32.mrb[7].mxu0  ;;  %v4908_v43 = vadd.f32 %v4907_v38, %v4906_v37  ;;  %v4909_v24 = vpop.f32.mrb[6].mxu1 }
 0x37b   : > { %v3318_v45 = vadd.f32 %v4844_v49, %v6846_v44  ;;  %v4847_v35 = vadd.f32 %v4846_v0, %v4845_v18  ;;  %v4910_v50 = vpop.f32.mrb[7].mxu1 }
 0x37c   : > { %v4911_v51 = vadd.f32 %v4910_v50, %v4909_v24 }
 0x37d   : > { %v3321_v13 = vadd.f32 %v4847_v35, %v6846_v44  ;;  %v6856_v5 = vadd.f32 %v4908_v43, %v3318_v45 }
 0x37f   : > { %v6858_v1 = vadd.f32 %v4911_v51, %v3321_v13  ;;  %v4848_v53 = vpop.f32.mrb[8].mxu0 }
 0x380   : > { %v4849_v59 = vpop.f32.mrb[9].mxu0  ;;  %v4912_v10 = vpop.f32.mrb[8].mxu1 }
 0x381   : > { %v4850_v2 = vadd.f32 %v4849_v59, %v4848_v53  ;;  %v4851_v57 = vpop.f32.mrb[10].mxu0  ;;  %v4913_v46 = vpop.f32.mrb[9].mxu1 }
 0x382   : > { %v4852_v3 = vpop.f32.mrb[11].mxu0  ;;  %v4914_v29 = vadd.f32 %v4913_v46, %v4912_v10  ;;  %v4915_v16 = vpop.f32.mrb[10].mxu1 }
 0x383   : > { %v3326_v4 = vadd.f32 %v4850_v2, %v6846_v44  ;;  %v4853_v11 = vadd.f32 %v4852_v3, %v4851_v57  ;;  %v4916_v17 = vpop.f32.mrb[11].mxu1 }
 0x384   : > { %v4917_v32 = vadd.f32 %v4916_v17, %v4915_v16 }
 0x385   : > { %v3329_v15 = vadd.f32 %v4853_v11, %v6846_v44  ;;  %v6862_v22 = vadd.f32 %v4914_v29, %v3326_v4 }
 0x387   : > { %v6864_v36 = vadd.f32 %v4917_v32, %v3329_v15  ;;  %v4854_v33 = vpop.f32.mrb[12].mxu0 }
 0x388   : > { %v4855_v48 = vpop.f32.mrb[13].mxu0  ;;  %v4918_v61 = vpop.f32.mrb[12].mxu1 }
 0x389   : > { %v4856_v52 = vadd.f32 %v4855_v48, %v4854_v33  ;;  %v4857_v62 = vpop.f32.mrb[14].mxu0  ;;  %v4919_v7 = vpop.f32.mrb[13].mxu1 }
 0x38a   : > { %v4858_v8 = vpop.f32.mrb[15].mxu0  ;;  %v4920_v39 = vadd.f32 %v4919_v7, %v4918_v61  ;;  %v4921_v9 = vpop.f32.mrb[14].mxu1 }
 0x38b   : > { %v3334_v14 = vadd.f32 %v4856_v52, %v6846_v44  ;;  %v4859_v27 = vadd.f32 %v4858_v8, %v4857_v62  ;;  %v4922_v28 = vpop.f32.mrb[15].mxu1 }
 0x38c   : > { %v4923_v63 = vadd.f32 %v4922_v28, %v4921_v9 }
 0x38d   : > { %v3337_v42 = vadd.f32 %v4859_v27, %v6846_v44  ;;  %v6868_v23 = vadd.f32 %v4920_v39, %v3334_v14 }
 0x38f   : > { %v6870_v56 = vadd.f32 %v4923_v63, %v3337_v42  ;;  %v4860_v58 = vpop.f32.mrb[16].mxu0 }
 0x390   : > { %v4861_v60 = vpop.f32.mrb[17].mxu0  ;;  %v4924_v12 = vpop.f32.mrb[16].mxu1 }
 0x391   : > { %v4862_v31 = vadd.f32 %v4861_v60, %v4860_v58  ;;  %v4863_v6 = vpop.f32.mrb[18].mxu0  ;;  %v4925_v47 = vpop.f32.mrb[17].mxu1 }
 0x392   : > { %v4864_v21 = vpop.f32.mrb[19].mxu0  ;;  %v4926_v54 = vadd.f32 %v4925_v47, %v4924_v12  ;;  %v4927_v40 = vpop.f32.mrb[18].mxu1 }
 0x393   : > { %v3342_v25 = vadd.f32 %v4862_v31, %v6846_v44  ;;  %v4865_v41 = vadd.f32 %v4864_v21, %v4863_v6  ;;  %v4928_v19 = vpop.f32.mrb[19].mxu1 }
 0x394   : > { %v4929_v20 = vadd.f32 %v4928_v19, %v4927_v40 }
 0x395   : > { %v3345_v30 = vadd.f32 %v4865_v41, %v6846_v44  ;;  %v6874_v34 = vadd.f32 %v4926_v54, %v3342_v25 }
 0x397   : > { %v6876_v37 = vadd.f32 %v4929_v20, %v3345_v30  ;;  %v4866_v49 = vpop.f32.mrb[20].mxu0 }
 0x398   : > { %v4867_v18 = vpop.f32.mrb[21].mxu0  ;;  %v4930_v38 = vpop.f32.mrb[20].mxu1 }
 0x399   : > { %v4868_v0 = vadd.f32 %v4867_v18, %v4866_v49  ;;  %v4869_v43 = vpop.f32.mrb[22].mxu0  ;;  %v4931_v24 = vpop.f32.mrb[21].mxu1 }
 0x39a   : > { %v4870_v45 = vpop.f32.mrb[23].mxu0  ;;  %v4932_v35 = vadd.f32 %v4931_v24, %v4930_v38  ;;  %v4933_v50 = vpop.f32.mrb[22].mxu1 }
 0x39b   : > { %v3350_v51 = vadd.f32 %v4868_v0, %v6846_v44  ;;  %v4871_v13 = vadd.f32 %v4870_v45, %v4869_v43  ;;  %v4934_v53 = vpop.f32.mrb[23].mxu1 }
 0x39c   : > { %v4935_v59 = vadd.f32 %v4934_v53, %v4933_v50 }
 0x39d   : > { %v3353_v10 = vadd.f32 %v4871_v13, %v6846_v44  ;;  %v6880_v2 = vadd.f32 %v4932_v35, %v3350_v51 }
 0x39f   : > { %v6882_v57 = vadd.f32 %v4935_v59, %v3353_v10  ;;  %v4872_v46 = vpop.f32.mrb[24].mxu0 }
 0x3a0   : > { %v4873_v3 = vpop.f32.mrb[25].mxu0  ;;  %v4936_v29 = vpop.f32.mrb[24].mxu1 }
 0x3a1   : > { %v4874_v16 = vadd.f32 %v4873_v3, %v4872_v46  ;;  %v4875_v4 = vpop.f32.mrb[26].mxu0  ;;  %v4937_v11 = vpop.f32.mrb[25].mxu1 }
 0x3a2   : > { %v4876_v17 = vpop.f32.mrb[27].mxu0  ;;  %v4938_v32 = vadd.f32 %v4937_v11, %v4936_v29  ;;  %v4939_v15 = vpop.f32.mrb[26].mxu1 }
 0x3a3   : > { %v3358_v33 = vadd.f32 %v4874_v16, %v6846_v44  ;;  %v4877_v48 = vadd.f32 %v4876_v17, %v4875_v4  ;;  %v4940_v61 = vpop.f32.mrb[27].mxu1 }
 0x3a4   : > { %v4941_v52 = vadd.f32 %v4940_v61, %v4939_v15 }
 0x3a5   : > { %v3361_v62 = vadd.f32 %v4877_v48, %v6846_v44  ;;  %v6886_v7 = vadd.f32 %v4938_v32, %v3358_v33 }
 0x3a7   : > { %v6888_v8 = vadd.f32 %v4941_v52, %v3361_v62  ;;  %v4878_v39 = vpop.f32.mrb[28].mxu0 }
 0x3a8   : > { %v4879_v9 = vpop.f32.mrb[29].mxu0  ;;  %v4942_v14 = vpop.f32.mrb[28].mxu1 }
 0x3a9   : > { %v4880_v27 = vadd.f32 %v4879_v9, %v4878_v39  ;;  %v4881_v28 = vpop.f32.mrb[30].mxu0  ;;  %v4943_v63 = vpop.f32.mrb[29].mxu1 }
 0x3aa   : > { %v4882_v42 = vpop.f32.mrb[31].mxu0  ;;  %v4944_v58 = vadd.f32 %v4943_v63, %v4942_v14  ;;  %v4945_v60 = vpop.f32.mrb[30].mxu1 }
 0x3ab   : > { %v3366_v12 = vadd.f32 %v4880_v27, %v6846_v44  ;;  %v4883_v31 = vadd.f32 %v4882_v42, %v4881_v28  ;;  %v4946_v6 = vpop.f32.mrb[31].mxu1 }
 0x3ac   : > { %v4947_v47 = vadd.f32 %v4946_v6, %v4945_v60 }
 0x3ad   : > { %v3369_v21 = vadd.f32 %v4883_v31, %v6846_v44  ;;  %v6892_v54 = vadd.f32 %v4944_v58, %v3366_v12 }
 0x3af   : > { %v6894_v40 = vadd.f32 %v4947_v47, %v3369_v21  ;;  %v4964_v25 = vpop.f32.mrb[32].mxu0 }
 0x3b0   : > { %v4965_v41 = vpop.f32.mrb[33].mxu0  ;;  %v5028_v19 = vpop.f32.mrb[32].mxu1 }
 0x3b1   : > { %v4966_v20 = vadd.f32 %v4965_v41, %v4964_v25  ;;  %v4967_v30 = vpop.f32.mrb[34].mxu0  ;;  %v5029_v49 = vpop.f32.mrb[33].mxu1 }
 0x3b2   : > { %v4968_v18 = vpop.f32.mrb[35].mxu0  ;;  %v5030_v38 = vadd.f32 %v5029_v49, %v5028_v19  ;;  %v5031_v0 = vpop.f32.mrb[34].mxu1 }
 0x3b3   : > { %v3504_v43 = vadd.f32 %v4966_v20, %v6850_v55  ;;  %v4969_v24 = vadd.f32 %v4968_v18, %v4967_v30  ;;  %v5032_v45 = vpop.f32.mrb[35].mxu1 }
 0x3b4   : > { %v5033_v35 = vadd.f32 %v5032_v45, %v5031_v0 }
 0x3b5   : > { %v3507_v44 = vadd.f32 %v4969_v24, %v6852_v26  ;;  %v6898_v50 = vadd.f32 %v5030_v38, %v3504_v43 }
 0x3b7   : > { %v4970_v51 = vpop.f32.mrb[36].mxu0  ;;  %v6900_v13 = vadd.f32 %v5033_v35, %v3507_v44 }
 0x3b8   : > { %v4971_v53 = vpop.f32.mrb[37].mxu0  ;;  %v5034_v59 = vpop.f32.mrb[36].mxu1 }
 0x3b9   : > { %v4972_v10 = vadd.f32 %v4971_v53, %v4970_v51  ;;  %v4973_v46 = vpop.f32.mrb[38].mxu0  ;;  %v5035_v3 = vpop.f32.mrb[37].mxu1 }
 0x3ba   : > { %v4974_v29 = vpop.f32.mrb[39].mxu0  ;;  %v5036_v16 = vadd.f32 %v5035_v3, %v5034_v59  ;;  %v5037_v4 = vpop.f32.mrb[38].mxu1 }
 0x3bb   : > { %v3512_v55 = vadd.f32 %v4972_v10, %v6856_v5  ;;  %v4975_v11 = vadd.f32 %v4974_v29, %v4973_v46  ;;  %v5038_v17 = vpop.f32.mrb[39].mxu1 }
 0x3bc   : > { %v5039_v32 = vadd.f32 %v5038_v17, %v5037_v4 }
 0x3bd   : > { %v3515_v26 = vadd.f32 %v4975_v11, %v6858_v1  ;;  %v6904_v15 = vadd.f32 %v5036_v16, %v3512_v55 }
 0x3bf   : > { %v4976_v33 = vpop.f32.mrb[40].mxu0  ;;  %v6906_v48 = vadd.f32 %v5039_v32, %v3515_v26 }
 0x3c0   : > { %v4977_v61 = vpop.f32.mrb[41].mxu0  ;;  %v5040_v52 = vpop.f32.mrb[40].mxu1 }
 0x3c1   : > { %v4978_v62 = vadd.f32 %v4977_v61, %v4976_v33  ;;  %v4979_v39 = vpop.f32.mrb[42].mxu0  ;;  %v5041_v9 = vpop.f32.mrb[41].mxu1 }
 0x3c2   : > { %v4980_v14 = vpop.f32.mrb[43].mxu0  ;;  %v5042_v27 = vadd.f32 %v5041_v9, %v5040_v52  ;;  %v5043_v28 = vpop.f32.mrb[42].mxu1 }
 0x3c3   : > { %v3520_v5 = vadd.f32 %v4978_v62, %v6862_v22  ;;  %v4981_v63 = vadd.f32 %v4980_v14, %v4979_v39  ;;  %v5044_v42 = vpop.f32.mrb[43].mxu1 }
 0x3c4   : > { %v5045_v58 = vadd.f32 %v5044_v42, %v5043_v28 }
 0x3c5   : > { %v3523_v1 = vadd.f32 %v4981_v63, %v6864_v36  ;;  %v6910_v60 = vadd.f32 %v5042_v27, %v3520_v5 }
 0x3c7   : > { %v4982_v12 = vpop.f32.mrb[44].mxu0  ;;  %v6912_v31 = vadd.f32 %v5045_v58, %v3523_v1 }
 0x3c8   : > { %v4983_v6 = vpop.f32.mrb[45].mxu0  ;;  %v5046_v47 = vpop.f32.mrb[44].mxu1 }
 0x3c9   : > { %v4984_v21 = vadd.f32 %v4983_v6, %v4982_v12  ;;  %v4985_v25 = vpop.f32.mrb[46].mxu0  ;;  %v5047_v41 = vpop.f32.mrb[45].mxu1 }
 0x3ca   : > { %v4986_v19 = vpop.f32.mrb[47].mxu0  ;;  %v5048_v20 = vadd.f32 %v5047_v41, %v5046_v47  ;;  %v5049_v30 = vpop.f32.mrb[46].mxu1 }
 0x3cb   : > { %v3528_v22 = vadd.f32 %v4984_v21, %v6868_v23  ;;  %v4987_v49 = vadd.f32 %v4986_v19, %v4985_v25  ;;  %v5050_v18 = vpop.f32.mrb[47].mxu1 }
 0x3cc   : > { %v5051_v38 = vadd.f32 %v5050_v18, %v5049_v30 }
 0x3cd   : > { %v3531_v36 = vadd.f32 %v4987_v49, %v6870_v56  ;;  %v6916_v0 = vadd.f32 %v5048_v20, %v3528_v22 }
 0x3cf   : > { %v4988_v43 = vpop.f32.mrb[48].mxu0  ;;  %v6918_v24 = vadd.f32 %v5051_v38, %v3531_v36 }
 0x3d0   : > { %v4989_v45 = vpop.f32.mrb[49].mxu0  ;;  %v5052_v35 = vpop.f32.mrb[48].mxu1 }
 0x3d1   : > { %v4990_v44 = vadd.f32 %v4989_v45, %v4988_v43  ;;  %v4991_v51 = vpop.f32.mrb[50].mxu0  ;;  %v5053_v53 = vpop.f32.mrb[49].mxu1 }
 0x3d2   : > { %v4992_v59 = vpop.f32.mrb[51].mxu0  ;;  %v5054_v10 = vadd.f32 %v5053_v53, %v5052_v35  ;;  %v5055_v46 = vpop.f32.mrb[50].mxu1 }
 0x3d3   : > { %v3536_v23 = vadd.f32 %v4990_v44, %v6874_v34  ;;  %v4993_v3 = vadd.f32 %v4992_v59, %v4991_v51  ;;  %v5056_v29 = vpop.f32.mrb[51].mxu1 }
 0x3d4   : > { %v5057_v16 = vadd.f32 %v5056_v29, %v5055_v46 }
 0x3d5   : > { %v3539_v56 = vadd.f32 %v4993_v3, %v6876_v37  ;;  %v3633_v4 = vadd.f32 %v5054_v10, %v3536_v23 }
 0x3d7   : > { %v4994_v55 = vpop.f32.mrb[52].mxu0  ;;  %v6922_v11 = vadd.f32 %v5057_v16, %v3539_v56 }
 0x3d8   : > { %v4995_v17 = vpop.f32.mrb[53].mxu0  ;;  %v5058_v32 = vpop.f32.mrb[52].mxu1 }
 0x3d9   : > { %v4996_v26 = vadd.f32 %v4995_v17, %v4994_v55  ;;  %v4997_v33 = vpop.f32.mrb[54].mxu0  ;;  %v5059_v61 = vpop.f32.mrb[53].mxu1 }
 0x3da   : > { %v4998_v52 = vpop.f32.mrb[55].mxu0  ;;  %v5060_v62 = vadd.f32 %v5059_v61, %v5058_v32  ;;  %v5061_v39 = vpop.f32.mrb[54].mxu1 }
 0x3db   : > { %v3544_v9 = vadd.f32 %v4996_v26, %v6880_v2  ;;  %v4999_v34 = vadd.f32 %v4998_v52, %v4997_v33  ;;  %v5062_v14 = vpop.f32.mrb[55].mxu1 }
 0x3dc   : > { %v5063_v27 = vadd.f32 %v5062_v14, %v5061_v39 }
 0x3dd   : > { %v3547_v28 = vadd.f32 %v4999_v34, %v6882_v57  ;;  %v3641_v37 = vadd.f32 %v5060_v62, %v3544_v9 }
 0x3df   : > { %v5000_v5 = vpop.f32.mrb[56].mxu0  ;;  %v3644_v63 = vadd.f32 %v5063_v27, %v3547_v28 }
 0x3e0   : > { %v5001_v42 = vpop.f32.mrb[57].mxu0  ;;  %v5064_v58 = vpop.f32.mrb[56].mxu1 }
 0x3e1   : > { %v5002_v1 = vadd.f32 %v5001_v42, %v5000_v5  ;;  %v5003_v12 = vpop.f32.mrb[58].mxu0  ;;  %v5065_v6 = vpop.f32.mrb[57].mxu1 }
 0x3e2   : > { %v5004_v47 = vpop.f32.mrb[59].mxu0  ;;  %v5066_v21 = vadd.f32 %v5065_v6, %v5064_v58  ;;  %v5067_v25 = vpop.f32.mrb[58].mxu1 }
 0x3e3   : > { %v3552_v41 = vadd.f32 %v5002_v1, %v6886_v7  ;;  %v5005_v19 = vadd.f32 %v5004_v47, %v5003_v12  ;;  %v5068_v2 = vpop.f32.mrb[59].mxu1 }
 0x3e4   : > { %v5069_v20 = vadd.f32 %v5068_v2, %v5067_v25 }
 0x3e5   : > { %v3555_v30 = vadd.f32 %v5005_v19, %v6888_v8  ;;  %v3649_v22 = vadd.f32 %v5066_v21, %v3552_v41 }
 0x3e7   : > { %v5006_v57 = vpop.f32.mrb[60].mxu0  ;;  %v6928_v49 = vadd.f32 %v5069_v20, %v3555_v30 }
 0x3e8   : > { %v5007_v18 = vpop.f32.mrb[61].mxu0  ;;  %v5070_v38 = vpop.f32.mrb[60].mxu1 }
 0x3e9   : > { %v5008_v36 = vadd.f32 %v5007_v18, %v5006_v57  ;;  %v5009_v43 = vpop.f32.mrb[62].mxu0  ;;  %v5071_v45 = vpop.f32.mrb[61].mxu1 }
 0x3ea   : > { %v5010_v35 = vpop.f32.mrb[63].mxu0  ;;  %v5072_v44 = vadd.f32 %v5071_v45, %v5070_v38  ;;  %v5073_v51 = vpop.f32.mrb[62].mxu1 }
 0x3eb   : > { %v3560_v7 = vadd.f32 %v5008_v36, %v6892_v54  ;;  %v5011_v53 = vadd.f32 %v5010_v35, %v5009_v43  ;;  %v5074_v59 = vpop.f32.mrb[63].mxu1 }
 0x3ec   : > { %v5075_v10 = vadd.f32 %v5074_v59, %v5073_v51 }
 0x3ed   : > { %v3563_v8 = vadd.f32 %v5011_v53, %v6894_v40  ;;  %v3657_v46 = vadd.f32 %v5072_v44, %v3560_v7 }
 0x3ef   : > { %v5142_v23 = vpop.f32.mrb[64].mxu0  ;;  %v3660_v3 = vadd.f32 %v5075_v10, %v3563_v8 }
 0x3f0   : > { %v3706_v29 = vadd.f32 %v5142_v23, %v6904_v15  ;;  %v5150_v16 = vpop.f32.mrb[64].mxu1  ;;  %v3697_v56 = vpop.f32.mrb[65].mxu0 }
 0x3f1   : > { %v6933_v55 = vadd.f32 %v5150_v16, %v3641_v37  ;;  %v3698_v17 = vadd.f32 %v3697_v56, %v6898_v50  ;;  %v3729_v32 = vpop.f32.mrb[65].mxu1  ;;  %v5143_v26 = vpop.f32.mrb[66].mxu0 }
 0x3f2   : > { %3763 = vst [vmem:[%s6937_s25 + $0x10] sm:$0xff] %v3706_v29  ;;  %v3730_v54 = vadd.f32 %v3729_v32, %v3633_v4  ;;  %v3709_v40 = vadd.f32 %v5143_v26, %v6906_v48  ;;  %v5151_v15 = vpop.f32.mrb[66].mxu1  ;;  %v3700_v33 = vpop.f32.mrb[67].mxu0  ;;  %v3804_v9 = vmul.f32 %v3706_v29, %v3706_v29 }
 0x3f3   : > { %3771 = vst [vmem:[%s6937_s25 + $0x50] sm:$0xff] %v6933_v55  ;;  %3761 = vst [vmem:[%s6937_s25] sm:$0xff] %v3698_v17  ;;  %v6944_v50 = vadd.f32 %v5151_v15, %v3644_v63  ;;  %v3701_v61 = vadd.f32 %v3700_v33, %v6900_v13  ;;  %v3732_v52 = vpop.f32.mrb[67].mxu1  ;;  %v3802_v39 = vmul.f32 %v3698_v17, %v3698_v17 }
 0x3f4   : > { %3769 = vst [vmem:[%s6937_s25 + $0x40] sm:$0xff] %v3730_v54  ;;  %3764 = vst [vmem:[%s6937_s25 + $0x18] sm:$0xff] %v3709_v40  ;;  %v3733_v62 = vadd.f32 %v3732_v52, %v6922_v11  ;;  %v3805_v28 = vmul.f32 %v3709_v40, %v3709_v40  ;;  %v3810_v44 = vmul.f32 %v3730_v54, %v3730_v54 }
 0x3f5   : > { %3772 = vst [vmem:[%s6937_s25 + $0x58] sm:$0xff] %v6944_v50  ;;  %3762 = vst [vmem:[%s6937_s25 + $0x8] sm:$0xff] %v3701_v61  ;;  %v3778_v48 = vadd.f32 %v3701_v61, %v3698_v17  ;;  %v3803_v4 = vmul.f32 %v3701_v61, %v3701_v61 }
 0x3f6   : > { %3770 = vst [vmem:[%s6937_s25 + $0x48] sm:$0xff] %v3733_v62  ;;  %v3811_v53 = vmul.f32 %v3733_v62, %v3733_v62 }
 0x3f7   : > { %v3779_v34 = vadd.f32 %v3778_v48, %v3706_v29  ;;  %v3818_v14 = vadd.f32 %v3803_v4, %v3802_v39  ;;  %v5146_v27 = vpop.f32.mrb[68].mxu0 }
 0x3f8   : > { %v3722_v13 = vadd.f32 %v5146_v27, %v6916_v0  ;;  %v5154_v37 = vpop.f32.mrb[68].mxu1  ;;  %v3713_v5 = vpop.f32.mrb[69].mxu0 }
 0x3f9   : > { %v3819_v11 = vadd.f32 %v3818_v14, %v3804_v9  ;;  %v3754_v63 = vadd.f32 %v5154_v37, %v3657_v46  ;;  %v3714_v42 = vadd.f32 %v3713_v5, %v6910_v60  ;;  %v3780_v58 = vadd.f32 %v3779_v34, %v3709_v40  ;;  %v3745_v1 = vpop.f32.mrb[69].mxu1  ;;  %v5147_v12 = vpop.f32.mrb[70].mxu0  ;;  %v3801_v5 = vld [vmem:[#allocation9] sm:$0x1] }
 0x3fa   : > { %3767 = vst [vmem:[%s6937_s25 + $0x30] sm:$0xff] %v3722_v13  ;;  %v3746_v6 = vadd.f32 %v3745_v1, %v3649_v22  ;;  %v3725_v47 = vadd.f32 %v5147_v12, %v6918_v24  ;;  %v5155_v21 = vpop.f32.mrb[70].mxu1  ;;  %v3716_v25 = vpop.f32.mrb[71].mxu0  ;;  %v3808_v18 = vmul.f32 %v3722_v13, %v3722_v13  ;;  %v3813_v46 = vmul.f32 %v6944_v50, %v6944_v50 }
 0x3fb   : > { %3775 = vst [vmem:[%s6937_s25 + $0x70] sm:$0xff] %v3754_v63  ;;  %3765 = vst [vmem:[%s6937_s25 + $0x20] sm:$0xff] %v3714_v42  ;;  %v3781_v0 = vadd.f32 %v3780_v58, %v3714_v42  ;;  %v3806_v41 = vmul.f32 %v3714_v42, %v3714_v42  ;;  %v3820_v19 = vadd.f32 %v3819_v11, %v3805_v28  ;;  %v3748_v2 = vpop.f32.mrb[71].mxu1  ;;  %v3777_v28 = vld [vmem:[#allocation8] sm:$0x1] }
 0x3fc   : > { %3773 = vst [vmem:[%s6937_s25 + $0x60] sm:$0xff] %v3746_v6  ;;  %3768 = vst [vmem:[%s6937_s25 + $0x38] sm:$0xff] %v3725_v47  ;;  %v3757_v60 = vadd.f32 %v5155_v21, %v3660_v3  ;;  %v3717_v20 = vadd.f32 %v3716_v25, %v6912_v31  ;;  %v3749_v22 = vadd.f32 %v3748_v2, %v6928_v49 }
 0x3fd   : > { %v3821_v30 = vadd.f32 %v3820_v19, %v3806_v41  ;;  %v3809_v43 = vmul.f32 %v3725_v47, %v3725_v47  ;;  %v3812_v49 = vmul.f32 %v6933_v55, %v6933_v55  ;;  %v3814_v29 = vmul.f32 %v3746_v6, %v3746_v6 }
 0x3fe   : > { %3776 = vst [vmem:[%s6937_s25 + $0x78] sm:$0xff] %v3757_v60  ;;  %3766 = vst [vmem:[%s6937_s25 + $0x28] sm:$0xff] %v3717_v20  ;;  %v3782_v24 = vadd.f32 %v3781_v0, %v3717_v20  ;;  %v3807_v57 = vmul.f32 %v3717_v20, %v3717_v20  ;;  %v3815_v32 = vmul.f32 %v3749_v22, %v3749_v22 }
 0x3ff   : > { %3774 = vst [vmem:[%s6937_s25 + $0x68] sm:$0xff] %v3749_v22  ;;  %v3817_v33 = vmul.f32 %v3757_v60, %v3757_v60 }
 0x400   : > { %v3783_v38 = vadd.f32 %v3782_v24, %v3722_v13  ;;  %v3822_v36 = vadd.f32 %v3821_v30, %v3807_v57 }
 0x402   : > { %v3784_v45 = vadd.f32 %v3783_v38, %v3725_v47  ;;  %v3823_v35 = vadd.f32 %v3822_v36, %v3808_v18 }
 0x404   : > { %v3785_v51 = vadd.f32 %v3784_v45, %v3730_v54  ;;  %v3824_v7 = vadd.f32 %v3823_v35, %v3809_v43  ;;  %v3816_v54 = vmul.f32 %v3754_v63, %v3754_v63 }
 0x406   : > { %v3825_v59 = vadd.f32 %v3824_v7, %v3810_v44  ;;  %v3786_v31 = vadd.f32 %v3785_v51, %v3733_v62 }
 0x408   : > { %v3787_v10 = vadd.f32 %v3786_v31, %v6933_v55  ;;  %v3826_v8 = vadd.f32 %v3825_v59, %v3811_v53 }
 0x40a   : > { %v3788_v23 = vadd.f32 %v3787_v10, %v6944_v50  ;;  %v3827_v3 = vadd.f32 %v3826_v8, %v3812_v49 }
 0x40c   : > { %v3789_v16 = vadd.f32 %v3788_v23, %v3746_v6  ;;  %v3828_v56 = vadd.f32 %v3827_v3, %v3813_v46 }
 0x40e   : > { %v3790_v17 = vadd.f32 %v3789_v16, %v3749_v22  ;;  %v3829_v26 = vadd.f32 %v3828_v56, %v3814_v29 }
 0x410   : > { %v3791_v40 = vadd.f32 %v3790_v17, %v3754_v63  ;;  %v3830_v15 = vadd.f32 %v3829_v26, %v3815_v32 }
 0x412   : > { %v3792_v61 = vadd.f32 %v3791_v40, %v3757_v60  ;;  %v3831_v52 = vadd.f32 %v3830_v15, %v3816_v54 }
 0x414   : > { %v3793_v55 = vrot.slane %v3792_v61, 4  ;;  %v3832_v62 = vadd.f32 %v3831_v52, %v3817_v33 }
 0x416   : > { %v3794_v39 = vadd.f32 %v3793_v55, %v3792_v61  ;;  %v3833_v48 = vrot.slane %v3832_v62, 4 }
 0x418   : > { %v3795_v4 = vrot.slane %v3794_v39, 2  ;;  %v3834_v9 = vadd.f32 %v3833_v48, %v3832_v62 }
 0x41a   : > { %v3796_v50 = vadd.f32 %v3795_v4, %v3794_v39  ;;  %v3835_v34 = vrot.slane %v3834_v9, 2 }
 0x41c   : > { %v3797_v14 = vrot.slane %v3796_v50, 1  ;;  %v3836_v27 = vadd.f32 %v3835_v34, %v3834_v9 }
 0x41e   : > { %v3798_v13 = vadd.f32 %v3797_v14, %v3796_v50  ;;  %v3837_v37 = vrot.slane %v3836_v27, 1 }
 0x420   : > { %v3799_v11 = vadd.f32 %v3798_v13, %v3777_v28  ;;  %v3838_v63 = vadd.f32 %v3837_v37, %v3836_v27 }
 0x422   : > { %3800 = vst [vmem:[#allocation8] sm:$0x1] %v3799_v11  ;;  %v3839_v42 = vadd.f32 %v3838_v63, %v3801_v5 }
 0x424   : > { %3840 = vst [vmem:[#allocation9] sm:$0x1] %v3839_v42 }
 0x425 PF: > { %p4506_p1 = scmp.ne.s32.totalorder %s5431_s11, 4 }
 0x426   : > { %v3876_v0 = vlaneseq (!%p4506_p1)  ;;  %v3853_v19 = vld [vmem:[%s7088_s7] sm:$0x1] (!%p4506_p1)  ;;  %s6981_s29 = scalar_lea.vmem (!%p4506_p1), [#allocation5], %s5552_s26  ;;  %s7029_s23 = scalar_lea.vmem (!%p4506_p1), %s7090_s9, %s5552_s26 }
 0x427   : > { %3844 = sbr.rel (%p4506_p1) target bundleno = 1114 (0x45a), region = 80  ;;  %v3855_v30 = vld [vmem:[%s7089_s8] sm:$0x1] (!%p4506_p1)  ;;  %v3860_v24 = vld [vmem:[%s6981_s29 + $0x8] sm:$0xff] (!%p4506_p1)  ;;  %v3861_v57 = vld [vmem:[%s6981_s29 + $0x10] sm:$0xff] (!%p4506_p1) }
 0x428   : > { %v3877_v41 = vshrl.u32 (!%p4506_p1), %v3876_v0, 7  ;;  %v3859_v22 = vld [vmem:[%s6981_s29] sm:$0xff] (!%p4506_p1)  ;;  %v3862_v18 = vld [vmem:[%s6981_s29 + $0x18] sm:$0xff] (!%p4506_p1)  ;;  %v3864_v45 = vld [vmem:[%s6981_s29 + $0x28] sm:$0xff] (!%p4506_p1) }
 0x429   : > { %v3845_v58 = vld [vmem:[#allocation8] sm:$0x1] (!%p4506_p1)  ;;  %v3865_v35 = vld [vmem:[%s6981_s29 + $0x30] sm:$0xff] (!%p4506_p1)  ;;  %v3866_v44 = vld [vmem:[%s6981_s29 + $0x38] sm:$0xff] (!%p4506_p1) }
 0x42a   : > { %v3846_v12 = vmul.f32 (!%p4506_p1), 0.001953125, %v3845_v58  ;;  %v3878_v2 = vsub.s32 (!%p4506_p1), 0, %v3877_v41  ;;  %v3863_v38 = vld [vmem:[%s6981_s29 + $0x20] sm:$0xff] (!%p4506_p1)  ;;  %v3868_v7 = vld [vmem:[%s6981_s29 + $0x48] sm:$0xff] (!%p4506_p1)  ;;  %v3869_v53 = vld [vmem:[%s6981_s29 + $0x50] sm:$0xff] (!%p4506_p1) }
 0x42b   : > { %v3847_v1 = vld [vmem:[#allocation9] sm:$0x1] (!%p4506_p1)  ;;  %v3870_v8 = vld [vmem:[%s6981_s29 + $0x58] sm:$0xff] (!%p4506_p1)  ;;  %v3872_v23 = vld [vmem:[%s6981_s29 + $0x68] sm:$0xff] (!%p4506_p1) }
 0x42c   : > { %v3848_v6 = vmul.f32 (!%p4506_p1), 0.001953125, %v3847_v1  ;;  %v3849_v47 = vmul.f32 (!%p4506_p1), %v3846_v12, %v3846_v12  ;;  %v3867_v51 = vld [vmem:[%s6981_s29 + $0x40] sm:$0xff] (!%p4506_p1) }
 0x42d   : > { %v3871_v46 = vld [vmem:[%s6981_s29 + $0x60] sm:$0xff] (!%p4506_p1) }
 0x42e   : > { %v3850_v21 = vsub.f32 %v3848_v6, %v3849_v47 }
 0x430   : > { %v3851_v25 = vadd.f32 1e-05, %v3850_v21 }
 0x432   : > { %5391 = vrsqrt.f32 %v3851_v25 }
 0x43c   : > { %v5392_v60 = vpop.eup %5391 }
 0x43d   : > { %v3854_v20 = vmul.f32 %v5392_v60, %v3853_v19 }
 0x43f   : > { %v3856_v36 = vmul.f32 %v3854_v20, %v3846_v12  ;;  %v6988_v43 = vrot.slane %v3854_v20, %v3878_v2  ;;  %v3873_v20 = vld [vmem:[%s6981_s29 + $0x70] sm:$0xff] }
 0x441   : > { %v3857_v59 = vsub.f32 %v3855_v30, %v3856_v36  ;;  %v3881_v31 = vmul.f32 %v6988_v43, %v3859_v22  ;;  %v3882_v49 = vmul.f32 %v6988_v43, %v3860_v24  ;;  %v3883_v10 = vmul.f32 %v6988_v43, %v3861_v57  ;;  %v3874_v30 = vld [vmem:[%s6981_s29 + $0x78] sm:$0xff] }
 0x442   : > { %v3884_v3 = vmul.f32 %v6988_v43, %v3862_v18  ;;  %v3885_v29 = vmul.f32 %v6988_v43, %v3863_v38  ;;  %v3886_v16 = vmul.f32 %v6988_v43, %v3864_v45  ;;  %v3887_v56 = vmul.f32 %v6988_v43, %v3865_v35 }
 0x443   : > { %v7006_v17 = vrot.slane %v3857_v59, %v3878_v2  ;;  %v3888_v32 = vmul.f32 %v6988_v43, %v3866_v44  ;;  %v3889_v26 = vmul.f32 %v6988_v43, %v3867_v51  ;;  %v3890_v54 = vmul.f32 %v6988_v43, %v3868_v7 }
 0x444   : > { %v3891_v40 = vmul.f32 %v6988_v43, %v3869_v53  ;;  %v3892_v15 = vmul.f32 %v6988_v43, %v3870_v8  ;;  %v3893_v33 = vmul.f32 %v6988_v43, %v3871_v46  ;;  %v7015_v61 = vmul.f32 %v6988_v43, %v3872_v23 }
 0x445   : > { %v3903_v52 = vadd.f32 %v7006_v17, %v3881_v31  ;;  %v3904_v55 = vadd.f32 %v7006_v17, %v3882_v49  ;;  %v3905_v62 = vadd.f32 %v7006_v17, %v3883_v10  ;;  %v3906_v39 = vadd.f32 %v7006_v17, %v3884_v3 }
 0x446   : > { %v3907_v48 = vadd.f32 %v7006_v17, %v3885_v29  ;;  %v3908_v4 = vadd.f32 %v7006_v17, %v3886_v16  ;;  %v3909_v9 = vadd.f32 %v7006_v17, %v3887_v56  ;;  %v3910_v50 = vadd.f32 %v7006_v17, %v3888_v32 }
 0x447   : > { %vm3919_vm0 = vcmp.gt.f32.partialorder %v3903_v52, 0.0  ;;  %v3935_v34 = vmul.f32 0.2, %v3903_v52  ;;  %vm3920_vm1 = vcmp.gt.f32.partialorder %v3904_v55, 0.0  ;;  %v3936_v14 = vmul.f32 0.2, %v3904_v55 }
 0x448   : > { %vm3921_vm2 = vcmp.gt.f32.partialorder %v3905_v62, 0.0  ;;  %v3937_v27 = vmul.f32 0.2, %v3905_v62  ;;  %vm3922_vm3 = vcmp.gt.f32.partialorder %v3906_v39, 0.0  ;;  %v3938_v28 = vmul.f32 0.2, %v3906_v39 }
 0x449   : > { %v3951_v13 = vsel %vm3919_vm0, %v3903_v52, %v3935_v34  ;;  %v3952_v37 = vsel %vm3920_vm1, %v3904_v55, %v3936_v14  ;;  %vm3923_vm4 = vcmp.gt.f32.partialorder %v3907_v48, 0.0  ;;  %v3939_v5 = vmul.f32 0.2, %v3907_v48 }
 0x44a   : > { %3968 = vst [vmem:[%s7029_s23] sm:$0xff] %v3951_v13  ;;  %3969 = vst [vmem:[%s7029_s23 + $0x8] sm:$0xff] %v3952_v37  ;;  %v3953_v11 = vsel %vm3921_vm2, %v3905_v62, %v3937_v27  ;;  %v3954_v63 = vsel %vm3922_vm3, %v3906_v39, %v3938_v28  ;;  %vm3924_vm5 = vcmp.gt.f32.partialorder %v3908_v4, 0.0  ;;  %v3940_v42 = vmul.f32 0.2, %v3908_v4 }
 0x44b   : > { %3970 = vst [vmem:[%s7029_s23 + $0x10] sm:$0xff] %v3953_v11  ;;  %3971 = vst [vmem:[%s7029_s23 + $0x18] sm:$0xff] %v3954_v63  ;;  %v3955_v58 = vsel %vm3923_vm4, %v3907_v48, %v3939_v5  ;;  %vm3925_vm6 = vcmp.gt.f32.partialorder %v3909_v9, 0.0  ;;  %v3941_v1 = vmul.f32 0.2, %v3909_v9  ;;  %vm3926_vm7 = vcmp.gt.f32.partialorder %v3910_v50, 0.0 }
 0x44c   : > { %3972 = vst [vmem:[%s7029_s23 + $0x20] sm:$0xff] %v3955_v58  ;;  %v3956_v12 = vsel %vm3924_vm5, %v3908_v4, %v3940_v42  ;;  %v3942_v6 = vmul.f32 0.2, %v3910_v50  ;;  %v3911_v47 = vadd.f32 %v7006_v17, %v3889_v26  ;;  %v3912_v21 = vadd.f32 %v7006_v17, %v3890_v54 }
 0x44d   : > { %3973 = vst [vmem:[%s7029_s23 + $0x28] sm:$0xff] %v3956_v12  ;;  %v3957_v25 = vsel %vm3925_vm6, %v3909_v9, %v3941_v1  ;;  %v3913_v0 = vadd.f32 %v7006_v17, %v3891_v40  ;;  %v3914_v41 = vadd.f32 %v7006_v17, %v3892_v15  ;;  %v3915_v19 = vadd.f32 %v7006_v17, %v3893_v33 }
 0x44e   : > { %3974 = vst [vmem:[%s7029_s23 + $0x30] sm:$0xff] %v3957_v25  ;;  %v3958_v2 = vsel %vm3926_vm7, %v3910_v50, %v3942_v6  ;;  %vm3927_vm8 = vcmp.gt.f32.partialorder %v3911_v47, 0.0  ;;  %v3943_v60 = vmul.f32 0.2, %v3911_v47  ;;  %vm3928_vm9 = vcmp.gt.f32.partialorder %v3912_v21, 0.0 }
 0x44f   : > { %3975 = vst [vmem:[%s7029_s23 + $0x38] sm:$0xff] %v3958_v2  ;;  %v3944_v22 = vmul.f32 0.2, %v3912_v21  ;;  %vm3929_vm10 = vcmp.gt.f32.partialorder %v3913_v0, 0.0  ;;  %v3945_v24 = vmul.f32 0.2, %v3913_v0  ;;  %v3916_v35 = vadd.f32 %v7006_v17, %v7015_v61 }
 0x450   : > { %vm3930_vm11 = vcmp.gt.f32.partialorder %v3914_v41, 0.0  ;;  %v3959_v57 = vsel %vm3927_vm8, %v3911_v47, %v3943_v60  ;;  %v3946_v18 = vmul.f32 0.2, %v3914_v41  ;;  %vm3931_vm12 = vcmp.gt.f32.partialorder %v3915_v19, 0.0 }
 0x451   : > { %v3947_v38 = vmul.f32 0.2, %v3915_v19  ;;  %3976 = vst [vmem:[%s7029_s23 + $0x40] sm:$0xff] %v3959_v57  ;;  %v3960_v36 = vsel %vm3928_vm9, %v3912_v21, %v3944_v22  ;;  %v3961_v45 = vsel %vm3929_vm10, %v3913_v0, %v3945_v24  ;;  %v3895_v44 = vmul.f32 %v6988_v43, %v3873_v20 }
 0x452   : > { %3977 = vst [vmem:[%s7029_s23 + $0x48] sm:$0xff] %v3960_v36  ;;  %3978 = vst [vmem:[%s7029_s23 + $0x50] sm:$0xff] %v3961_v45  ;;  %v3962_v51 = vsel %vm3930_vm11, %v3914_v41, %v3946_v18  ;;  %v3896_v53 = vmul.f32 %v6988_v43, %v3874_v30  ;;  %vm3932_vm13 = vcmp.gt.f32.partialorder %v3916_v35, 0.0  ;;  %v3948_v59 = vmul.f32 0.2, %v3916_v35 }
 0x453   : > { %v3963_v7 = vsel %vm3931_vm12, %v3915_v19, %v3947_v38  ;;  %3979 = vst [vmem:[%s7029_s23 + $0x58] sm:$0xff] %v3962_v51  ;;  %v3917_v31 = vadd.f32 %v7006_v17, %v3895_v44 }
 0x454   : > { %3980 = vst [vmem:[%s7029_s23 + $0x60] sm:$0xff] %v3963_v7  ;;  %v3918_v49 = vadd.f32 %v7006_v17, %v3896_v53  ;;  %v3964_v10 = vsel %vm3932_vm13, %v3916_v35, %v3948_v59 }
 0x455   : > { %vm3933_vm14 = vcmp.gt.f32.partialorder %v3917_v31, 0.0  ;;  %v3949_v8 = vmul.f32 0.2, %v3917_v31  ;;  %3981 = vst [vmem:[%s7029_s23 + $0x68] sm:$0xff] %v3964_v10 }
 0x456   : > { %vm3934_vm15 = vcmp.gt.f32.partialorder %v3918_v49, 0.0  ;;  %v3950_v46 = vmul.f32 0.2, %v3918_v49 }
 0x457   : > { %v3965_v23 = vsel %vm3933_vm14, %v3917_v31, %v3949_v8 }
 0x458   : > { %3982 = vst [vmem:[%s7029_s23 + $0x70] sm:$0xff] %v3965_v23  ;;  %v3966_v3 = vsel %vm3934_vm15, %v3918_v49, %v3950_v46 }
 0x459   : > { %3983 = vst [vmem:[%s7029_s23 + $0x78] sm:$0xff] %v3966_v3 }
 0x45a PF: > { %s19_s15 = sadd.s32 1, %s5447_s15   ;;  %s7093_s26 = sld [smem:[#allocation10_spill]] }
 0x45b   : > { %p16_p2 = scmp.ge.s32.totalorder %s19_s15, 22   ;;  %s7094_s24 = sld [smem:[#allocation11_spill]] }
 0x45c   : > { %s7095_s30 = smov %s5435_s12  ;;  %s7096_s10 = smov %s5439_s13 }
 0x45d   : > { %s7097_s11 = smov %s5443_s14  ;;  %s7098_s12 = smov %s7102_s16 }
 0x45e   :  { %18 = sbr.rel (!%p16_p2) target bundleno = 4 (0x4), region = 119 }
 0x460   : > { %s7099_s13 = smov %s7093_s26 }
 0x461   : > { %s7100_s14 = smov %s7094_s24 }

</bundles_post_ra>
